<compile_context>
chip_gen: v5e
topology: v5e:2x2
jax: 0.10.0
libtpu: 0.0.40
codegen_flags: <defaults>
</compile_context>

<pallas_src>
import math

import jax
import jax.numpy as jnp
from jax import lax
from jax.experimental import pallas as pl
from jax.experimental.pallas import tpu as pltpu


# ----------------------------------------------------------------------------
# Fused kernel: all encoders of the stack for one batch element per grid step.
# ----------------------------------------------------------------------------
def _make_stack_kernel(inp_lens, L, D):
    seqs = [L // (2 ** i) for i in inp_lens]
    x_offs = [L - s for s in seqs]
    y_offs, off = [], 0
    for s in seqs:
        y_offs.append(off)
        off += s
    total = off
    scale = 1.0 / math.sqrt(D)

    def kernel(x_ref,                                   # (1, L, D)
               wqkv_ref, bqkv_ref, wo_ref, bo_ref,      # stacked params (E, ...)
               w1_ref, b1_ref, w2_ref, b2_ref,
               g1_ref, be1_ref, g2_ref, be2_ref,
               y_ref,                                    # (1, total, D)
               *attn_refs):                              # (1, S_e, S_e) each
        x = x_ref[0]                                     # (L, D)

        def layer_norm(h, g, b):
            mu = jnp.mean(h, axis=-1, keepdims=True)
            hc = h - mu
            var = jnp.mean(hc * hc, axis=-1, keepdims=True)
            return hc * lax.rsqrt(var + 1e-5) * g + b

        for e in range(len(seqs)):
            S, ox, oy = seqs[e], x_offs[e], y_offs[e]
            xs = x[ox:ox + S, :]                         # (S, D) static slice

            # Fused QKV projection; with D = 128 the column splits below are
            # 128-lane aligned, so no cross-lane relayout is needed.
            qkv = (jnp.dot(xs, wqkv_ref[e], preferred_element_type=jnp.float32)
                   + bqkv_ref[e])                        # (S, 3D)
            q = qkv[:, 0 * D:1 * D]
            k = qkv[:, 1 * D:2 * D]
            v = qkv[:, 2 * D:3 * D]

            # Scaled dot-product attention, softmax over keys.
            scores = lax.dot_general(
                q, k, (((1,), (1,)), ((), ())),
                preferred_element_type=jnp.float32) * scale          # (S, S)
            m = jnp.max(scores, axis=-1, keepdims=True)
            p = jnp.exp(scores - m)
            attn = p * pl.reciprocal(jnp.sum(p, axis=-1, keepdims=True),
                                     approx=True)
            attn_refs[e][...] = attn[None].astype(attn_refs[e].dtype)

            ctx = jnp.dot(attn, v, preferred_element_type=jnp.float32)   # (S, D)
            attn_out = (jnp.dot(ctx, wo_ref[e],
                                preferred_element_type=jnp.float32) + bo_ref[e])

            x1 = layer_norm(xs + attn_out, g1_ref[e], be1_ref[e])

            h1 = jnp.maximum(
                jnp.dot(x1, w1_ref[e], preferred_element_type=jnp.float32)
                + b1_ref[e], 0.0)
            ff = (jnp.dot(h1, w2_ref[e], preferred_element_type=jnp.float32)
                  + b2_ref[e])
            y_e = layer_norm(x1 + ff, g2_ref[e], be2_ref[e])

            # Write straight into the concatenated output (no wrapper concat);
            # rows are exactly one 128-lane tile -> unmasked lane-dense store.
            y_ref[:, oy:oy + S, :] = y_e[None].astype(y_ref.dtype)

    return kernel, seqs, total


# ----------------------------------------------------------------------------
# EncoderStack.forward: single pallas_call over a batch-parallel grid.
# ----------------------------------------------------------------------------
def encoder_stack_forward(x, params, inp_lens):
    B, L, D = x.shape
    kernel, seqs, total = _make_stack_kernel(inp_lens, L, D)

    def full_spec(arr):
        nd = arr.ndim
        return pl.BlockSpec(arr.shape, lambda b, _n=nd: (0,) * _n)

    grid_spec = pltpu.PrefetchScalarGridSpec(
        num_scalar_prefetch=0,
        grid=(B,),
        in_specs=[pl.BlockSpec((1, L, D), lambda b: (b, 0, 0))]
                 + [full_spec(p) for p in params],
        out_specs=[pl.BlockSpec((1, total, D), lambda b: (b, 0, 0))]
                  + [pl.BlockSpec((1, s, s), lambda b: (b, 0, 0)) for s in seqs],
    )
    out_shape = tuple(
        [jax.ShapeDtypeStruct((B, total, D), x.dtype)]
        + [jax.ShapeDtypeStruct((B, s, s), jnp.float32) for s in seqs])

    outs = pl.pallas_call(
        kernel,
        out_shape=out_shape,
        grid_spec=grid_spec,
        compiler_params=pltpu.CompilerParams(
            dimension_semantics=("parallel",)),
    )(x, *params)
    return outs[0], list(outs[1:])


# ----------------------------------------------------------------------------
# Deterministic parameters (PyTorch Linear-style init), stacked per encoder.
# ----------------------------------------------------------------------------
def init_stacked_params(key, num_encoders, d_model, d_ff):
    def one_encoder(k):
        ks = jax.random.split(k, 12)

        def lin(kw, kb, fan_in, fan_out):
            bound = 1.0 / math.sqrt(fan_in)
            w = jax.random.uniform(kw, (fan_in, fan_out), jnp.float32, -bound, bound)
            b = jax.random.uniform(kb, (1, fan_out), jnp.float32, -bound, bound)
            return w, b

        wq, bq = lin(ks[0], ks[1], d_model, d_model)
        wk, bk = lin(ks[2], ks[3], d_model, d_model)
        wv, bv = lin(ks[4], ks[5], d_model, d_model)
        wo, bo = lin(ks[6], ks[7], d_model, d_model)
        w1, b1 = lin(ks[8], ks[9], d_model, d_ff)
        w2, b2 = lin(ks[10], ks[11], d_ff, d_model)

        # Hoisted preprocessing: fuse Q/K/V once at init time (d_model >= 128
        # keeps each chunk 128-lane aligned inside the kernel).
        wqkv = jnp.concatenate([wq, wk, wv], axis=1)   # (D, 3D)
        bqkv = jnp.concatenate([bq, bk, bv], axis=1)   # (1, 3D)

        ones = jnp.ones((1, d_model), jnp.float32)
        zeros = jnp.zeros((1, d_model), jnp.float32)
        return (wqkv, bqkv, wo, bo, w1, b1, w2, b2, ones, zeros, ones, zeros)

    per_enc = [one_encoder(k) for k in jax.random.split(key, num_encoders)]
    # Stack each parameter across encoders; the kernel statically indexes the
    # leading encoder axis.
    return tuple(jnp.stack([pe[i] for pe in per_enc], axis=0)
                 for i in range(len(per_enc[0])))


# ----------------------------------------------------------------------------
# Pure-JAX reference for correctness checking.
# ----------------------------------------------------------------------------
def _reference_forward(x, params, inp_lens):
    (wqkv, bqkv, wo, bo, w1, b1, w2, b2, g1, be1, g2, be2) = params
    B, L, D = x.shape

    def layer_norm(h, g, b):
        mu = jnp.mean(h, axis=-1, keepdims=True)
        var = jnp.mean((h - mu) ** 2, axis=-1, keepdims=True)
        return (h - mu) / jnp.sqrt(var + 1e-5) * g + b

    outs, attns = [], []
    for e, i_len in enumerate(inp_lens):
        S = L // (2 ** i_len)
        xs = x[:, L - S:, :]
        qkv = xs @ wqkv[e] + bqkv[e]
        q, k, v = qkv[..., :D], qkv[..., D:2 * D], qkv[..., 2 * D:]
        scores = jnp.einsum('bqd,bkd->bqk', q, k) / math.sqrt(D)
        attn = jax.nn.softmax(scores, axis=-1)
        ctx = jnp.einsum('bqk,bkd->bqd', attn, v)
        attn_out = ctx @ wo[e] + bo[e]
        x1 = layer_norm(xs + attn_out, g1[e], be1[e])
        h1 = jax.nn.relu(x1 @ w1[e] + b1[e])
        y = layer_norm(x1 + h1 @ w2[e] + b2[e], g2[e], be2[e])
        outs.append(y)
        attns.append(attn)
    return jnp.concatenate(outs, axis=-2), attns


if __name__ == "__main__":
    B, L, D, F = 2, 16, 128, 256     # batch, seq_len, d_model, d_ff
    inp_lens = [0, 1, 2]             # encoder i sees the last L // 2**i steps

    key = jax.random.PRNGKey(0)
    kx, kp = jax.random.split(key)
    x = jax.random.normal(kx, (B, L, D), jnp.float32)
    params = init_stacked_params(kp, len(inp_lens), D, F)

    y, attns = encoder_stack_forward(x, params, inp_lens)
    y = jax.block_until_ready(y)
    attns = [jax.block_until_ready(a) for a in attns]

    expected_len = sum(L // (2 ** i) for i in inp_lens)   # 16 + 8 + 4 = 28
    assert y.shape == (B, expected_len, D)
    assert bool(jnp.all(jnp.isfinite(y)))

    # Correctness vs. a pure-JAX reference (loose tolerance: the kernel uses the
    # EUP approximate reciprocal in the softmax).
    y_ref, attn_ref = _reference_forward(x, params, inp_lens)
    assert bool(jnp.allclose(y, y_ref, atol=1e-2, rtol=1e-2))
    for a, ar, i_len in zip(attns, attn_ref, inp_lens):
        s = L // (2 ** i_len)
        assert a.shape == (B, s, s)
        assert bool(jnp.all(jnp.isfinite(a)))
        assert bool(jnp.allclose(a, ar, atol=1e-2, rtol=1e-2))
        # attention rows are a softmax -> sum to (approximately) 1
        assert bool(jnp.all(jnp.abs(jnp.sum(a, axis=-1) - 1.0) < 5e-3))

    print("KERNEL_OK")
</pallas_src>

<mosaic_0001>
module attributes {stable_mosaic.version = 11 : i64} {
  func.func @kernel(%arg0: i32, %arg1: memref<1x16x128xf32, #tpu.memory_space<vmem>>, %arg2: memref<3x128x384xf32, #tpu.memory_space<vmem>>, %arg3: memref<3x1x384xf32, #tpu.memory_space<vmem>>, %arg4: memref<3x128x128xf32, #tpu.memory_space<vmem>>, %arg5: memref<3x1x128xf32, #tpu.memory_space<vmem>>, %arg6: memref<3x128x256xf32, #tpu.memory_space<vmem>>, %arg7: memref<3x1x256xf32, #tpu.memory_space<vmem>>, %arg8: memref<3x256x128xf32, #tpu.memory_space<vmem>>, %arg9: memref<3x1x128xf32, #tpu.memory_space<vmem>>, %arg10: memref<3x1x128xf32, #tpu.memory_space<vmem>>, %arg11: memref<3x1x128xf32, #tpu.memory_space<vmem>>, %arg12: memref<3x1x128xf32, #tpu.memory_space<vmem>>, %arg13: memref<3x1x128xf32, #tpu.memory_space<vmem>>, %arg14: memref<1x28x128xf32, #tpu.memory_space<vmem>>, %arg15: memref<1x16x16xf32, #tpu.memory_space<vmem>>, %arg16: memref<1x8x8xf32, #tpu.memory_space<vmem>>, %arg17: memref<1x4x4xf32, #tpu.memory_space<vmem>>) attributes {dimension_semantics = [#tpu.dimension_semantics<parallel>], iteration_bounds = array<i64: 2>, scalar_prefetch = 0 : i64, scratch_operands = 0 : i64, tpu.core_type = #tpu.core_type<tc>, window_params = [{transform_indices = @transform_0, window_bounds = array<i64: 1, 16, 128>}, {pipeline_mode = #tpu.pipeline_mode<synchronous>, transform_indices = @transform_1, window_bounds = array<i64: 3, 128, 384>}, {pipeline_mode = #tpu.pipeline_mode<synchronous>, transform_indices = @transform_2, window_bounds = array<i64: 3, 1, 384>}, {pipeline_mode = #tpu.pipeline_mode<synchronous>, transform_indices = @transform_3, window_bounds = array<i64: 3, 128, 128>}, {pipeline_mode = #tpu.pipeline_mode<synchronous>, transform_indices = @transform_4, window_bounds = array<i64: 3, 1, 128>}, {pipeline_mode = #tpu.pipeline_mode<synchronous>, transform_indices = @transform_5, window_bounds = array<i64: 3, 128, 256>}, {pipeline_mode = #tpu.pipeline_mode<synchronous>, transform_indices = @transform_6, window_bounds = array<i64: 3, 1, 256>}, {pipeline_mode = #tpu.pipeline_mode<synchronous>, transform_indices = @transform_7, window_bounds = array<i64: 3, 256, 128>}, {pipeline_mode = #tpu.pipeline_mode<synchronous>, transform_indices = @transform_8, window_bounds = array<i64: 3, 1, 128>}, {pipeline_mode = #tpu.pipeline_mode<synchronous>, transform_indices = @transform_9, window_bounds = array<i64: 3, 1, 128>}, {pipeline_mode = #tpu.pipeline_mode<synchronous>, transform_indices = @transform_10, window_bounds = array<i64: 3, 1, 128>}, {pipeline_mode = #tpu.pipeline_mode<synchronous>, transform_indices = @transform_11, window_bounds = array<i64: 3, 1, 128>}, {pipeline_mode = #tpu.pipeline_mode<synchronous>, transform_indices = @transform_12, window_bounds = array<i64: 3, 1, 128>}, {transform_indices = @transform_13, window_bounds = array<i64: 1, 28, 128>}, {transform_indices = @transform_14, window_bounds = array<i64: 1, 16, 16>}, {transform_indices = @transform_15, window_bounds = array<i64: 1, 8, 8>}, {transform_indices = @transform_16, window_bounds = array<i64: 1, 4, 4>}]} {
    %c0 = arith.constant 0 : index
    %c0_0 = arith.constant 0 : index
    %c0_1 = arith.constant 0 : index
    %0 = vector.load %arg1[%c0, %c0_0, %c0_1] : memref<1x16x128xf32, #tpu.memory_space<vmem>>, vector<1x16x128xf32>
    %1 = vector.shape_cast %0 : vector<1x16x128xf32> to vector<16x128xf32>
    %c0_2 = arith.constant 0 : index
    %c0_3 = arith.constant 0 : index
    %c0_4 = arith.constant 0 : index
    %2 = vector.load %arg2[%c0_2, %c0_3, %c0_4] : memref<3x128x384xf32, #tpu.memory_space<vmem>>, vector<1x128x384xf32>
    %3 = vector.shape_cast %2 : vector<1x128x384xf32> to vector<128x384xf32>
    %cst = arith.constant dense<0.000000e+00> : vector<16x384xf32>
    %4 = tpu.matmul %1, %3, %cst {dimension_numbers = #tpu.dot_dimension_numbers<[1], [0], [0], [1], [0, 0, 1, 1], [], []>} : vector<16x128xf32>, vector<128x384xf32>, vector<16x384xf32> -> vector<16x384xf32>
    %c0_5 = arith.constant 0 : index
    %c0_6 = arith.constant 0 : index
    %c0_7 = arith.constant 0 : index
    %5 = vector.load %arg3[%c0_5, %c0_6, %c0_7] : memref<3x1x384xf32, #tpu.memory_space<vmem>>, vector<1x1x384xf32>
    %6 = vector.shape_cast %5 : vector<1x1x384xf32> to vector<1x384xf32>
    %7 = vector.broadcast %6 : vector<1x384xf32> to vector<16x384xf32>
    %8 = arith.addf %4, %7 : vector<16x384xf32>
    %9 = vector.extract_strided_slice %8 {offsets = [0, 0], sizes = [16, 128], strides = [1, 1]} : vector<16x384xf32> to vector<16x128xf32>
    %10 = vector.extract_strided_slice %8 {offsets = [0, 128], sizes = [16, 128], strides = [1, 1]} : vector<16x384xf32> to vector<16x128xf32>
    %11 = vector.extract_strided_slice %8 {offsets = [0, 256], sizes = [16, 128], strides = [1, 1]} : vector<16x384xf32> to vector<16x128xf32>
    %cst_8 = arith.constant dense<0.000000e+00> : vector<16x16xf32>
    %12 = tpu.matmul %9, %10, %cst_8 {dimension_numbers = #tpu.dot_dimension_numbers<[1], [1], [0], [0], [0, 0, 1, 0], [], []>} : vector<16x128xf32>, vector<16x128xf32>, vector<16x16xf32> -> vector<16x16xf32>
    %cst_9 = arith.constant 0.0883883461 : f32
    %13 = vector.broadcast %cst_9 : f32 to vector<16x16xf32>
    %14 = arith.mulf %12, %13 : vector<16x16xf32>
    %cst_10 = arith.constant dense<0xFF800000> : vector<16xf32>
    %15 = vector.multi_reduction <maximumf>, %14, %cst_10 [1] : vector<16x16xf32> to vector<16xf32>
    %16 = vector.shape_cast %15 : vector<16xf32> to vector<16x1xf32>
    %17 = vector.broadcast %16 : vector<16x1xf32> to vector<16x16xf32>
    %18 = arith.subf %14, %17 : vector<16x16xf32>
    %19 = math.exp %18 : vector<16x16xf32>
    %cst_11 = arith.constant dense<0.000000e+00> : vector<16xf32>
    %20 = vector.multi_reduction <add>, %19, %cst_11 [1] : vector<16x16xf32> to vector<16xf32>
    %21 = vector.shape_cast %20 : vector<16xf32> to vector<16x1xf32>
    %22 = tpu.reciprocal %21 {approx = true} : vector<16x1xf32> -> vector<16x1xf32>
    %23 = vector.broadcast %22 : vector<16x1xf32> to vector<16x16xf32>
    %24 = arith.mulf %19, %23 : vector<16x16xf32>
    %25 = vector.shape_cast %24 : vector<16x16xf32> to vector<1x16x16xf32>
    %c0_12 = arith.constant 0 : index
    %c0_13 = arith.constant 0 : index
    %c0_14 = arith.constant 0 : index
    %26 = vector.load %arg15[%c0_12, %c0_13, %c0_14] : memref<1x16x16xf32, #tpu.memory_space<vmem>>, vector<1x16x16xf32>
    tpu.vector_store %arg15[%c0_12, %c0_13, %c0_14], %25 {strides = array<i32>} : memref<1x16x16xf32, #tpu.memory_space<vmem>>, vector<1x16x16xf32>,
    %cst_15 = arith.constant dense<0.000000e+00> : vector<16x128xf32>
    %27 = tpu.matmul %24, %11, %cst_15 {dimension_numbers = #tpu.dot_dimension_numbers<[1], [0], [0], [1], [0, 0, 1, 1], [], []>} : vector<16x16xf32>, vector<16x128xf32>, vector<16x128xf32> -> vector<16x128xf32>
    %c0_16 = arith.constant 0 : index
    %c0_17 = arith.constant 0 : index
    %c0_18 = arith.constant 0 : index
    %28 = vector.load %arg4[%c0_16, %c0_17, %c0_18] : memref<3x128x128xf32, #tpu.memory_space<vmem>>, vector<1x128x128xf32>
    %29 = vector.shape_cast %28 : vector<1x128x128xf32> to vector<128x128xf32>
    %cst_19 = arith.constant dense<0.000000e+00> : vector<16x128xf32>
    %30 = tpu.matmul %27, %29, %cst_19 {dimension_numbers = #tpu.dot_dimension_numbers<[1], [0], [0], [1], [0, 0, 1, 1], [], []>} : vector<16x128xf32>, vector<128x128xf32>, vector<16x128xf32> -> vector<16x128xf32>
    %c0_20 = arith.constant 0 : index
    %c0_21 = arith.constant 0 : index
    %c0_22 = arith.constant 0 : index
    %31 = vector.load %arg5[%c0_20, %c0_21, %c0_22] : memref<3x1x128xf32, #tpu.memory_space<vmem>>, vector<1x1x128xf32>
    %32 = vector.shape_cast %31 : vector<1x1x128xf32> to vector<1x128xf32>
    %33 = vector.broadcast %32 : vector<1x128xf32> to vector<16x128xf32>
    %34 = arith.addf %30, %33 : vector<16x128xf32>
    %35 = arith.addf %1, %34 : vector<16x128xf32>
    %c0_23 = arith.constant 0 : index
    %c0_24 = arith.constant 0 : index
    %c0_25 = arith.constant 0 : index
    %36 = vector.load %arg10[%c0_23, %c0_24, %c0_25] : memref<3x1x128xf32, #tpu.memory_space<vmem>>, vector<1x1x128xf32>
    %37 = vector.shape_cast %36 : vector<1x1x128xf32> to vector<1x128xf32>
    %c0_26 = arith.constant 0 : index
    %c0_27 = arith.constant 0 : index
    %c0_28 = arith.constant 0 : index
    %38 = vector.load %arg11[%c0_26, %c0_27, %c0_28] : memref<3x1x128xf32, #tpu.memory_space<vmem>>, vector<1x1x128xf32>
    %39 = vector.shape_cast %38 : vector<1x1x128xf32> to vector<1x128xf32>
    %cst_29 = arith.constant dense<0.000000e+00> : vector<16xf32>
    %40 = vector.multi_reduction <add>, %35, %cst_29 [1] : vector<16x128xf32> to vector<16xf32>
    %41 = vector.shape_cast %40 : vector<16xf32> to vector<16x1xf32>
    %cst_30 = arith.constant 1.280000e+02 : f32
    %42 = vector.broadcast %cst_30 : f32 to vector<16x1xf32>
    %43 = arith.divf %41, %42 : vector<16x1xf32>
    %44 = vector.broadcast %43 : vector<16x1xf32> to vector<16x128xf32>
    %45 = arith.subf %35, %44 : vector<16x128xf32>
    %46 = arith.mulf %45, %45 : vector<16x128xf32>
    %cst_31 = arith.constant dense<0.000000e+00> : vector<16xf32>
    %47 = vector.multi_reduction <add>, %46, %cst_31 [1] : vector<16x128xf32> to vector<16xf32>
    %48 = vector.shape_cast %47 : vector<16xf32> to vector<16x1xf32>
    %cst_32 = arith.constant 1.280000e+02 : f32
    %49 = vector.broadcast %cst_32 : f32 to vector<16x1xf32>
    %50 = arith.divf %48, %49 : vector<16x1xf32>
    %cst_33 = arith.constant 9.99999974E-6 : f32
    %51 = vector.broadcast %cst_33 : f32 to vector<16x1xf32>
    %52 = arith.addf %50, %51 : vector<16x1xf32>
    %53 = math.rsqrt %52 : vector<16x1xf32>
    %54 = vector.broadcast %53 : vector<16x1xf32> to vector<16x128xf32>
    %55 = arith.mulf %45, %54 : vector<16x128xf32>
    %56 = vector.broadcast %37 : vector<1x128xf32> to vector<16x128xf32>
    %57 = arith.mulf %55, %56 : vector<16x128xf32>
    %58 = vector.broadcast %39 : vector<1x128xf32> to vector<16x128xf32>
    %59 = arith.addf %57, %58 : vector<16x128xf32>
    %c0_34 = arith.constant 0 : index
    %c0_35 = arith.constant 0 : index
    %c0_36 = arith.constant 0 : index
    %60 = vector.load %arg6[%c0_34, %c0_35, %c0_36] : memref<3x128x256xf32, #tpu.memory_space<vmem>>, vector<1x128x256xf32>
    %61 = vector.shape_cast %60 : vector<1x128x256xf32> to vector<128x256xf32>
    %cst_37 = arith.constant dense<0.000000e+00> : vector<16x256xf32>
    %62 = tpu.matmul %59, %61, %cst_37 {dimension_numbers = #tpu.dot_dimension_numbers<[1], [0], [0], [1], [0, 0, 1, 1], [], []>} : vector<16x128xf32>, vector<128x256xf32>, vector<16x256xf32> -> vector<16x256xf32>
    %c0_38 = arith.constant 0 : index
    %c0_39 = arith.constant 0 : index
    %c0_40 = arith.constant 0 : index
    %63 = vector.load %arg7[%c0_38, %c0_39, %c0_40] : memref<3x1x256xf32, #tpu.memory_space<vmem>>, vector<1x1x256xf32>
    %64 = vector.shape_cast %63 : vector<1x1x256xf32> to vector<1x256xf32>
    %65 = vector.broadcast %64 : vector<1x256xf32> to vector<16x256xf32>
    %66 = arith.addf %62, %65 : vector<16x256xf32>
    %cst_41 = arith.constant 0.000000e+00 : f32
    %67 = vector.broadcast %cst_41 : f32 to vector<16x256xf32>
    %68 = arith.maximumf %66, %67 : vector<16x256xf32>
    %c0_42 = arith.constant 0 : index
    %c0_43 = arith.constant 0 : index
    %c0_44 = arith.constant 0 : index
    %69 = vector.load %arg8[%c0_42, %c0_43, %c0_44] : memref<3x256x128xf32, #tpu.memory_space<vmem>>, vector<1x256x128xf32>
    %70 = vector.shape_cast %69 : vector<1x256x128xf32> to vector<256x128xf32>
    %cst_45 = arith.constant dense<0.000000e+00> : vector<16x128xf32>
    %71 = tpu.matmul %68, %70, %cst_45 {dimension_numbers = #tpu.dot_dimension_numbers<[1], [0], [0], [1], [0, 0, 1, 1], [], []>} : vector<16x256xf32>, vector<256x128xf32>, vector<16x128xf32> -> vector<16x128xf32>
    %c0_46 = arith.constant 0 : index
    %c0_47 = arith.constant 0 : index
    %c0_48 = arith.constant 0 : index
    %72 = vector.load %arg9[%c0_46, %c0_47, %c0_48] : memref<3x1x128xf32, #tpu.memory_space<vmem>>, vector<1x1x128xf32>
    %73 = vector.shape_cast %72 : vector<1x1x128xf32> to vector<1x128xf32>
    %74 = vector.broadcast %73 : vector<1x128xf32> to vector<16x128xf32>
    %75 = arith.addf %71, %74 : vector<16x128xf32>
    %76 = arith.addf %59, %75 : vector<16x128xf32>
    %c0_49 = arith.constant 0 : index
    %c0_50 = arith.constant 0 : index
    %c0_51 = arith.constant 0 : index
    %77 = vector.load %arg12[%c0_49, %c0_50, %c0_51] : memref<3x1x128xf32, #tpu.memory_space<vmem>>, vector<1x1x128xf32>
    %78 = vector.shape_cast %77 : vector<1x1x128xf32> to vector<1x128xf32>
    %c0_52 = arith.constant 0 : index
    %c0_53 = arith.constant 0 : index
    %c0_54 = arith.constant 0 : index
    %79 = vector.load %arg13[%c0_52, %c0_53, %c0_54] : memref<3x1x128xf32, #tpu.memory_space<vmem>>, vector<1x1x128xf32>
    %80 = vector.shape_cast %79 : vector<1x1x128xf32> to vector<1x128xf32>
    %cst_55 = arith.constant dense<0.000000e+00> : vector<16xf32>
    %81 = vector.multi_reduction <add>, %76, %cst_55 [1] : vector<16x128xf32> to vector<16xf32>
    %82 = vector.shape_cast %81 : vector<16xf32> to vector<16x1xf32>
    %cst_56 = arith.constant 1.280000e+02 : f32
    %83 = vector.broadcast %cst_56 : f32 to vector<16x1xf32>
    %84 = arith.divf %82, %83 : vector<16x1xf32>
    %85 = vector.broadcast %84 : vector<16x1xf32> to vector<16x128xf32>
    %86 = arith.subf %76, %85 : vector<16x128xf32>
    %87 = arith.mulf %86, %86 : vector<16x128xf32>
    %cst_57 = arith.constant dense<0.000000e+00> : vector<16xf32>
    %88 = vector.multi_reduction <add>, %87, %cst_57 [1] : vector<16x128xf32> to vector<16xf32>
    %89 = vector.shape_cast %88 : vector<16xf32> to vector<16x1xf32>
    %cst_58 = arith.constant 1.280000e+02 : f32
    %90 = vector.broadcast %cst_58 : f32 to vector<16x1xf32>
    %91 = arith.divf %89, %90 : vector<16x1xf32>
    %cst_59 = arith.constant 9.99999974E-6 : f32
    %92 = vector.broadcast %cst_59 : f32 to vector<16x1xf32>
    %93 = arith.addf %91, %92 : vector<16x1xf32>
    %94 = math.rsqrt %93 : vector<16x1xf32>
    %95 = vector.broadcast %94 : vector<16x1xf32> to vector<16x128xf32>
    %96 = arith.mulf %86, %95 : vector<16x128xf32>
    %97 = vector.broadcast %78 : vector<1x128xf32> to vector<16x128xf32>
    %98 = arith.mulf %96, %97 : vector<16x128xf32>
    %99 = vector.broadcast %80 : vector<1x128xf32> to vector<16x128xf32>
    %100 = arith.addf %98, %99 : vector<16x128xf32>
    %101 = vector.shape_cast %100 : vector<16x128xf32> to vector<1x16x128xf32>
    %c0_60 = arith.constant 0 : index
    %c0_61 = arith.constant 0 : index
    %c0_62 = arith.constant 0 : index
    %102 = vector.load %arg14[%c0_60, %c0_61, %c0_62] : memref<1x28x128xf32, #tpu.memory_space<vmem>>, vector<1x16x128xf32>
    tpu.vector_store %arg14[%c0_60, %c0_61, %c0_62], %101 {strides = array<i32>} : memref<1x28x128xf32, #tpu.memory_space<vmem>>, vector<1x16x128xf32>,
    %103 = vector.extract_strided_slice %1 {offsets = [8, 0], sizes = [8, 128], strides = [1, 1]} : vector<16x128xf32> to vector<8x128xf32>
    %c1 = arith.constant 1 : index
    %c0_63 = arith.constant 0 : index
    %c0_64 = arith.constant 0 : index
    %104 = vector.load %arg2[%c1, %c0_63, %c0_64] : memref<3x128x384xf32, #tpu.memory_space<vmem>>, vector<1x128x384xf32>
    %105 = vector.shape_cast %104 : vector<1x128x384xf32> to vector<128x384xf32>
    %cst_65 = arith.constant dense<0.000000e+00> : vector<8x384xf32>
    %106 = tpu.matmul %103, %105, %cst_65 {dimension_numbers = #tpu.dot_dimension_numbers<[1], [0], [0], [1], [0, 0, 1, 1], [], []>} : vector<8x128xf32>, vector<128x384xf32>, vector<8x384xf32> -> vector<8x384xf32>
    %c1_66 = arith.constant 1 : index
    %c0_67 = arith.constant 0 : index
    %c0_68 = arith.constant 0 : index
    %107 = vector.load %arg3[%c1_66, %c0_67, %c0_68] : memref<3x1x384xf32, #tpu.memory_space<vmem>>, vector<1x1x384xf32>
    %108 = vector.shape_cast %107 : vector<1x1x384xf32> to vector<1x384xf32>
    %109 = vector.broadcast %108 : vector<1x384xf32> to vector<8x384xf32>
    %110 = arith.addf %106, %109 : vector<8x384xf32>
    %111 = vector.extract_strided_slice %110 {offsets = [0, 0], sizes = [8, 128], strides = [1, 1]} : vector<8x384xf32> to vector<8x128xf32>
    %112 = vector.extract_strided_slice %110 {offsets = [0, 128], sizes = [8, 128], strides = [1, 1]} : vector<8x384xf32> to vector<8x128xf32>
    %113 = vector.extract_strided_slice %110 {offsets = [0, 256], sizes = [8, 128], strides = [1, 1]} : vector<8x384xf32> to vector<8x128xf32>
    %cst_69 = arith.constant dense<0.000000e+00> : vector<8x8xf32>
    %114 = tpu.matmul %111, %112, %cst_69 {dimension_numbers = #tpu.dot_dimension_numbers<[1], [1], [0], [0], [0, 0, 1, 0], [], []>} : vector<8x128xf32>, vector<8x128xf32>, vector<8x8xf32> -> vector<8x8xf32>
    %cst_70 = arith.constant 0.0883883461 : f32
    %115 = vector.broadcast %cst_70 : f32 to vector<8x8xf32>
    %116 = arith.mulf %114, %115 : vector<8x8xf32>
    %cst_71 = arith.constant dense<0xFF800000> : vector<8xf32>
    %117 = vector.multi_reduction <maximumf>, %116, %cst_71 [1] : vector<8x8xf32> to vector<8xf32>
    %118 = vector.shape_cast %117 : vector<8xf32> to vector<8x1xf32>
    %119 = vector.broadcast %118 : vector<8x1xf32> to vector<8x8xf32>
    %120 = arith.subf %116, %119 : vector<8x8xf32>
    %121 = math.exp %120 : vector<8x8xf32>
    %cst_72 = arith.constant dense<0.000000e+00> : vector<8xf32>
    %122 = vector.multi_reduction <add>, %121, %cst_72 [1] : vector<8x8xf32> to vector<8xf32>
    %123 = vector.shape_cast %122 : vector<8xf32> to vector<8x1xf32>
    %124 = tpu.reciprocal %123 {approx = true} : vector<8x1xf32> -> vector<8x1xf32>
    %125 = vector.broadcast %124 : vector<8x1xf32> to vector<8x8xf32>
    %126 = arith.mulf %121, %125 : vector<8x8xf32>
    %127 = vector.shape_cast %126 : vector<8x8xf32> to vector<1x8x8xf32>
    %c0_73 = arith.constant 0 : index
    %c0_74 = arith.constant 0 : index
    %c0_75 = arith.constant 0 : index
    %128 = vector.load %arg16[%c0_73, %c0_74, %c0_75] : memref<1x8x8xf32, #tpu.memory_space<vmem>>, vector<1x8x8xf32>
    tpu.vector_store %arg16[%c0_73, %c0_74, %c0_75], %127 {strides = array<i32>} : memref<1x8x8xf32, #tpu.memory_space<vmem>>, vector<1x8x8xf32>,
    %cst_76 = arith.constant dense<0.000000e+00> : vector<8x128xf32>
    %129 = tpu.matmul %126, %113, %cst_76 {dimension_numbers = #tpu.dot_dimension_numbers<[1], [0], [0], [1], [0, 0, 1, 1], [], []>} : vector<8x8xf32>, vector<8x128xf32>, vector<8x128xf32> -> vector<8x128xf32>
    %c1_77 = arith.constant 1 : index
    %c0_78 = arith.constant 0 : index
    %c0_79 = arith.constant 0 : index
    %130 = vector.load %arg4[%c1_77, %c0_78, %c0_79] : memref<3x128x128xf32, #tpu.memory_space<vmem>>, vector<1x128x128xf32>
    %131 = vector.shape_cast %130 : vector<1x128x128xf32> to vector<128x128xf32>
    %cst_80 = arith.constant dense<0.000000e+00> : vector<8x128xf32>
    %132 = tpu.matmul %129, %131, %cst_80 {dimension_numbers = #tpu.dot_dimension_numbers<[1], [0], [0], [1], [0, 0, 1, 1], [], []>} : vector<8x128xf32>, vector<128x128xf32>, vector<8x128xf32> -> vector<8x128xf32>
    %c1_81 = arith.constant 1 : index
    %c0_82 = arith.constant 0 : index
    %c0_83 = arith.constant 0 : index
    %133 = vector.load %arg5[%c1_81, %c0_82, %c0_83] : memref<3x1x128xf32, #tpu.memory_space<vmem>>, vector<1x1x128xf32>
    %134 = vector.shape_cast %133 : vector<1x1x128xf32> to vector<1x128xf32>
    %135 = vector.broadcast %134 : vector<1x128xf32> to vector<8x128xf32>
    %136 = arith.addf %132, %135 : vector<8x128xf32>
    %137 = arith.addf %103, %136 : vector<8x128xf32>
    %c1_84 = arith.constant 1 : index
    %c0_85 = arith.constant 0 : index
    %c0_86 = arith.constant 0 : index
    %138 = vector.load %arg10[%c1_84, %c0_85, %c0_86] : memref<3x1x128xf32, #tpu.memory_space<vmem>>, vector<1x1x128xf32>
    %139 = vector.shape_cast %138 : vector<1x1x128xf32> to vector<1x128xf32>
    %c1_87 = arith.constant 1 : index
    %c0_88 = arith.constant 0 : index
    %c0_89 = arith.constant 0 : index
    %140 = vector.load %arg11[%c1_87, %c0_88, %c0_89] : memref<3x1x128xf32, #tpu.memory_space<vmem>>, vector<1x1x128xf32>
    %141 = vector.shape_cast %140 : vector<1x1x128xf32> to vector<1x128xf32>
    %cst_90 = arith.constant dense<0.000000e+00> : vector<8xf32>
    %142 = vector.multi_reduction <add>, %137, %cst_90 [1] : vector<8x128xf32> to vector<8xf32>
    %143 = vector.shape_cast %142 : vector<8xf32> to vector<8x1xf32>
    %cst_91 = arith.constant 1.280000e+02 : f32
    %144 = vector.broadcast %cst_91 : f32 to vector<8x1xf32>
    %145 = arith.divf %143, %144 : vector<8x1xf32>
    %146 = vector.broadcast %145 : vector<8x1xf32> to vector<8x128xf32>
    %147 = arith.subf %137, %146 : vector<8x128xf32>
    %148 = arith.mulf %147, %147 : vector<8x128xf32>
    %cst_92 = arith.constant dense<0.000000e+00> : vector<8xf32>
    %149 = vector.multi_reduction <add>, %148, %cst_92 [1] : vector<8x128xf32> to vector<8xf32>
    %150 = vector.shape_cast %149 : vector<8xf32> to vector<8x1xf32>
    %cst_93 = arith.constant 1.280000e+02 : f32
    %151 = vector.broadcast %cst_93 : f32 to vector<8x1xf32>
    %152 = arith.divf %150, %151 : vector<8x1xf32>
    %cst_94 = arith.constant 9.99999974E-6 : f32
    %153 = vector.broadcast %cst_94 : f32 to vector<8x1xf32>
    %154 = arith.addf %152, %153 : vector<8x1xf32>
    %155 = math.rsqrt %154 : vector<8x1xf32>
    %156 = vector.broadcast %155 : vector<8x1xf32> to vector<8x128xf32>
    %157 = arith.mulf %147, %156 : vector<8x128xf32>
    %158 = vector.broadcast %139 : vector<1x128xf32> to vector<8x128xf32>
    %159 = arith.mulf %157, %158 : vector<8x128xf32>
    %160 = vector.broadcast %141 : vector<1x128xf32> to vector<8x128xf32>
    %161 = arith.addf %159, %160 : vector<8x128xf32>
    %c1_95 = arith.constant 1 : index
    %c0_96 = arith.constant 0 : index
    %c0_97 = arith.constant 0 : index
    %162 = vector.load %arg6[%c1_95, %c0_96, %c0_97] : memref<3x128x256xf32, #tpu.memory_space<vmem>>, vector<1x128x256xf32>
    %163 = vector.shape_cast %162 : vector<1x128x256xf32> to vector<128x256xf32>
    %cst_98 = arith.constant dense<0.000000e+00> : vector<8x256xf32>
    %164 = tpu.matmul %161, %163, %cst_98 {dimension_numbers = #tpu.dot_dimension_numbers<[1], [0], [0], [1], [0, 0, 1, 1], [], []>} : vector<8x128xf32>, vector<128x256xf32>, vector<8x256xf32> -> vector<8x256xf32>
    %c1_99 = arith.constant 1 : index
    %c0_100 = arith.constant 0 : index
    %c0_101 = arith.constant 0 : index
    %165 = vector.load %arg7[%c1_99, %c0_100, %c0_101] : memref<3x1x256xf32, #tpu.memory_space<vmem>>, vector<1x1x256xf32>
    %166 = vector.shape_cast %165 : vector<1x1x256xf32> to vector<1x256xf32>
    %167 = vector.broadcast %166 : vector<1x256xf32> to vector<8x256xf32>
    %168 = arith.addf %164, %167 : vector<8x256xf32>
    %cst_102 = arith.constant 0.000000e+00 : f32
    %169 = vector.broadcast %cst_102 : f32 to vector<8x256xf32>
    %170 = arith.maximumf %168, %169 : vector<8x256xf32>
    %c1_103 = arith.constant 1 : index
    %c0_104 = arith.constant 0 : index
    %c0_105 = arith.constant 0 : index
    %171 = vector.load %arg8[%c1_103, %c0_104, %c0_105] : memref<3x256x128xf32, #tpu.memory_space<vmem>>, vector<1x256x128xf32>
    %172 = vector.shape_cast %171 : vector<1x256x128xf32> to vector<256x128xf32>
    %cst_106 = arith.constant dense<0.000000e+00> : vector<8x128xf32>
    %173 = tpu.matmul %170, %172, %cst_106 {dimension_numbers = #tpu.dot_dimension_numbers<[1], [0], [0], [1], [0, 0, 1, 1], [], []>} : vector<8x256xf32>, vector<256x128xf32>, vector<8x128xf32> -> vector<8x128xf32>
    %c1_107 = arith.constant 1 : index
    %c0_108 = arith.constant 0 : index
    %c0_109 = arith.constant 0 : index
    %174 = vector.load %arg9[%c1_107, %c0_108, %c0_109] : memref<3x1x128xf32, #tpu.memory_space<vmem>>, vector<1x1x128xf32>
    %175 = vector.shape_cast %174 : vector<1x1x128xf32> to vector<1x128xf32>
    %176 = vector.broadcast %175 : vector<1x128xf32> to vector<8x128xf32>
    %177 = arith.addf %173, %176 : vector<8x128xf32>
    %178 = arith.addf %161, %177 : vector<8x128xf32>
    %c1_110 = arith.constant 1 : index
    %c0_111 = arith.constant 0 : index
    %c0_112 = arith.constant 0 : index
    %179 = vector.load %arg12[%c1_110, %c0_111, %c0_112] : memref<3x1x128xf32, #tpu.memory_space<vmem>>, vector<1x1x128xf32>
    %180 = vector.shape_cast %179 : vector<1x1x128xf32> to vector<1x128xf32>
    %c1_113 = arith.constant 1 : index
    %c0_114 = arith.constant 0 : index
    %c0_115 = arith.constant 0 : index
    %181 = vector.load %arg13[%c1_113, %c0_114, %c0_115] : memref<3x1x128xf32, #tpu.memory_space<vmem>>, vector<1x1x128xf32>
    %182 = vector.shape_cast %181 : vector<1x1x128xf32> to vector<1x128xf32>
    %cst_116 = arith.constant dense<0.000000e+00> : vector<8xf32>
    %183 = vector.multi_reduction <add>, %178, %cst_116 [1] : vector<8x128xf32> to vector<8xf32>
    %184 = vector.shape_cast %183 : vector<8xf32> to vector<8x1xf32>
    %cst_117 = arith.constant 1.280000e+02 : f32
    %185 = vector.broadcast %cst_117 : f32 to vector<8x1xf32>
    %186 = arith.divf %184, %185 : vector<8x1xf32>
    %187 = vector.broadcast %186 : vector<8x1xf32> to vector<8x128xf32>
    %188 = arith.subf %178, %187 : vector<8x128xf32>
    %189 = arith.mulf %188, %188 : vector<8x128xf32>
    %cst_118 = arith.constant dense<0.000000e+00> : vector<8xf32>
    %190 = vector.multi_reduction <add>, %189, %cst_118 [1] : vector<8x128xf32> to vector<8xf32>
    %191 = vector.shape_cast %190 : vector<8xf32> to vector<8x1xf32>
    %cst_119 = arith.constant 1.280000e+02 : f32
    %192 = vector.broadcast %cst_119 : f32 to vector<8x1xf32>
    %193 = arith.divf %191, %192 : vector<8x1xf32>
    %cst_120 = arith.constant 9.99999974E-6 : f32
    %194 = vector.broadcast %cst_120 : f32 to vector<8x1xf32>
    %195 = arith.addf %193, %194 : vector<8x1xf32>
    %196 = math.rsqrt %195 : vector<8x1xf32>
    %197 = vector.broadcast %196 : vector<8x1xf32> to vector<8x128xf32>
    %198 = arith.mulf %188, %197 : vector<8x128xf32>
    %199 = vector.broadcast %180 : vector<1x128xf32> to vector<8x128xf32>
    %200 = arith.mulf %198, %199 : vector<8x128xf32>
    %201 = vector.broadcast %182 : vector<1x128xf32> to vector<8x128xf32>
    %202 = arith.addf %200, %201 : vector<8x128xf32>
    %203 = vector.shape_cast %202 : vector<8x128xf32> to vector<1x8x128xf32>
    %c0_121 = arith.constant 0 : index
    %c16 = arith.constant 16 : index
    %c0_122 = arith.constant 0 : index
    %204 = vector.load %arg14[%c0_121, %c16, %c0_122] : memref<1x28x128xf32, #tpu.memory_space<vmem>>, vector<1x8x128xf32>
    tpu.vector_store %arg14[%c0_121, %c16, %c0_122], %203 {strides = array<i32>} : memref<1x28x128xf32, #tpu.memory_space<vmem>>, vector<1x8x128xf32>,
    %205 = vector.extract_strided_slice %1 {offsets = [12, 0], sizes = [4, 128], strides = [1, 1]} : vector<16x128xf32> to vector<4x128xf32>
    %c2 = arith.constant 2 : index
    %c0_123 = arith.constant 0 : index
    %c0_124 = arith.constant 0 : index
    %206 = vector.load %arg2[%c2, %c0_123, %c0_124] : memref<3x128x384xf32, #tpu.memory_space<vmem>>, vector<1x128x384xf32>
    %207 = vector.shape_cast %206 : vector<1x128x384xf32> to vector<128x384xf32>
    %cst_125 = arith.constant dense<0.000000e+00> : vector<4x384xf32>
    %208 = tpu.matmul %205, %207, %cst_125 {dimension_numbers = #tpu.dot_dimension_numbers<[1], [0], [0], [1], [0, 0, 1, 1], [], []>} : vector<4x128xf32>, vector<128x384xf32>, vector<4x384xf32> -> vector<4x384xf32>
    %c2_126 = arith.constant 2 : index
    %c0_127 = arith.constant 0 : index
    %c0_128 = arith.constant 0 : index
    %209 = vector.load %arg3[%c2_126, %c0_127, %c0_128] : memref<3x1x384xf32, #tpu.memory_space<vmem>>, vector<1x1x384xf32>
    %210 = vector.shape_cast %209 : vector<1x1x384xf32> to vector<1x384xf32>
    %211 = vector.broadcast %210 : vector<1x384xf32> to vector<4x384xf32>
    %212 = arith.addf %208, %211 : vector<4x384xf32>
    %213 = vector.extract_strided_slice %212 {offsets = [0, 0], sizes = [4, 128], strides = [1, 1]} : vector<4x384xf32> to vector<4x128xf32>
    %214 = vector.extract_strided_slice %212 {offsets = [0, 128], sizes = [4, 128], strides = [1, 1]} : vector<4x384xf32> to vector<4x128xf32>
    %215 = vector.extract_strided_slice %212 {offsets = [0, 256], sizes = [4, 128], strides = [1, 1]} : vector<4x384xf32> to vector<4x128xf32>
    %cst_129 = arith.constant dense<0.000000e+00> : vector<4x4xf32>
    %216 = tpu.matmul %213, %214, %cst_129 {dimension_numbers = #tpu.dot_dimension_numbers<[1], [1], [0], [0], [0, 0, 1, 0], [], []>} : vector<4x128xf32>, vector<4x128xf32>, vector<4x4xf32> -> vector<4x4xf32>
    %cst_130 = arith.constant 0.0883883461 : f32
    %217 = vector.broadcast %cst_130 : f32 to vector<4x4xf32>
    %218 = arith.mulf %216, %217 : vector<4x4xf32>
    %cst_131 = arith.constant dense<0xFF800000> : vector<4xf32>
    %219 = vector.multi_reduction <maximumf>, %218, %cst_131 [1] : vector<4x4xf32> to vector<4xf32>
    %220 = vector.shape_cast %219 : vector<4xf32> to vector<4x1xf32>
    %221 = vector.broadcast %220 : vector<4x1xf32> to vector<4x4xf32>
    %222 = arith.subf %218, %221 : vector<4x4xf32>
    %223 = math.exp %222 : vector<4x4xf32>
    %cst_132 = arith.constant dense<0.000000e+00> : vector<4xf32>
    %224 = vector.multi_reduction <add>, %223, %cst_132 [1] : vector<4x4xf32> to vector<4xf32>
    %225 = vector.shape_cast %224 : vector<4xf32> to vector<4x1xf32>
    %226 = tpu.reciprocal %225 {approx = true} : vector<4x1xf32> -> vector<4x1xf32>
    %227 = vector.broadcast %226 : vector<4x1xf32> to vector<4x4xf32>
    %228 = arith.mulf %223, %227 : vector<4x4xf32>
    %229 = vector.shape_cast %228 : vector<4x4xf32> to vector<1x4x4xf32>
    %c0_133 = arith.constant 0 : index
    %c0_134 = arith.constant 0 : index
    %c0_135 = arith.constant 0 : index
    %230 = vector.load %arg17[%c0_133, %c0_134, %c0_135] : memref<1x4x4xf32, #tpu.memory_space<vmem>>, vector<1x4x4xf32>
    tpu.vector_store %arg17[%c0_133, %c0_134, %c0_135], %229 {strides = array<i32>} : memref<1x4x4xf32, #tpu.memory_space<vmem>>, vector<1x4x4xf32>,
    %cst_136 = arith.constant dense<0.000000e+00> : vector<4x128xf32>
    %231 = tpu.matmul %228, %215, %cst_136 {dimension_numbers = #tpu.dot_dimension_numbers<[1], [0], [0], [1], [0, 0, 1, 1], [], []>} : vector<4x4xf32>, vector<4x128xf32>, vector<4x128xf32> -> vector<4x128xf32>
    %c2_137 = arith.constant 2 : index
    %c0_138 = arith.constant 0 : index
    %c0_139 = arith.constant 0 : index
    %232 = vector.load %arg4[%c2_137, %c0_138, %c0_139] : memref<3x128x128xf32, #tpu.memory_space<vmem>>, vector<1x128x128xf32>
    %233 = vector.shape_cast %232 : vector<1x128x128xf32> to vector<128x128xf32>
    %cst_140 = arith.constant dense<0.000000e+00> : vector<4x128xf32>
    %234 = tpu.matmul %231, %233, %cst_140 {dimension_numbers = #tpu.dot_dimension_numbers<[1], [0], [0], [1], [0, 0, 1, 1], [], []>} : vector<4x128xf32>, vector<128x128xf32>, vector<4x128xf32> -> vector<4x128xf32>
    %c2_141 = arith.constant 2 : index
    %c0_142 = arith.constant 0 : index
    %c0_143 = arith.constant 0 : index
    %235 = vector.load %arg5[%c2_141, %c0_142, %c0_143] : memref<3x1x128xf32, #tpu.memory_space<vmem>>, vector<1x1x128xf32>
    %236 = vector.shape_cast %235 : vector<1x1x128xf32> to vector<1x128xf32>
    %237 = vector.broadcast %236 : vector<1x128xf32> to vector<4x128xf32>
    %238 = arith.addf %234, %237 : vector<4x128xf32>
    %239 = arith.addf %205, %238 : vector<4x128xf32>
    %c2_144 = arith.constant 2 : index
    %c0_145 = arith.constant 0 : index
    %c0_146 = arith.constant 0 : index
    %240 = vector.load %arg10[%c2_144, %c0_145, %c0_146] : memref<3x1x128xf32, #tpu.memory_space<vmem>>, vector<1x1x128xf32>
    %241 = vector.shape_cast %240 : vector<1x1x128xf32> to vector<1x128xf32>
    %c2_147 = arith.constant 2 : index
    %c0_148 = arith.constant 0 : index
    %c0_149 = arith.constant 0 : index
    %242 = vector.load %arg11[%c2_147, %c0_148, %c0_149] : memref<3x1x128xf32, #tpu.memory_space<vmem>>, vector<1x1x128xf32>
    %243 = vector.shape_cast %242 : vector<1x1x128xf32> to vector<1x128xf32>
    %cst_150 = arith.constant dense<0.000000e+00> : vector<4xf32>
    %244 = vector.multi_reduction <add>, %239, %cst_150 [1] : vector<4x128xf32> to vector<4xf32>
    %245 = vector.shape_cast %244 : vector<4xf32> to vector<4x1xf32>
    %cst_151 = arith.constant 1.280000e+02 : f32
    %246 = vector.broadcast %cst_151 : f32 to vector<4x1xf32>
    %247 = arith.divf %245, %246 : vector<4x1xf32>
    %248 = vector.broadcast %247 : vector<4x1xf32> to vector<4x128xf32>
    %249 = arith.subf %239, %248 : vector<4x128xf32>
    %250 = arith.mulf %249, %249 : vector<4x128xf32>
    %cst_152 = arith.constant dense<0.000000e+00> : vector<4xf32>
    %251 = vector.multi_reduction <add>, %250, %cst_152 [1] : vector<4x128xf32> to vector<4xf32>
    %252 = vector.shape_cast %251 : vector<4xf32> to vector<4x1xf32>
    %cst_153 = arith.constant 1.280000e+02 : f32
    %253 = vector.broadcast %cst_153 : f32 to vector<4x1xf32>
    %254 = arith.divf %252, %253 : vector<4x1xf32>
    %cst_154 = arith.constant 9.99999974E-6 : f32
    %255 = vector.broadcast %cst_154 : f32 to vector<4x1xf32>
    %256 = arith.addf %254, %255 : vector<4x1xf32>
    %257 = math.rsqrt %256 : vector<4x1xf32>
    %258 = vector.broadcast %257 : vector<4x1xf32> to vector<4x128xf32>
    %259 = arith.mulf %249, %258 : vector<4x128xf32>
    %260 = vector.broadcast %241 : vector<1x128xf32> to vector<4x128xf32>
    %261 = arith.mulf %259, %260 : vector<4x128xf32>
    %262 = vector.broadcast %243 : vector<1x128xf32> to vector<4x128xf32>
    %263 = arith.addf %261, %262 : vector<4x128xf32>
    %c2_155 = arith.constant 2 : index
    %c0_156 = arith.constant 0 : index
    %c0_157 = arith.constant 0 : index
    %264 = vector.load %arg6[%c2_155, %c0_156, %c0_157] : memref<3x128x256xf32, #tpu.memory_space<vmem>>, vector<1x128x256xf32>
    %265 = vector.shape_cast %264 : vector<1x128x256xf32> to vector<128x256xf32>
    %cst_158 = arith.constant dense<0.000000e+00> : vector<4x256xf32>
    %266 = tpu.matmul %263, %265, %cst_158 {dimension_numbers = #tpu.dot_dimension_numbers<[1], [0], [0], [1], [0, 0, 1, 1], [], []>} : vector<4x128xf32>, vector<128x256xf32>, vector<4x256xf32> -> vector<4x256xf32>
    %c2_159 = arith.constant 2 : index
    %c0_160 = arith.constant 0 : index
    %c0_161 = arith.constant 0 : index
    %267 = vector.load %arg7[%c2_159, %c0_160, %c0_161] : memref<3x1x256xf32, #tpu.memory_space<vmem>>, vector<1x1x256xf32>
    %268 = vector.shape_cast %267 : vector<1x1x256xf32> to vector<1x256xf32>
    %269 = vector.broadcast %268 : vector<1x256xf32> to vector<4x256xf32>
    %270 = arith.addf %266, %269 : vector<4x256xf32>
    %cst_162 = arith.constant 0.000000e+00 : f32
    %271 = vector.broadcast %cst_162 : f32 to vector<4x256xf32>
    %272 = arith.maximumf %270, %271 : vector<4x256xf32>
    %c2_163 = arith.constant 2 : index
    %c0_164 = arith.constant 0 : index
    %c0_165 = arith.constant 0 : index
    %273 = vector.load %arg8[%c2_163, %c0_164, %c0_165] : memref<3x256x128xf32, #tpu.memory_space<vmem>>, vector<1x256x128xf32>
    %274 = vector.shape_cast %273 : vector<1x256x128xf32> to vector<256x128xf32>
    %cst_166 = arith.constant dense<0.000000e+00> : vector<4x128xf32>
    %275 = tpu.matmul %272, %274, %cst_166 {dimension_numbers = #tpu.dot_dimension_numbers<[1], [0], [0], [1], [0, 0, 1, 1], [], []>} : vector<4x256xf32>, vector<256x128xf32>, vector<4x128xf32> -> vector<4x128xf32>
    %c2_167 = arith.constant 2 : index
    %c0_168 = arith.constant 0 : index
    %c0_169 = arith.constant 0 : index
    %276 = vector.load %arg9[%c2_167, %c0_168, %c0_169] : memref<3x1x128xf32, #tpu.memory_space<vmem>>, vector<1x1x128xf32>
    %277 = vector.shape_cast %276 : vector<1x1x128xf32> to vector<1x128xf32>
    %278 = vector.broadcast %277 : vector<1x128xf32> to vector<4x128xf32>
    %279 = arith.addf %275, %278 : vector<4x128xf32>
    %280 = arith.addf %263, %279 : vector<4x128xf32>
    %c2_170 = arith.constant 2 : index
    %c0_171 = arith.constant 0 : index
    %c0_172 = arith.constant 0 : index
    %281 = vector.load %arg12[%c2_170, %c0_171, %c0_172] : memref<3x1x128xf32, #tpu.memory_space<vmem>>, vector<1x1x128xf32>
    %282 = vector.shape_cast %281 : vector<1x1x128xf32> to vector<1x128xf32>
    %c2_173 = arith.constant 2 : index
    %c0_174 = arith.constant 0 : index
    %c0_175 = arith.constant 0 : index
    %283 = vector.load %arg13[%c2_173, %c0_174, %c0_175] : memref<3x1x128xf32, #tpu.memory_space<vmem>>, vector<1x1x128xf32>
    %284 = vector.shape_cast %283 : vector<1x1x128xf32> to vector<1x128xf32>
    %cst_176 = arith.constant dense<0.000000e+00> : vector<4xf32>
    %285 = vector.multi_reduction <add>, %280, %cst_176 [1] : vector<4x128xf32> to vector<4xf32>
    %286 = vector.shape_cast %285 : vector<4xf32> to vector<4x1xf32>
    %cst_177 = arith.constant 1.280000e+02 : f32
    %287 = vector.broadcast %cst_177 : f32 to vector<4x1xf32>
    %288 = arith.divf %286, %287 : vector<4x1xf32>
    %289 = vector.broadcast %288 : vector<4x1xf32> to vector<4x128xf32>
    %290 = arith.subf %280, %289 : vector<4x128xf32>
    %291 = arith.mulf %290, %290 : vector<4x128xf32>
    %cst_178 = arith.constant dense<0.000000e+00> : vector<4xf32>
    %292 = vector.multi_reduction <add>, %291, %cst_178 [1] : vector<4x128xf32> to vector<4xf32>
    %293 = vector.shape_cast %292 : vector<4xf32> to vector<4x1xf32>
    %cst_179 = arith.constant 1.280000e+02 : f32
    %294 = vector.broadcast %cst_179 : f32 to vector<4x1xf32>
    %295 = arith.divf %293, %294 : vector<4x1xf32>
    %cst_180 = arith.constant 9.99999974E-6 : f32
    %296 = vector.broadcast %cst_180 : f32 to vector<4x1xf32>
    %297 = arith.addf %295, %296 : vector<4x1xf32>
    %298 = math.rsqrt %297 : vector<4x1xf32>
    %299 = vector.broadcast %298 : vector<4x1xf32> to vector<4x128xf32>
    %300 = arith.mulf %290, %299 : vector<4x128xf32>
    %301 = vector.broadcast %282 : vector<1x128xf32> to vector<4x128xf32>
    %302 = arith.mulf %300, %301 : vector<4x128xf32>
    %303 = vector.broadcast %284 : vector<1x128xf32> to vector<4x128xf32>
    %304 = arith.addf %302, %303 : vector<4x128xf32>
    %305 = vector.shape_cast %304 : vector<4x128xf32> to vector<1x4x128xf32>
    %c0_181 = arith.constant 0 : index
    %c24 = arith.constant 24 : index
    %c0_182 = arith.constant 0 : index
    %306 = vector.load %arg14[%c0_181, %c24, %c0_182] : memref<1x28x128xf32, #tpu.memory_space<vmem>>, vector<1x4x128xf32>
    tpu.vector_store %arg14[%c0_181, %c24, %c0_182], %305 {strides = array<i32>} : memref<1x28x128xf32, #tpu.memory_space<vmem>>, vector<1x4x128xf32>,
    return
  }
  func.func @transform_0(%arg0: i32) -> (i32, i32, i32) {
    %c0_i32 = arith.constant 0 : i32
    %c0_i32_0 = arith.constant 0 : i32
    %c0_i32_1 = arith.constant 0 : i32
    return %arg0, %c0_i32, %c0_i32_0 : i32, i32, i32
  }
  func.func @transform_1(%arg0: i32) -> (i32, i32, i32) {
    %c0_i32 = arith.constant 0 : i32
    %c0_i32_0 = arith.constant 0 : i32
    %c0_i32_1 = arith.constant 0 : i32
    %c0_i32_2 = arith.constant 0 : i32
    return %c0_i32, %c0_i32_0, %c0_i32_1 : i32, i32, i32
  }
  func.func @transform_2(%arg0: i32) -> (i32, i32, i32) {
    %c0_i32 = arith.constant 0 : i32
    %c0_i32_0 = arith.constant 0 : i32
    %c0_i32_1 = arith.constant 0 : i32
    %c0_i32_2 = arith.constant 0 : i32
    return %c0_i32, %c0_i32_0, %c0_i32_1 : i32, i32, i32
  }
  func.func @transform_3(%arg0: i32) -> (i32, i32, i32) {
    %c0_i32 = arith.constant 0 : i32
    %c0_i32_0 = arith.constant 0 : i32
    %c0_i32_1 = arith.constant 0 : i32
    %c0_i32_2 = arith.constant 0 : i32
    return %c0_i32, %c0_i32_0, %c0_i32_1 : i32, i32, i32
  }
  func.func @transform_4(%arg0: i32) -> (i32, i32, i32) {
    %c0_i32 = arith.constant 0 : i32
    %c0_i32_0 = arith.constant 0 : i32
    %c0_i32_1 = arith.constant 0 : i32
    %c0_i32_2 = arith.constant 0 : i32
    return %c0_i32, %c0_i32_0, %c0_i32_1 : i32, i32, i32
  }
  func.func @transform_5(%arg0: i32) -> (i32, i32, i32) {
    %c0_i32 = arith.constant 0 : i32
    %c0_i32_0 = arith.constant 0 : i32
    %c0_i32_1 = arith.constant 0 : i32
    %c0_i32_2 = arith.constant 0 : i32
    return %c0_i32, %c0_i32_0, %c0_i32_1 : i32, i32, i32
  }
  func.func @transform_6(%arg0: i32) -> (i32, i32, i32) {
    %c0_i32 = arith.constant 0 : i32
    %c0_i32_0 = arith.constant 0 : i32
    %c0_i32_1 = arith.constant 0 : i32
    %c0_i32_2 = arith.constant 0 : i32
    return %c0_i32, %c0_i32_0, %c0_i32_1 : i32, i32, i32
  }
  func.func @transform_7(%arg0: i32) -> (i32, i32, i32) {
    %c0_i32 = arith.constant 0 : i32
    %c0_i32_0 = arith.constant 0 : i32
    %c0_i32_1 = arith.constant 0 : i32
    %c0_i32_2 = arith.constant 0 : i32
    return %c0_i32, %c0_i32_0, %c0_i32_1 : i32, i32, i32
  }
  func.func @transform_8(%arg0: i32) -> (i32, i32, i32) {
    %c0_i32 = arith.constant 0 : i32
    %c0_i32_0 = arith.constant 0 : i32
    %c0_i32_1 = arith.constant 0 : i32
    %c0_i32_2 = arith.constant 0 : i32
    return %c0_i32, %c0_i32_0, %c0_i32_1 : i32, i32, i32
  }
  func.func @transform_9(%arg0: i32) -> (i32, i32, i32) {
    %c0_i32 = arith.constant 0 : i32
    %c0_i32_0 = arith.constant 0 : i32
    %c0_i32_1 = arith.constant 0 : i32
    %c0_i32_2 = arith.constant 0 : i32
    return %c0_i32, %c0_i32_0, %c0_i32_1 : i32, i32, i32
  }
  func.func @transform_10(%arg0: i32) -> (i32, i32, i32) {
    %c0_i32 = arith.constant 0 : i32
    %c0_i32_0 = arith.constant 0 : i32
    %c0_i32_1 = arith.constant 0 : i32
    %c0_i32_2 = arith.constant 0 : i32
    return %c0_i32, %c0_i32_0, %c0_i32_1 : i32, i32, i32
  }
  func.func @transform_11(%arg0: i32) -> (i32, i32, i32) {
    %c0_i32 = arith.constant 0 : i32
    %c0_i32_0 = arith.constant 0 : i32
    %c0_i32_1 = arith.constant 0 : i32
    %c0_i32_2 = arith.constant 0 : i32
    return %c0_i32, %c0_i32_0, %c0_i32_1 : i32, i32, i32
  }
  func.func @transform_12(%arg0: i32) -> (i32, i32, i32) {
    %c0_i32 = arith.constant 0 : i32
    %c0_i32_0 = arith.constant 0 : i32
    %c0_i32_1 = arith.constant 0 : i32
    %c0_i32_2 = arith.constant 0 : i32
    return %c0_i32, %c0_i32_0, %c0_i32_1 : i32, i32, i32
  }
  func.func @transform_13(%arg0: i32) -> (i32, i32, i32) {
    %c0_i32 = arith.constant 0 : i32
    %c0_i32_0 = arith.constant 0 : i32
    %c0_i32_1 = arith.constant 0 : i32
    return %arg0, %c0_i32, %c0_i32_0 : i32, i32, i32
  }
  func.func @transform_14(%arg0: i32) -> (i32, i32, i32) {
    %c0_i32 = arith.constant 0 : i32
    %c0_i32_0 = arith.constant 0 : i32
    %c0_i32_1 = arith.constant 0 : i32
    return %arg0, %c0_i32, %c0_i32_0 : i32, i32, i32
  }
  func.func @transform_15(%arg0: i32) -> (i32, i32, i32) {
    %c0_i32 = arith.constant 0 : i32
    %c0_i32_0 = arith.constant 0 : i32
    %c0_i32_1 = arith.constant 0 : i32
    return %arg0, %c0_i32, %c0_i32_0 : i32, i32, i32
  }
  func.func @transform_16(%arg0: i32) -> (i32, i32, i32) {
    %c0_i32 = arith.constant 0 : i32
    %c0_i32_0 = arith.constant 0 : i32
    %c0_i32_1 = arith.constant 0 : i32
    return %arg0, %c0_i32, %c0_i32_0 : i32, i32, i32
  }
}

</mosaic_0001>

<bundles_post_ra>
// kernel: tpu_custom_call.1
= control target key start
LH: loop header
LB: loop body
LE: loop exit
PB: predicated region body
PF: predicated region fallthrough
CT: control target
= control target key end

     0   :  { %s3789_s0 = inlined_call_operand.hbm [shape: f32[2,16,128], index: 0, kind: input, shape index: {}]   ;;  %s3790_s1 = inlined_call_operand.hbm [shape: f32[3,128,384], index: 1, kind: input, shape index: {}]   ;;  %s3791_s2 = inlined_call_operand.hbm [shape: f32[3,1,384], index: 2, kind: input, shape index: {}]   ;;  %s3792_s3 = inlined_call_operand.hbm [shape: f32[3,128,128], index: 3, kind: input, shape index: {}]   ;;  %s3793_s4 = inlined_call_operand.vmem [shape: f32[3,1,128], index: 4, kind: input, shape index: {}]   ;;  %s3794_s5 = inlined_call_operand.hbm [shape: f32[3,128,256], index: 5, kind: input, shape index: {}]   ;;  %s3795_s6 = inlined_call_operand.hbm [shape: f32[3,1,256], index: 6, kind: input, shape index: {}]   ;;  %s3796_s7 = inlined_call_operand.hbm [shape: f32[3,256,128], index: 7, kind: input, shape index: {}]   ;;  %s3797_s8 = inlined_call_operand.vmem [shape: f32[3,1,128], index: 8, kind: input, shape index: {}]   ;;  %s3798_s9 = inlined_call_operand.hbm [shape: f32[3,1,128], index: 9, kind: input, shape index: {}]   ;;  %s3799_s10 = inlined_call_operand.vmem [shape: f32[3,1,128], index: 10, kind: input, shape index: {}]   ;;  %s3800_s11 = inlined_call_operand.hbm [shape: f32[3,1,128], index: 11, kind: input, shape index: {}]   ;;  %s3801_s12 = inlined_call_operand.hbm [shape: f32[3,1,128], index: 12, kind: input, shape index: {}]   ;;  %s3802_s13 = inlined_call_operand.vmem [shape: f32[2,28,128], index: 13, kind: output, shape index: {0}]   ;;  %s3803_s14 = inlined_call_operand.hbm [shape: f32[2,16,16], index: 14, kind: output, shape index: {1}]   ;;  %s3804_s15 = inlined_call_operand.hbm [shape: f32[2,8,8], index: 15, kind: output, shape index: {2}]   ;;  %s3805_s16 = inlined_call_operand.hbm [shape: f32[2,4,4], index: 16, kind: output, shape index: {3}]  }
   0x1   :  { %3819 = sst [smem:[#allocation31_spill]] %s3789_s0 }
   0x2   :  { %3820 = sst [smem:[#allocation32_spill]] %s3790_s1 }
   0x3   :  { %3821 = sst [smem:[#allocation33_spill]] %s3791_s2 }
   0x4   :  { %3822 = sst [smem:[#allocation34_spill]] %s3792_s3 }
   0x5   :  { %3823 = sst [smem:[#allocation35_spill]] %s3793_s4 }
   0x6   :  { %3824 = sst [smem:[#allocation36_spill]] %s3794_s5 }
   0x7   :  { %3825 = sst [smem:[#allocation37_spill]] %s3795_s6 }
   0x8   :  { %3826 = sst [smem:[#allocation38_spill]] %s3796_s7 }
   0x9   :  { %3827 = sst [smem:[#allocation39_spill]] %s3797_s8 }
   0xa   :  { %3828 = sst [smem:[#allocation40_spill]] %s3798_s9 }
   0xb   :  { %3829 = sst [smem:[#allocation41_spill]] %s3799_s10 }
   0xc   :  { %3830 = sst [smem:[#allocation42_spill]] %s3800_s11 }
   0xd   :  { %3831 = sst [smem:[#allocation43_spill]] %s3801_s12 }
   0xe   :  { %3832 = sst [smem:[#allocation44_spill]] %s3802_s13 }
   0xf   :  { %3833 = sst [smem:[#allocation45_spill]] %s3803_s14 }
  0x10   :  { %3834 = sst [smem:[#allocation46_spill]] %s3804_s15 }
  0x11   :  { %3835 = sst [smem:[#allocation47_spill]] %s3805_s16 }
  0x12   :  { %22 = vsyncpa [#allocation3], 0 }
  0x13   :  { %24 = vsyncpa [#allocation3 + $0x1], 0 }
  0x14   :  { %25 = vsyncpa [#allocation6], 0 }
  0x15   :  { %26 = vsyncpa [#allocation9], 0 }
  0x16   :  { %27 = vsyncpa [#allocation12], 0 }
  0x17   :  { %28 = vsyncpa [#allocation15], 0 }
  0x18   :  { %29 = vsyncpa [#allocation18], 0 }
  0x19   :  { %30 = vsyncpa [#allocation4], 0 }
  0x1a   :  { %32 = vsyncpa [#allocation4 + $0x1], 0 }
  0x1b   :  { %33 = vsyncpa [#allocation21], 0 }
  0x1c   :  { %35 = vsyncpa [#allocation21 + $0x1], 0  ;;  %s3300_s21 = smov 0   ;;  %s3302_s22 = smov 0  }
  0x1d   :  { %s3304_s23 = smov 0   ;;  %s3306_s24 = smov 0  }
  0x1e LB: > { %s3836_s1 = sld [smem:[#allocation32_spill]]  ;;  %s3324_s28 = sadd.s32 4294967295, %s3190_s24   ;;  %s3190_s24 = sphi %s3306_s24, %s3868_s24   ;;  %s3186_s23 = sphi %s3304_s23, %s3867_s23   ;;  %s3182_s22 = sphi %s3302_s22, %s3866_s22   ;;  %s3178_s21 = sphi %s3300_s21, %s3865_s21  }
  0x1f   : > { %p2477_p0 = scmp.ge.s32.totalorder %s3190_s24, 1  ;;  %p62_p1 = scmp.eq.s32.totalorder %s3324_s28, 0 }
  0x20   : > { %p428_p2 = scmp.lt.s32.totalorder %s3190_s24, 3  ;;  %s3192_s30 = smov [#allocation5]  }
  0x21   : > { %s441_s0 = sshll.u32 %s3192_s30, 4  ;;  %s3838_s3 = sld [smem:[#allocation34_spill]]  ;;  %s442_s0 = int_to_ptr.vmem [resolvable:$true] %s441_s0 }
  0x22   : > { %p3329_p3 = pnand %p2477_p0, %p428_p2  ;;  %s3193_s25 = smov [#allocation8]  }
  0x23   : > { %s469_s26 = sshll.u32 %s3193_s25, 4  ;;  %s3194_s30 = smov 384   ;;  %s470_s26 = int_to_ptr.vmem [resolvable:$true] %s469_s26 }
  0x24   : > { %s439_s27 = sshll.u32 %s3836_s1, 4  ;;  %p2574_p4 = pneg %p3329_p3  ;;  %s440_s27 = int_to_ptr.hbm [resolvable:$true] %s439_s27 }
  0x25   : > { %s3195_s1 = smov 24   ;;  %s3811_s16 = smov 128  }
  0x26   : > { %p3341_p6 = pnand %p2574_p4, %p62_p1  ;;  %s3815_s14 = smov 8  }
  0x27   : > { %s467_s19 = sshll.u32 %s3838_s3, 4  ;;  %s3840_s6 = sld [smem:[#allocation37_spill]]  ;;  %s468_s19 = int_to_ptr.hbm [resolvable:$true] %s467_s19 }
  0x28   : > { %2577 = dma.hbm_to_vmem [thread:$0]  (!%p3341_p6), %s440_s27, 18432, %s442_s0, [#allocation6], %s3194_s30, %s3194_s30, %s3195_s1  }
  0x29   : > { %2583 = dma.hbm_to_vmem [thread:$0]  (!%p3341_p6), %s468_s19, 6144, %s470_s26, [#allocation9], %s3811_s16, %s3811_s16, %s3815_s14  }
  0x2a   : > { %s3198_s15 = smov [#allocation11]   ;;  %s3199_s13 = smov 32  }
  0x2b   : > { %s500_s25 = sshll.u32 %s3198_s15, 4  ;;  %s3200_s8 = smov 2   ;;  %s501_s25 = int_to_ptr.vmem [resolvable:$true] %s500_s25 }
  0x2c   : > { %s3841_s9 = sld [smem:[#allocation40_spill]]  ;;  %s3201_s19 = smov [#allocation14]  }
  0x2d   : > { %s498_s3 = sshll.u32 %s3840_s6, 4  ;;  %s531_s26 = sshll.u32 %s3201_s19, 4  ;;  %s499_s3 = int_to_ptr.hbm [resolvable:$true] %s498_s3  ;;  %s532_s26 = int_to_ptr.vmem [resolvable:$true] %s531_s26 }
  0x2e   : > { %2589 = dma.hbm_to_vmem [thread:$0]  (!%p3341_p6), %s499_s3, 96, %s501_s25, [#allocation12], %s3199_s13, %s3199_s13, %s3200_s8  }
  0x2f   : > { %s3202_s30 = smov 16   ;;  %s3813_s17 = smov 1  }
  0x30   : > { %s3842_s2 = sld [smem:[#allocation33_spill]]  ;;  %s3204_s8 = smov [#allocation7]  }
  0x31   : > { %s455_s13 = sshll.u32 %s3204_s8, 4  ;;  %s3843_s5 = sld [smem:[#allocation36_spill]]  ;;  %s456_s13 = int_to_ptr.vmem [resolvable:$true] %s455_s13 }
  0x32   : > { %s529_s0 = sshll.u32 %s3841_s9, 4  ;;  %s3205_s19 = smov 48   ;;  %s530_s0 = int_to_ptr.hbm [resolvable:$true] %s529_s0 }
  0x33   : > { %2595 = dma.hbm_to_vmem [thread:$0]  (!%p3341_p6), %s530_s0, 48, %s532_s26, [#allocation15], %s3202_s30, %s3202_s30, %s3813_s17  }
  0x34   : > { %s3206_s16 = smov 3   ;;  %s3207_s0 = smov [#allocation10]  }
  0x35   : > { %s486_s26 = sshll.u32 %s3207_s0, 4  ;;  %s3844_s7 = sld [smem:[#allocation38_spill]]  ;;  %s487_s26 = int_to_ptr.vmem [resolvable:$true] %s486_s26 }
  0x36   : > { %s453_s3 = sshll.u32 %s3842_s2, 4  ;;  %s3208_s8 = smov 256   ;;  %s454_s3 = int_to_ptr.hbm [resolvable:$true] %s453_s3 }
  0x37   : > { %s484_s27 = sshll.u32 %s3843_s5, 4  ;;  %s3209_s25 = smov [#allocation13]   ;;  %s485_s27 = int_to_ptr.hbm [resolvable:$true] %s484_s27 }
  0x38   : > { %2580 = dma.hbm_to_vmem [thread:$0]  (!%p3341_p6), %s454_s3, 144, %s456_s13, [#allocation6], %s3205_s19, %s3205_s19, %s3206_s16  }
  0x39   : > { %2586 = dma.hbm_to_vmem [thread:$0]  (!%p3341_p6), %s485_s27, 12288, %s487_s26, [#allocation9], %s3208_s8, %s3208_s8, %s3202_s30  }
  0x3a   : > { %s514_s1 = sshll.u32 %s3209_s25, 4  ;;  %s3845_s11 = sld [smem:[#allocation42_spill]]  ;;  %s515_s1 = int_to_ptr.vmem [resolvable:$true] %s514_s1 }
  0x3b   : > { %s512_s17 = sshll.u32 %s3844_s7, 4  ;;  %s3846_s13 = smov 8   ;;  %s513_s17 = int_to_ptr.hbm [resolvable:$true] %s512_s17 }
  0x3c   : > { %s3847_s19 = smov 128   ;;  %s3848_s12 = sld [smem:[#allocation43_spill]] }
  0x3d   : > { %2592 = dma.hbm_to_vmem [thread:$0]  (!%p3341_p6), %s513_s17, 12288, %s515_s1, [#allocation12], %s3847_s19, %s3847_s19, %s3846_s13  }
  0x3e   : > { %s3210_s15 = smov [#allocation16]   ;;  %s3849_s18 = smov 1  }
  0x3f   : > { %s548_s14 = sshll.u32 %s3210_s15, 4  ;;  %s3211_s17 = smov [#allocation17]   ;;  %s549_s14 = int_to_ptr.vmem [resolvable:$true] %s548_s14 }
  0x40   : > { %s546_s3 = sshll.u32 %s3845_s11, 4  ;;  %s562_s8 = sshll.u32 %s3211_s17, 4  ;;  %s547_s3 = int_to_ptr.hbm [resolvable:$true] %s546_s3  ;;  %s563_s8 = int_to_ptr.vmem [resolvable:$true] %s562_s8 }
  0x41   : > { %2598 = dma.hbm_to_vmem [thread:$0]  (!%p3341_p6), %s547_s3, 48, %s549_s14, [#allocation15], %s3202_s30, %s3202_s30, %s3849_s18  }
  0x42   : > { %s560_s26 = sshll.u32 %s3848_s12, 4  ;;  %s3817_s25 = sadd.s32 4294967294, %s3190_s24   ;;  %s561_s26 = int_to_ptr.hbm [resolvable:$true] %s560_s26 }
  0x43   : > { %2601 = dma.hbm_to_vmem [thread:$0]  (!%p3341_p6), %s561_s26, 48, %s563_s8, [#allocation18], %s3202_s30, %s3202_s30, %s3849_s18  }
  0x44   : > { %s3402_s1 = sadd.s32 1, %s3190_s24   ;;  %s48_s27 = sadd.s32 1, %s3186_s23 }
  0x45   : > { %s45_s16 = ssub.s32 %s3190_s24, %s3402_s1  ;;  %p55_p8 = scmp.ne.s32.totalorder %s3186_s23, %s3182_s22 }
  0x46   : > { %p46_p7 = scmp.eq.s32.totalorder %s45_s16, 0  ;;  %p56_p9 = scmp.eq.s32.totalorder %s3190_s24, 0 }
  0x47   : > { %p61_p10 = scmp.ne.s32.totalorder %s3182_s22, %s3178_s21  ;;  %p363_p13 = scmp.eq.s32.totalorder %s3324_s28, 1 }
  0x48   : > { %s3413_s3 = scalar_select %p46_p7, %s3186_s23, %s48_s27  }
  0x49   : > { %p3415_p11 = por %p56_p9, %p55_p8  ;;  %p3421_p12 = por %p62_p1, %p61_p10 }
  0x4a   : > { %p369_p0 = scmp.eq.s32.totalorder %s3817_s25, 1  ;;  %p2625_p2 = scmp.lt.s32.totalorder %s3190_s24, 2 }
  0x4b   : > { %s576_s0 = sand.u32 1, %s3186_s23   ;;  %p3430_p4 = por %p363_p13, %p55_p8 }
  0x4c   : > { %p3434_p6 = por %p369_p0, %p61_p10  ;;  %s2488_s14 = sshll.u32 %s576_s0, 4 }
  0x4d   : > { %s2527_s18 = sshll.u32 %s3190_s24, 4  ;;  %s3854_s16 = sld [smem:[#allocation31_spill]] }
  0x4e   : > { %s580_s2 = scalar_lea.vmem [#allocation2], %s2488_s14  ;;  %p3444_p7 = pnand %p2625_p2, %p3415_p11 }
  0x4f   : > { %s588_s5 = sshll.u32 %s580_s2, 4  ;;  %s577_s7 = scalar_lea.sflag [#allocation3], %s576_s0  ;;  %s589_s5 = int_to_ptr.vmem [resolvable:$true] %s588_s5 }
  0x50   : > { %p3018_p9 = pneg %p3444_p7 }
  0x53   : > { %s585_s27 = scalar_lea.hbm %s3854_s16, %s2527_s18  ;;  %s3021_s18 = scalar_lea.hbm %s3854_s16, 32 }
  0x54   : > { %s586_s6 = sshll.u32 %s585_s27, 4  ;;  %s587_s6 = int_to_ptr.hbm [resolvable:$true] %s586_s6 }
  0x55   : > { %s3014_s9 = sshra.s32 %s587_s6, 4  ;;  %s3015_s9 = int_to_ptr.hbm [resolvable:$true] %s3014_s9 }
  0x56   : > { %s3016_s11 = scalar_lea.hbm %s3015_s9, 16  ;;  %p3022_p11 = scmp.lt.s32.totalorder %s3015_s9, %s3854_s16 }
  0x57   : > { %p3017_p8 = scmp.ne.s32.totalorder %s3015_s9, %s3016_s11  ;;  %p3023_p0 = scmp.lt.s32.totalorder %s3021_s18, %s3016_s11 }
  0x59   : > { %p3019_p10 = pnand %p3018_p9, %p3017_p8  ;;  %p3024_p2 = por %p3023_p0, %p3022_p11 }
  0x5b   : > { %p3020_p13 = pneg %p3019_p10 }
  0x5d   : > { %p3025_p5 = pnand %p3024_p2, %p3020_p13 }
  0x5f   : > { %3028 = shalt.err (!%p3025_p5)
}
  0x60   : > { %2605 = dma.hbm_to_vmem [thread:$0]  (!%p3444_p7), %s587_s6, 256, %s589_s5, %s577_s7, %s3847_s19, %s3847_s19, %s3846_s13  }
  0x61   : > { %600 = sbr.rel (%p3329_p3) target bundleno = 3877 (0xf25), region = 72  ;;  %s3464_s0 = sand.u32 (!%p3329_p3), 1, %s3182_s22  }
  0x62   : > { %s2492_s9 = sshll.u32 (!%p3329_p3), %s3464_s0, 4  ;;  %s603_s11 = scalar_lea.sflag (!%p3329_p3), [#allocation3], %s3464_s0 }
  0x63   : > { %s3470_s8 = scalar_lea.vmem (!%p3329_p3), [#allocation2], %s2492_s9 }
  0x66   : > { %3145 = dma.done.wait (%p3421_p12), %s603_s11, 256  }
  0x67   : > { %3147 = vsyncadd (%p3421_p12), %s603_s11, 4294967040 }
  0x68   : > { %3149 = dma.done.wait (%p62_p1), [#allocation6], 18576  }
  0x69   : > { %3151 = vsyncadd (%p62_p1), [#allocation6], 4294948720 }
  0x6a   : > { %3153 = dma.done.wait (%p62_p1), [#allocation9], 18432  }
  0x6b   : > { %3155 = vsyncadd (%p62_p1), [#allocation9], 4294948864 }
  0x6c   : > { %3157 = dma.done.wait (%p62_p1), [#allocation12], 12384  }
  0x6d   : > { %3159 = vsyncadd (%p62_p1), [#allocation12], 4294954912 }
  0x6e   : > { %3161 = dma.done.wait (%p62_p1), [#allocation15], 96  }
  0x6f   : > { %3163 = vsyncadd (%p62_p1), [#allocation15], 4294967200 }
  0x70   : > { %3165 = dma.done.wait (%p62_p1), [#allocation18], 48  }
  0x71   : > { %3167 = vsyncadd (%p62_p1), [#allocation18], 4294967248  ;;  %v769_v0 = vld [vmem:[#allocation5 + $0x170] sm:$0xff]  ;;  %v766_v1 = vld [vmem:[#allocation5 + $0x158] sm:$0xff]  ;;  %vm873_vm0 = vcmask 130048   ;;  %s3519_s5 = scalar_lea.vmem [#allocation19], %s2492_s9 }
  0x72   : > { %802 = vmatpush.msra.mxu1 %v769_v0  ;;  %v763_v2 = vld [vmem:[#allocation5 + $0x140] sm:$0xff]  ;;  %v768_v3 = vld [vmem:[#allocation5 + $0x168] sm:$0xff]  ;;  %v765_v4 = vld [vmem:[#allocation5 + $0x150] sm:$0xff]  ;;  %s3856_s4 = sld [smem:[#allocation35_spill]]  ;;  %vm1396_vm8 = vcmask 64512   ;;  %s2503_s27 = sshll.u32 %s3464_s0, 3 }
  0x73   : > { %779 = vmatpush.msra.mxu0 %v768_v3  ;;  %v760_v5 = vld [vmem:[#allocation5 + $0x128] sm:$0xff]  ;;  %v762_v6 = vld [vmem:[#allocation5 + $0x138] sm:$0xff]  ;;  %v757_v7 = vld [vmem:[#allocation5 + $0x110] sm:$0xff]  ;;  %s3857_s10 = sld [smem:[#allocation41_spill]]  ;;  %s3581_s14 = scalar_lea.vmem [#allocation20], %s2503_s27  ;;  %vm1843_vm12 = vcmask 27648  }
  0x74   : > { %803 = vmatpush.msra.mxu1 %v766_v1  ;;  %v759_v8 = vld [vmem:[#allocation5 + $0x120] sm:$0xff]  ;;  %v754_v9 = vld [vmem:[#allocation5 + $0xf8] sm:$0xff]  ;;  %v756_v10 = vld [vmem:[#allocation5 + $0x108] sm:$0xff]  ;;  %s3858_s30 = sld [smem:[#allocation39_spill]]  ;;  %vm1860_vm13 = vcmask 1043456   ;;  %s2504_s9 = sshll.u32 %s3464_s0, 2 }
  0x75   : > { %780 = vmatpush.msra.mxu0 %v765_v4  ;;  %v751_v11 = vld [vmem:[#allocation5 + $0xe0] sm:$0xff]  ;;  %v753_v12 = vld [vmem:[#allocation5 + $0xf0] sm:$0xff]  ;;  %v748_v13 = vld [vmem:[#allocation5 + $0xc8] sm:$0xff]  ;;  %vm1856_vm14 = vcmask 31744   ;;  %s3626_s11 = scalar_lea.vmem [#allocation22], %s2504_s9  ;;  %vm1934_vm15 = vcmask 1047556  }
  0x76   : > { %804 = vmatpush.msra.mxu1 %v763_v2  ;;  %v750_v14 = vld [vmem:[#allocation5 + $0xd8] sm:$0xff]  ;;  %v745_v15 = vld [vmem:[#allocation5 + $0xb0] sm:$0xff]  ;;  %v747_v16 = vld [vmem:[#allocation5 + $0xc0] sm:$0xff]  ;;  %p716_p1 = scmp.lt.s32.totalorder %s3324_s28, 1  ;;  %s3859_s2 = sld [smem:[#allocation44_spill]] }
  0x77   : > { %781 = vmatpush.msra.mxu0 %v762_v6  ;;  %v742_v17 = vld [vmem:[#allocation5 + $0x98] sm:$0xff]  ;;  %v744_v18 = vld [vmem:[#allocation5 + $0xa8] sm:$0xff]  ;;  %v739_v19 = vld [vmem:[#allocation5 + $0x80] sm:$0xff]  ;;  %s2523_s6 = sshll.u32 %s3324_s28, 3  ;;  %s2529_s25 = sshll.u32 %s3324_s28, 4 }
  0x78   : > { %805 = vmatpush.msra.mxu1 %v760_v5  ;;  %v741_v20 = vld [vmem:[#allocation5 + $0x90] sm:$0xff]  ;;  %v736_v21 = vld [vmem:[#allocation5 + $0x68] sm:$0xff]  ;;  %v738_v22 = vld [vmem:[#allocation5 + $0x78] sm:$0xff]  ;;  %s717_s13 = scalar_select %p716_p1, %s3324_s28, 1 }
  0x79   : > { %782 = vmatpush.msra.mxu0 %v759_v8  ;;  %v733_v23 = vld [vmem:[#allocation5 + $0x50] sm:$0xff]  ;;  %v735_v24 = vld [vmem:[#allocation5 + $0x60] sm:$0xff]  ;;  %v730_v25 = vld [vmem:[#allocation5 + $0x38] sm:$0xff]  ;;  %s2177_s27 = sand.u32 1, %s3324_s28  }
  0x7a   : > { %806 = vmatpush.msra.mxu1 %v757_v7  ;;  %v732_v26 = vld [vmem:[#allocation5 + $0x48] sm:$0xff]  ;;  %v727_v27 = vld [vmem:[#allocation5 + $0x20] sm:$0xff]  ;;  %v729_v28 = vld [vmem:[#allocation5 + $0x30] sm:$0xff]  ;;  %s2528_s19 = sshll.u32 %s717_s13, 5  ;;  %s3860_s13 = sld [smem:[#allocation46_spill]] }
  0x7b   : > { %783 = vmatpush.msra.mxu0 %v756_v10  ;;  %v724_v29 = vld [vmem:[#allocation5 + $0x8] sm:$0xff]  ;;  %v726_v30 = vld [vmem:[#allocation5 + $0x18] sm:$0xff]  ;;  %v3497_v31 = vld [vmem:[%s3470_s8] sm:$0xff] }
  0x7c   : > { %807 = vmatpush.msra.mxu1 %v754_v9  ;;  %v723_v32 = vld [vmem:[#allocation5] sm:$0xff]  ;;  %v3502_v33 = vld [vmem:[%s3470_s8 + $0x8] sm:$0xff]  ;;  %v761_v48 = vld [vmem:[#allocation5 + $0x130] sm:$0xff]  ;;  %s3681_s18 = scalar_lea.vmem %s3859_s2, %s2528_s19  ;;  %s2215_s2 = sshll.u32 %s3581_s14, 4  ;;  %s2216_s2 = int_to_ptr.vmem [resolvable:$true] %s2215_s2 }
  0x7d   : > { %784 = vmatpush.msra.mxu0 %v753_v12  ;;  %v3506_v35 = vld [vmem:[#allocation7] sm:$0x7]  ;;  %v770_v45 = vld [vmem:[#allocation5 + $0x178] sm:$0xff]  ;;  %v764_v47 = vld [vmem:[#allocation5 + $0x148] sm:$0xff] }
  0x7e   : > { %808 = vmatpush.msra.mxu1 %v751_v11  ;;  %v774_v36 = vperm.slane %v3506_v35, 1  ;;  %v773_v40 = vperm.slane %v3506_v35, 0  ;;  %v767_v46 = vld [vmem:[#allocation5 + $0x160] sm:$0xff]  ;;  %825 = vmatpush.msra.mxu2 %v770_v45  ;;  %v758_v49 = vld [vmem:[#allocation5 + $0x118] sm:$0xff]  ;;  %v752_v51 = vld [vmem:[#allocation5 + $0xe8] sm:$0xff] }
  0x7f   : > { %785 = vmatpush.msra.mxu0 %v750_v14  ;;  %v755_v50 = vld [vmem:[#allocation5 + $0x100] sm:$0xff]  ;;  %v749_v52 = vld [vmem:[#allocation5 + $0xd0] sm:$0xff]  ;;  %v746_v53 = vld [vmem:[#allocation5 + $0xb8] sm:$0xff]  ;;  %v775_v14 = vperm.slane %v3506_v35, 2 }
  0x80   : > { %809 = vmatpush.msra.mxu1 %v748_v13  ;;  %826 = vmatpush.msra.mxu2 %v767_v46  ;;  %v743_v54 = vld [vmem:[#allocation5 + $0xa0] sm:$0xff]  ;;  %v740_v55 = vld [vmem:[#allocation5 + $0x88] sm:$0xff]  ;;  %v737_v57 = vld [vmem:[#allocation5 + $0x70] sm:$0xff]  ;;  %s2213_s19 = scalar_lea.hbm %s3860_s13, %s2523_s6 }
  0x81   : > { %786 = vmatpush.msra.mxu0 %v747_v16  ;;  %v734_v59 = vld [vmem:[#allocation5 + $0x58] sm:$0xff]  ;;  %v731_v61 = vld [vmem:[#allocation5 + $0x40] sm:$0xff]  ;;  %v728_v62 = vld [vmem:[#allocation5 + $0x28] sm:$0xff]  ;;  %s2217_s17 = sshll.u32 %s2213_s19, 4  ;;  %s2218_s17 = int_to_ptr.hbm [resolvable:$true] %s2217_s17 }
  0x82   : > { %810 = vmatpush.msra.mxu1 %v745_v15  ;;  %827 = vmatpush.msra.mxu2 %v764_v47  ;;  %v725_v0 = vld [vmem:[#allocation5 + $0x10] sm:$0xff]  ;;  %s3058_s12 = sshra.s32 %s2218_s17, 4  ;;  %s3059_s12 = int_to_ptr.hbm [resolvable:$true] %s3058_s12 }
  0x83   : > { %787 = vmatpush.msra.mxu0 %v744_v18  ;;  %v942_v18 = vld [vmem:[#allocation8 + $0x78] sm:$0xff]  ;;  %s3060_s16 = scalar_lea.hbm %s3059_s12, 8  ;;  %p3065_p7 = scmp.lt.s32.totalorder %s3059_s12, %s3860_s13 }
  0x84   : > { %811 = vmatpush.msra.mxu1 %v742_v17  ;;  %828 = vmatpush.msra.mxu2 %v761_v48  ;;  %p3061_p3 = scmp.ne.s32.totalorder %s3059_s12, %s3060_s16 }
  0x85   : > { %788 = vmatpush.msra.mxu0 %v741_v20  ;;  %v940_v20 = vld [vmem:[#allocation8 + $0x68] sm:$0xff] }
  0x86   : > { %812 = vmatpush.msra.mxu1 %v739_v19  ;;  %829 = vmatpush.msra.mxu2 %v758_v49  ;;  %v941_v19 = vld [vmem:[#allocation8 + $0x70] sm:$0xff]  ;;  %p3062_p5 = pnand %p3061_p3, %p3430_p4 }
  0x87   : > { %789 = vmatpush.msra.mxu0 %v738_v22  ;;  %v938_v22 = vld [vmem:[#allocation8 + $0x58] sm:$0xff] }
  0x88   : > { %813 = vmatpush.msra.mxu1 %v736_v21  ;;  %830 = vmatpush.msra.mxu2 %v755_v50  ;;  %v939_v21 = vld [vmem:[#allocation8 + $0x60] sm:$0xff]  ;;  %p3063_p12 = pneg %p3062_p5 }
  0x89   : > { %790 = vmatpush.msra.mxu0 %v735_v24  ;;  %v936_v24 = vld [vmem:[#allocation8 + $0x48] sm:$0xff] }
  0x8a   : > { %814 = vmatpush.msra.mxu1 %v733_v23  ;;  %831 = vmatpush.msra.mxu2 %v752_v51  ;;  %v937_v23 = vld [vmem:[#allocation8 + $0x50] sm:$0xff]  ;;  %v3212_v51 = vmov 128.0  }
  0x8b   : > { %791 = vmatpush.msra.mxu0 %v732_v26 }
  0x8c   : > { %815 = vmatpush.msra.mxu1 %v730_v25  ;;  %832 = vmatpush.msra.mxu2 %v749_v52  ;;  %v935_v25 = vld [vmem:[#allocation8 + $0x40] sm:$0xff] }
  0x8d   : > { %792 = vmatpush.msra.mxu0 %v729_v28  ;;  %v933_v28 = vld [vmem:[#allocation8 + $0x30] sm:$0xff] }
  0x8e   : > { %816 = vmatpush.msra.mxu1 %v727_v27  ;;  %833 = vmatpush.msra.mxu2 %v746_v53  ;;  %v934_v27 = vld [vmem:[#allocation8 + $0x38] sm:$0xff] }
  0x8f   : > { %793 = vmatpush.msra.mxu0 %v726_v30  ;;  %v931_v30 = vld [vmem:[#allocation8 + $0x20] sm:$0xff] }
  0x90   : > { %817 = vmatpush.msra.mxu1 %v724_v29  ;;  %834 = vmatpush.msra.mxu2 %v743_v54  ;;  %v932_v29 = vld [vmem:[#allocation8 + $0x28] sm:$0xff]  ;;  %v1062_v54 = vld [vmem:[#allocation10 + $0xf8] sm:$0xff] }
  0x91   : > { %818 = vmatmul.f32.vlgmr.msra.gmra.mxu1 %v3497_v31  ;;  %794 = vmatpush.msra.mxu0 %v723_v32 }
  0x92   : > { %795 = vmatmul.f32.vlgmr.msra.gmra.mxu0 %v3497_v31  ;;  %835 = vmatpush.msra.mxu2 %v740_v55  ;;  %v1060_v55 = vld [vmem:[#allocation10 + $0xe8] sm:$0xff] }
  0x93   : > { %1092 = vmatpush.msrb.mxu1 %v1062_v54  ;;  %v1274_v54 = vld [vmem:[#allocation5 + $0x200] sm:$0xff] }
  0x94   : > { %836 = vmatpush.msra.mxu2 %v737_v57  ;;  %v1059_v57 = vld [vmem:[#allocation10 + $0xe0] sm:$0xff] }
  0x95   : > { %1093 = vmatpush.msrb.mxu1 %v1060_v55 }
  0x96   : > { %837 = vmatpush.msra.mxu2 %v734_v59  ;;  %v1057_v59 = vld [vmem:[#allocation10 + $0xd0] sm:$0xff] }
  0x98   : > { %838 = vmatpush.msra.mxu2 %v731_v61  ;;  %v1055_v61 = vld [vmem:[#allocation10 + $0xc0] sm:$0xff] }
  0x99   : > { %821 = vmatmul.f32.gmra.mxu1 %v3502_v33 }
  0x9a   : > { %798 = vmatmul.f32.gmra.mxu0 %v3502_v33  ;;  %839 = vmatpush.msra.mxu2 %v728_v62  ;;  %v1054_v62 = vld [vmem:[#allocation10 + $0xb8] sm:$0xff] }
  0x9c   : > { %840 = vmatpush.msra.mxu2 %v725_v0 }
  0x9d   : > { %841 = vmatmul.f32.vlgmr.msra.gmra.mxu2 %v3497_v31 }
  0xa5   : > { %844 = vmatmul.f32.gmra.mxu2 %v3502_v33 }
 0x10e   : > { %v819_v34 = vpop.f32.mrf.mxu1 }
 0x10f   : > { %v796_v39 = vpop.f32.mrf.mxu0  ;;  %v820_v41 = vadd.f32 %v819_v34, %v774_v36 }
 0x110   : > { %v797_v42 = vadd.f32 %v796_v39, %v773_v40 }
 0x116   : > { %v822_v37 = vpop.f32.mrf.mxu1 }
 0x117   : > { %v823_v38 = vadd.f32 %v822_v37, %v774_v36  ;;  %v799_v43 = vpop.f32.mrf.mxu0  ;;  %v930_v36 = vld [vmem:[#allocation8 + $0x18] sm:$0xff]  ;;  %v929_v37 = vld [vmem:[#allocation8 + $0x10] sm:$0xff] }
 0x118   : > { %v800_v44 = vadd.f32 %v799_v43, %v773_v40 }
 0x119   : > { %862 = vmatpush.xpose.msrb.mxu0 %v823_v38  ;;  %v928_v38 = vld [vmem:[#allocation8 + $0x8] sm:$0xff] }
 0x11d   : > { %863 = vmatpush.xpose.msrb.mxu0 %v820_v41  ;;  %v927_v41 = vld [vmem:[#allocation8] sm:$0xff] }
 0x120   : > { %864 = vmatmul.f32.vlgmr.msrb.gmra.mxu0 %v797_v42  ;;  %v842_v13 = vpop.f32.mrf.mxu2 }
 0x121   : > { %v843_v16 = vadd.f32 %v842_v13, %v775_v14 }
 0x128   : > { %867 = vmatmul.f32.gmra.mxu0 %v800_v44  ;;  %v845_v15 = vpop.f32.mrf.mxu2  ;;  %v2691_v44 = vld [vmem:[%s3856_s4] ss:$0 sm:$0xff] }
 0x129   : > { %v846_v17 = vadd.f32 %v845_v15, %v775_v14 }
 0x12b   : > { %918 = vmatpush.msra.mxu3 %v846_v17 }
 0x12d   : > { %919 = vmatpush.msra.mxu3 %v843_v16 }
 0x12f   : > { %947 = vmatpush.msrb.mxu3 %v942_v18  ;;  %v1044_v18 = vld [vmem:[#allocation10 + $0x68] sm:$0xff] }
 0x131   : > { %948 = vmatpush.msrb.mxu3 %v941_v19  ;;  %v1045_v19 = vld [vmem:[#allocation10 + $0x70] sm:$0xff] }
 0x133   : > { %949 = vmatpush.msrb.mxu3 %v940_v20  ;;  %v1042_v20 = vld [vmem:[#allocation10 + $0x58] sm:$0xff] }
 0x135   : > { %950 = vmatpush.msrb.mxu3 %v939_v21  ;;  %v1043_v21 = vld [vmem:[#allocation10 + $0x60] sm:$0xff] }
 0x137   : > { %951 = vmatpush.msrb.mxu3 %v938_v22  ;;  %v1040_v22 = vld [vmem:[#allocation10 + $0x48] sm:$0xff] }
 0x139   : > { %952 = vmatpush.msrb.mxu3 %v937_v23  ;;  %v1041_v23 = vld [vmem:[#allocation10 + $0x50] sm:$0xff] }
 0x13b   : > { %953 = vmatpush.msrb.mxu3 %v936_v24  ;;  %v1038_v24 = vld [vmem:[#allocation10 + $0x38] sm:$0xff] }
 0x13d   : > { %954 = vmatpush.msrb.mxu3 %v935_v25  ;;  %v1039_v25 = vld [vmem:[#allocation10 + $0x40] sm:$0xff] }
 0x13f   : > { %955 = vmatpush.msrb.mxu3 %v934_v27  ;;  %v1037_v27 = vld [vmem:[#allocation10 + $0x30] sm:$0xff] }
 0x141   : > { %956 = vmatpush.msrb.mxu3 %v933_v28  ;;  %v1034_v28 = vld [vmem:[#allocation10 + $0x18] sm:$0xff] }
 0x143   : > { %957 = vmatpush.msrb.mxu3 %v932_v29  ;;  %v1035_v29 = vld [vmem:[#allocation10 + $0x20] sm:$0xff] }
 0x145   : > { %958 = vmatpush.msrb.mxu3 %v931_v30  ;;  %v1032_v30 = vld [vmem:[#allocation10 + $0x8] sm:$0xff] }
 0x147   : > { %959 = vmatpush.msrb.mxu3 %v930_v36  ;;  %v1301_v36 = vld [vmem:[#allocation5 + $0x2d8] sm:$0xff] }
 0x149   : > { %960 = vmatpush.msrb.mxu3 %v929_v37  ;;  %v1303_v37 = vld [vmem:[#allocation5 + $0x2e8] sm:$0xff] }
 0x14b   : > { %961 = vmatpush.msrb.mxu3 %v928_v38  ;;  %v1298_v38 = vld [vmem:[#allocation5 + $0x2c0] sm:$0xff] }
 0x14d   : > { %962 = vmatpush.msrb.mxu3 %v927_v41  ;;  %v1297_v41 = vld [vmem:[#allocation5 + $0x2b8] sm:$0xff] }
 0x19d   : > { %v865_v56 = vpop.f32.mrf.mxu0 }
 0x19e   : > { %v871_v58 = vmul.f32 0.088388346, %v865_v56  ;;  %v1061_v56 = vld [vmem:[#allocation10 + $0xf0] sm:$0xff] }
 0x19f   : > { %1069 = vmatpush.msra.mxu0 %v1061_v56  ;;  %v1276_v56 = vld [vmem:[#allocation5 + $0x210] sm:$0xff] }
 0x1a0   : > { %v874_v60 = vsel %vm873_vm0, %v871_v58, -inf }
 0x1a1   : > { %875 = vmax.xlane.f32.xlu0 %v874_v60  ;;  %1070 = vmatpush.msra.mxu0 %v1059_v57 }
 0x1a3   : > { %1071 = vmatpush.msra.mxu0 %v1057_v59 }
 0x1a5   : > { %v868_v63 = vpop.f32.mrf.mxu0  ;;  %1072 = vmatpush.msra.mxu0 %v1055_v61  ;;  %v1270_v61 = vld [vmem:[#allocation5 + $0x1e0] sm:$0xff] }
 0x1a6   : > { %v872_v1 = vmul.f32 0.088388346, %v868_v63  ;;  %v1053_v63 = vld [vmem:[#allocation10 + $0xb0] sm:$0xff] }
 0x1a7   : > { %1073 = vmatpush.msra.mxu0 %v1053_v63  ;;  %v1267_v63 = vld [vmem:[#allocation5 + $0x1c8] sm:$0xff] }
 0x1a8   : > { %v877_v2 = vsel %vm873_vm0, %v872_v1, -inf }
 0x1a9   : > { %878 = vmax.xlane.f32.xlu0 %v877_v2  ;;  %v1051_v2 = vld [vmem:[#allocation10 + $0xa0] sm:$0xff] }
 0x1aa   : > { %1074 = vmatpush.msra.mxu0 %v1051_v2  ;;  %v1264_v2 = vld [vmem:[#allocation5 + $0x1b0] sm:$0xff] }
 0x214   : > { %v876_v3 = vpop.xlane.xlu0 %875 }
 0x215   : > { %v880_v4 = vsub.f32 %v871_v58, %v876_v3  ;;  %v1058_v58 = vld [vmem:[#allocation10 + $0xd8] sm:$0xff] }
 0x216   : > { %1094 = vmatpush.msrb.mxu1 %v1058_v58  ;;  %v1050_v3 = vld [vmem:[#allocation10 + $0x98] sm:$0xff] }
 0x217   : > { %v882_v5 = vmul.f32 1.442695, %v880_v4  ;;  %v1049_v4 = vld [vmem:[#allocation10 + $0x90] sm:$0xff]  ;;  %v1271_v58 = vld [vmem:[#allocation5 + $0x1e8] sm:$0xff] }
 0x218   : > { %1075 = vmatpush.msra.mxu0 %v1049_v4  ;;  %v1259_v4 = vld [vmem:[#allocation5 + $0x188] sm:$0xff] }
 0x219   : > { %2709 = vpow2.f32 %v882_v5 }
 0x21c   : > { %v879_v6 = vpop.xlane.xlu0 %878 }
 0x21d   : > { %v881_v7 = vsub.f32 %v872_v1, %v879_v6  ;;  %v1052_v1 = vld [vmem:[#allocation10 + $0xa8] sm:$0xff] }
 0x21e   : > { %v1048_v6 = vld [vmem:[#allocation10 + $0x88] sm:$0xff] }
 0x21f   : > { %v2710_v8 = vpop.eup %2709  ;;  %v884_v9 = vmul.f32 1.442695, %v881_v7  ;;  %v1047_v7 = vld [vmem:[#allocation10 + $0x80] sm:$0xff] }
 0x220   : > { %v886_v10 = vsel %vm873_vm0, %v2710_v8, 0.0  ;;  %1076 = vmatpush.msra.mxu0 %v1047_v7 }
 0x221   : > { %2711 = vpow2.f32 %v884_v9  ;;  %887 = vadd.xlane.f32.xlu1 %v886_v10 }
 0x222   : > { %1077 = vmatpush.msra.mxu0 %v1045_v19 }
 0x224   : > { %1078 = vmatpush.msra.mxu0 %v1043_v21  ;;  %v1131_v21 = vld [vmem:[#allocation13 + $0x60] sm:$0xff] }
 0x226   : > { %1079 = vmatpush.msra.mxu0 %v1041_v23  ;;  %v1147_v23 = vld [vmem:[#allocation13 + $0xe0] sm:$0xff] }
 0x227   : > { %v2712_v11 = vpop.eup %2711 }
 0x228   : > { %v889_v12 = vsel %vm873_vm0, %v2712_v11, 0.0  ;;  %1080 = vmatpush.msra.mxu0 %v1039_v25  ;;  %v1130_v25 = vld [vmem:[#allocation13 + $0x58] sm:$0xff] }
 0x229   : > { %890 = vadd.xlane.f32.xlu1 %v889_v12 }
 0x22a   : > { %1081 = vmatpush.msra.mxu0 %v1037_v27 }
 0x22c   : > { %1082 = vmatpush.msra.mxu0 %v1035_v29  ;;  %v2692_v29 = vld [vmem:[#allocation14] ss:$0 sm:$0xff] }
 0x294   : > { %v888_v26 = vpop.xlane.xlu1 %887 }
 0x295   : > { %2713 = vrcp.f32 %v888_v26  ;;  %v1036_v26 = vld [vmem:[#allocation10 + $0x28] sm:$0xff] }
 0x29b   : > { %v2714_v32 = vpop.eup %2713 }
 0x29c   : > { %v891_v34 = vpop.xlane.xlu1 %890  ;;  %v894_v35 = vmul.f32 %v2714_v32, %v2710_v8  ;;  %v1046_v8 = vld [vmem:[#allocation10 + $0x78] sm:$0xff]  ;;  %v1033_v32 = vld [vmem:[#allocation10 + $0x10] sm:$0xff] }
 0x29d   : > { %2715 = vrcp.f32 %v891_v34  ;;  %v1304_v34 = vld [vmem:[#allocation5 + $0x2f0] sm:$0xff]  ;;  %1083 = vmatpush.msra.mxu0 %v1033_v32 }
 0x29e   : > { %896 = vst.msk [vmem:[%s3519_s5] sm:$0xff] %vm873_vm0, %v894_v35  ;;  %2507 = vmatmul.msk.f32.vlgmr.msra.gmra.mxu3 %vm873_vm0, %v894_v35  ;;  %2717 = vrcp.f32 %v3212_v51  ;;  %v1031_v35 = vld [vmem:[#allocation10] sm:$0xff]  ;;  %v1282_v51 = vld [vmem:[#allocation5 + $0x240] sm:$0xff] }
 0x29f   : > { %1084 = vmatpush.msra.mxu0 %v1031_v35  ;;  %v1145_v35 = vld [vmem:[#allocation13 + $0xd0] sm:$0xff] }
 0x2a1   : > { %1315 = vmatpush.msrb.mxu0 %v1303_v37  ;;  %v2693_v37 = vld [vmem:[%s3857_s10] ss:$0 sm:$0xff] }
 0x2a3   : > { %v2716_v39 = vpop.eup %2715 }
 0x2a4   : > { %v895_v40 = vmul.f32 %v2716_v39, %v2712_v11  ;;  %v2718_v52 = vpop.eup %2717  ;;  %v1300_v39 = vld [vmem:[#allocation5 + $0x2d0] sm:$0xff] }
 0x2a5   : > { %v979_v53 = vmul.f32 128.0, %v2718_v52  ;;  %vm983_vm1 = vweird.f32 %v2718_v52  ;;  %1316 = vmatpush.msrb.mxu0 %v1300_v39 }
 0x2a6   : > { %897 = vst.msk [vmem:[%s3519_s5 + $0x8] sm:$0xff] %vm873_vm0, %v895_v40  ;;  %2508 = vmatmul.msk.f32.gmra.mxu3 %vm873_vm0, %v895_v40  ;;  %v1295_v40 = vld [vmem:[#allocation5 + $0x2a8] sm:$0xff] }
 0x2a7   : > { %v980_v60 = vsub.f32 1.0, %v979_v53  ;;  %1317 = vmatpush.msrb.mxu0 %v1297_v41  ;;  %v1279_v53 = vld [vmem:[#allocation5 + $0x228] sm:$0xff] }
 0x2a9   : > { %v981_v0 = vmul.f32 %v2718_v52, %v980_v60  ;;  %v1273_v60 = vld [vmem:[#allocation5 + $0x1f8] sm:$0xff] }
 0x2ab   : > { %v982_v5 = vadd.f32 %v2718_v52, %v981_v0  ;;  %v1262_v0 = vld [vmem:[#allocation5 + $0x1a0] sm:$0xff] }
 0x2ad   : > { %v3532_v9 = vsel %vm983_vm1, %v2718_v52, %v982_v5  ;;  %v1277_v52 = vld [vmem:[#allocation5 + $0x218] sm:$0xff] }
 0x2ae   : > { %v1261_v5 = vld [vmem:[#allocation5 + $0x198] sm:$0xff] }
 0x321   : > { %v921_v42 = vpop.f32.mrf.mxu3 }
 0x322   : > { %963 = vmatmul.f32.vlgmr.msrb.gmra.mxu3 %v921_v42  ;;  %v1292_v42 = vld [vmem:[#allocation5 + $0x290] sm:$0xff] }
 0x329   : > { %v924_v43 = vpop.f32.mrf.mxu3 }
 0x32a   : > { %966 = vmatmul.f32.gmra.mxu3 %v924_v43  ;;  %v1294_v43 = vld [vmem:[#allocation5 + $0x2a0] sm:$0xff] }
 0x32b   : > { %1318 = vmatpush.msrb.mxu0 %v1294_v43 }
 0x3a5   : > { %v964_v45 = vpop.f32.mrf.mxu3 }
 0x3a6   : > { %v965_v46 = vadd.f32 %v2691_v44, %v964_v45  ;;  %v1291_v45 = vld [vmem:[#allocation5 + $0x288] sm:$0xff] }
 0x3a7   : > { %1319 = vmatpush.msrb.mxu0 %v1291_v45  ;;  %v1143_v45 = vld [vmem:[#allocation13 + $0xc0] sm:$0xff] }
 0x3a8   : > { %v970_v47 = vadd.f32 %v965_v46, %v3497_v31  ;;  %v1056_v31 = vld [vmem:[#allocation10 + $0xc8] sm:$0xff]  ;;  %v1286_v46 = vld [vmem:[#allocation5 + $0x260] sm:$0xff] }
 0x3a9   : > { %1095 = vmatpush.msrb.mxu1 %v1056_v31  ;;  %v1268_v31 = vld [vmem:[#allocation5 + $0x1d0] sm:$0xff] }
 0x3aa   : > { %974 = vadd.xlane.f32.xlu2 %v970_v47 }
 0x3ab   : > { %1096 = vmatpush.msrb.mxu1 %v1054_v62  ;;  %v1265_v62 = vld [vmem:[#allocation5 + $0x1b8] sm:$0xff] }
 0x3ad   : > { %v967_v48 = vpop.f32.mrf.mxu3  ;;  %1097 = vmatpush.msrb.mxu1 %v1052_v1 }
 0x3ae   : > { %v968_v49 = vadd.f32 %v2691_v44, %v967_v48  ;;  %v1289_v44 = vld [vmem:[#allocation5 + $0x278] sm:$0xff]  ;;  %v1283_v48 = vld [vmem:[#allocation5 + $0x248] sm:$0xff] }
 0x3af   : > { %1098 = vmatpush.msrb.mxu1 %v1050_v3 }
 0x3b0   : > { %v971_v50 = vadd.f32 %v968_v49, %v3502_v33  ;;  %v1285_v49 = vld [vmem:[#allocation5 + $0x258] sm:$0xff] }
 0x3b1   : > { %1099 = vmatpush.msrb.mxu1 %v1048_v6 }
 0x3b2   : > { %976 = vadd.xlane.f32.xlu2 %v971_v50 }
 0x3b3   : > { %1100 = vmatpush.msrb.mxu1 %v1046_v8 }
 0x3b5   : > { %1101 = vmatpush.msrb.mxu1 %v1044_v18  ;;  %v1132_v18 = vld [vmem:[#allocation13 + $0x68] sm:$0xff] }
 0x3b7   : > { %1102 = vmatpush.msrb.mxu1 %v1042_v20  ;;  %v1148_v20 = vld [vmem:[#allocation13 + $0xe8] sm:$0xff] }
 0x3b9   : > { %1103 = vmatpush.msrb.mxu1 %v1040_v22 }
 0x3bb   : > { %1104 = vmatpush.msrb.mxu1 %v1038_v24 }
 0x3bd   : > { %1105 = vmatpush.msrb.mxu1 %v1036_v26 }
 0x3bf   : > { %1106 = vmatpush.msrb.mxu1 %v1034_v28  ;;  %v1146_v28 = vld [vmem:[#allocation13 + $0xd8] sm:$0xff] }
 0x3c1   : > { %1107 = vmatpush.msrb.mxu1 %v1032_v30  ;;  %v1129_v30 = vld [vmem:[#allocation13 + $0x50] sm:$0xff] }
 0x3c3   : > { %1335 = vmatpush.msra.mxu1 %v1304_v34 }
 0x3c5   : > { %1336 = vmatpush.msra.mxu1 %v1301_v36 }
 0x3c7   : > { %1337 = vmatpush.msra.mxu1 %v1298_v38  ;;  %v1128_v38 = vld [vmem:[#allocation13 + $0x48] sm:$0xff] }
 0x3c9   : > { %1338 = vmatpush.msra.mxu1 %v1295_v40  ;;  %v1144_v40 = vld [vmem:[#allocation13 + $0xc8] sm:$0xff] }
 0x3cb   : > { %1339 = vmatpush.msra.mxu1 %v1292_v42  ;;  %v1127_v42 = vld [vmem:[#allocation13 + $0x40] sm:$0xff] }
 0x3cd   : > { %1340 = vmatpush.msra.mxu1 %v1289_v44 }
 0x3cf   : > { %1341 = vmatpush.msra.mxu1 %v1286_v46 }
 0x3d1   : > { %1342 = vmatpush.msra.mxu1 %v1283_v48  ;;  %v1125_v48 = vld [vmem:[#allocation13 + $0x30] sm:$0xff] }
 0x41d   : > { %v975_v10 = vpop.xlane.xlu2 %974 }
 0x41e   : > { %v985_v11 = vmul.f32 %v3532_v9, %v975_v10  ;;  %v1258_v10 = vld [vmem:[#allocation5 + $0x180] sm:$0xff] }
 0x420   : > { %v3535_v12 = vsub.f32 %v970_v47, %v985_v11  ;;  %v1288_v47 = vld [vmem:[#allocation5 + $0x270] sm:$0xff]  ;;  %v1134_v11 = vld [vmem:[#allocation13 + $0x78] sm:$0xff] }
 0x421   : > { %1320 = vmatpush.msrb.mxu0 %v1288_v47  ;;  %1155 = vmatpush.msrb.mxu2 %v1134_v11  ;;  %v1142_v47 = vld [vmem:[#allocation13 + $0xb8] sm:$0xff] }
 0x422   : > { %v989_v13 = vmul.f32 %v3535_v12, %v3535_v12 }
 0x423   : > { %1321 = vmatpush.msrb.mxu0 %v1285_v49 }
 0x424   : > { %991 = vadd.xlane.f32.xlu0 %v989_v13 }
 0x425   : > { %v977_v14 = vpop.xlane.xlu2 %976  ;;  %1322 = vmatpush.msrb.mxu0 %v1282_v51  ;;  %v1141_v51 = vld [vmem:[#allocation13 + $0xb0] sm:$0xff] }
 0x426   : > { %v986_v15 = vmul.f32 %v3532_v9, %v977_v14  ;;  %v1150_v14 = vld [vmem:[#allocation13 + $0xf8] sm:$0xff] }
 0x427   : > { %1323 = vmatpush.msrb.mxu0 %v1279_v53  ;;  %1178 = vmatpush.msra.mxu3 %v1150_v14 }
 0x428   : > { %v3540_v16 = vsub.f32 %v971_v50, %v986_v15  ;;  %v1280_v50 = vld [vmem:[#allocation5 + $0x230] sm:$0xff]  ;;  %v1133_v15 = vld [vmem:[#allocation13 + $0x70] sm:$0xff] }
 0x429   : > { %1343 = vmatpush.msra.mxu1 %v1280_v50  ;;  %1324 = vmatpush.msrb.mxu0 %v1276_v56 }
 0x42a   : > { %v990_v17 = vmul.f32 %v3540_v16, %v3540_v16  ;;  %1156 = vmatpush.msrb.mxu2 %v1133_v15  ;;  %v3561_v15 = vld [vmem:[#allocation7 + $0x3] sm:$0x7] }
 0x42b   : > { %1344 = vmatpush.msra.mxu1 %v1277_v52  ;;  %1325 = vmatpush.msrb.mxu0 %v1273_v60  ;;  %v1124_v52 = vld [vmem:[#allocation13 + $0x28] sm:$0xff]  ;;  %v1137_v60 = vld [vmem:[#allocation13 + $0x90] sm:$0xff] }
 0x42c   : > { %993 = vadd.xlane.f32.xlu1 %v990_v17  ;;  %v1149_v17 = vld [vmem:[#allocation13 + $0xf0] sm:$0xff]  ;;  %1157 = vmatpush.msrb.mxu2 %v1132_v18 }
 0x42d   : > { %1345 = vmatpush.msra.mxu1 %v1274_v54  ;;  %1326 = vmatpush.msrb.mxu0 %v1270_v61  ;;  %v1140_v54 = vld [vmem:[#allocation13 + $0xa8] sm:$0xff] }
 0x42e   : > { %1179 = vmatpush.msra.mxu3 %v1149_v17  ;;  %1158 = vmatpush.msrb.mxu2 %v1131_v21  ;;  %v1136_v61 = vld [vmem:[#allocation13 + $0x88] sm:$0xff] }
 0x42f   : > { %1346 = vmatpush.msra.mxu1 %v1271_v58  ;;  %1327 = vmatpush.msrb.mxu0 %v1267_v63  ;;  %v1122_v58 = vld [vmem:[#allocation13 + $0x18] sm:$0xff]  ;;  %v1135_v63 = vld [vmem:[#allocation13 + $0x80] sm:$0xff] }
 0x430   : > { %1180 = vmatpush.msra.mxu3 %v1148_v20  ;;  %1159 = vmatpush.msrb.mxu2 %v1130_v25  ;;  %v1309_v20 = vperm.slane %v3561_v15, 0  ;;  %v1305_v25 = vld [vmem:[#allocation5 + $0x2f8] sm:$0xff] }
 0x431   : > { %1347 = vmatpush.msra.mxu1 %v1268_v31  ;;  %1328 = vmatpush.msrb.mxu0 %v1264_v2  ;;  %v1120_v31 = vld [vmem:[#allocation13 + $0x8] sm:$0xff] }
 0x432   : > { %1181 = vmatpush.msra.mxu3 %v1147_v23  ;;  %1160 = vmatpush.msrb.mxu2 %v1129_v30  ;;  %v1290_v30 = vld [vmem:[#allocation5 + $0x280] sm:$0xff] }
 0x433   : > { %1348 = vmatpush.msra.mxu1 %v1265_v62  ;;  %1329 = vmatpush.msrb.mxu0 %v1261_v5  ;;  %v1119_v62 = vld [vmem:[#allocation13] sm:$0xff] }
 0x434   : > { %1182 = vmatpush.msra.mxu3 %v1146_v28  ;;  %1161 = vmatpush.msrb.mxu2 %v1128_v38  ;;  %v1296_v28 = vld [vmem:[#allocation5 + $0x2b0] sm:$0xff] }
 0x435   : > { %1349 = vmatpush.msra.mxu1 %v1262_v0  ;;  %1330 = vmatpush.msrb.mxu0 %v1258_v10  ;;  %v1063_v0 = vld [vmem:[#allocation11] sm:$0x3] }
 0x436   : > { %1183 = vmatpush.msra.mxu3 %v1145_v35  ;;  %1162 = vmatpush.msrb.mxu2 %v1127_v42  ;;  %v1066_v2 = vperm.slane %v1063_v0, 1  ;;  %v3568_v35 = vld [vmem:[%s3858_s30] ss:$0 sm:$0xff] }
 0x437   : > { %1350 = vmatpush.msra.mxu1 %v1259_v4 }
 0x438   : > { %1184 = vmatpush.msra.mxu3 %v1144_v40  ;;  %v1275_v40 = vld [vmem:[#allocation5 + $0x208] sm:$0xff] }
 0x43a   : > { %1185 = vmatpush.msra.mxu3 %v1143_v45  ;;  %v1269_v45 = vld [vmem:[#allocation5 + $0x1d8] sm:$0xff] }
 0x43c   : > { %1186 = vmatpush.msra.mxu3 %v1142_v47 }
 0x43e   : > { %1187 = vmatpush.msra.mxu3 %v1141_v51 }
 0x440   : > { %1188 = vmatpush.msra.mxu3 %v1140_v54 }
 0x497   : > { %v992_v55 = vpop.xlane.xlu0 %991 }
 0x498   : > { %v995_v57 = vmul.f32 %v992_v55, %v3532_v9  ;;  %v1123_v55 = vld [vmem:[#allocation13 + $0x20] sm:$0xff] }
 0x49a   : > { %v997_v59 = vadd.f32 1e-05, %v995_v57  ;;  %v1139_v57 = vld [vmem:[#allocation13 + $0xa0] sm:$0xff] }
 0x49b   : > { %1189 = vmatpush.msra.mxu3 %v1139_v57 }
 0x49c   : > { %2719 = vrsqrt.f32 %v997_v59  ;;  %vm1005_vm3 = vweird.f32 %v997_v59 }
 0x49f   : > { %v994_v1 = vpop.xlane.xlu1 %993 }
 0x4a0   : > { %v996_v3 = vmul.f32 %v994_v1, %v3532_v9  ;;  %v1065_v1 = vperm.slane %v1063_v0, 0  ;;  %v1442_v0 = vld [vmem:[#allocation8 + $0xc8] sm:$0xff] }
 0x4a2   : > { %v2720_v6 = vpop.eup %2719  ;;  %v998_v7 = vadd.f32 1e-05, %v996_v3 }
 0x4a3   : > { %v1000_v8 = vmul.f32 %v2720_v6, %v997_v59  ;;  %vm1006_vm2 = vweird.f32 %v2720_v6  ;;  %v1121_v59 = vld [vmem:[#allocation13 + $0x10] sm:$0xff] }
 0x4a4   : > { %2721 = vrsqrt.f32 %v998_v7  ;;  %vm1007_vm4 = vmor %vm1005_vm3, %vm1006_vm2  ;;  %vm1015_vm6 = vweird.f32 %v998_v7 }
 0x4a5   : > { %v1001_v13 = vmul.f32 %v2720_v6, %v1000_v8 }
 0x4a7   : > { %v1002_v19 = vmul.f32 0.5, %v1001_v13 }
 0x4a9   : > { %v1003_v22 = vsub.f32 1.5, %v1002_v19  ;;  %v1310_v19 = vperm.slane %v3561_v15, 1 }
 0x4aa   : > { %v2722_v24 = vpop.eup %2721 }
 0x4ab   : > { %v1004_v26 = vmul.f32 %v2720_v6, %v1003_v22  ;;  %v1010_v27 = vmul.f32 %v2722_v24, %v998_v7  ;;  %vm1016_vm5 = vweird.f32 %v2722_v24 }
 0x4ac   : > { %vm1017_vm7 = vmor %vm1015_vm6, %vm1016_vm5 }
 0x4ad   : > { %v1008_v32 = vsel %vm1007_vm4, %v2720_v6, %v1004_v26  ;;  %v1011_v34 = vmul.f32 %v2722_v24, %v1010_v27  ;;  %v1302_v26 = vld [vmem:[#allocation5 + $0x2e0] sm:$0xff]  ;;  %v1299_v27 = vld [vmem:[#allocation5 + $0x2c8] sm:$0xff] }
 0x4ae   : > { %v1019_v36 = vmul.f32 %v1008_v32, %v3535_v12  ;;  %v1126_v12 = vld [vmem:[#allocation13 + $0x38] sm:$0xff] }
 0x4af   : > { %v1012_v39 = vmul.f32 0.5, %v1011_v34  ;;  %1163 = vmatpush.msrb.mxu2 %v1126_v12  ;;  %v1287_v32 = vld [vmem:[#allocation5 + $0x268] sm:$0xff]  ;;  %v1284_v34 = vld [vmem:[#allocation5 + $0x250] sm:$0xff]  ;;  %v1266_v12 = vld [vmem:[#allocation5 + $0x1c0] sm:$0xff] }
 0x4b0   : > { %v1024_v41 = vmul.f32 %v2692_v29, %v1019_v36  ;;  %v1281_v36 = vld [vmem:[#allocation5 + $0x238] sm:$0xff] }
 0x4b1   : > { %v1013_v43 = vsub.f32 1.5, %v1012_v39  ;;  %1164 = vmatpush.msrb.mxu2 %v1125_v48 }
 0x4b2   : > { %v3550_v44 = vadd.f32 %v2693_v37, %v1024_v41 }
 0x4b3   : > { %v1014_v46 = vmul.f32 %v2722_v24, %v1013_v43  ;;  %1165 = vmatpush.msrb.mxu2 %v1124_v52  ;;  %v1272_v43 = vld [vmem:[#allocation5 + $0x1f0] sm:$0xff] }
 0x4b4   : > { %1085 = vmatmul.f32.vlgmr.msra.gmra.mxu0 %v3550_v44  ;;  %1108 = vmatmul.f32.vlgmr.msrb.gmra.mxu1 %v3550_v44 }
 0x4b5   : > { %v1018_v49 = vsel %vm1017_vm7, %v2722_v24, %v1014_v46  ;;  %1166 = vmatpush.msrb.mxu2 %v1123_v55  ;;  %v1263_v46 = vld [vmem:[#allocation5 + $0x1a8] sm:$0xff] }
 0x4b6   : > { %v1020_v50 = vmul.f32 %v1018_v49, %v3540_v16  ;;  %v1138_v16 = vld [vmem:[#allocation13 + $0x98] sm:$0xff] }
 0x4b7   : > { %1167 = vmatpush.msrb.mxu2 %v1122_v58  ;;  %1190 = vmatpush.msra.mxu3 %v1138_v16  ;;  %v1311_v58 = vperm.slane %v3561_v15, 2 }
 0x4b8   : > { %v1025_v53 = vmul.f32 %v2692_v29, %v1020_v50  ;;  %v1293_v29 = vld [vmem:[#allocation5 + $0x298] sm:$0xff]  ;;  %v1260_v50 = vld [vmem:[#allocation5 + $0x190] sm:$0xff] }
 0x4b9   : > { %1168 = vmatpush.msrb.mxu2 %v1121_v59  ;;  %1191 = vmatpush.msra.mxu3 %v1137_v60  ;;  %v1448_v60 = vld [vmem:[#allocation8 + $0xf8] sm:$0xff] }
 0x4ba   : > { %v3555_v56 = vadd.f32 %v2693_v37, %v1025_v53  ;;  %v1278_v37 = vld [vmem:[#allocation5 + $0x220] sm:$0xff] }
 0x4bb   : > { %1169 = vmatpush.msrb.mxu2 %v1120_v31  ;;  %1192 = vmatpush.msra.mxu3 %v1136_v61  ;;  %v1447_v31 = vld [vmem:[#allocation8 + $0xf0] sm:$0xff]  ;;  %v1446_v61 = vld [vmem:[#allocation8 + $0xe8] sm:$0xff] }
 0x4bc   : > { %1088 = vmatmul.f32.gmra.mxu0 %v3555_v56  ;;  %1111 = vmatmul.f32.gmra.mxu1 %v3555_v56 }
 0x4bd   : > { %1170 = vmatpush.msrb.mxu2 %v1119_v62  ;;  %1193 = vmatpush.msra.mxu3 %v1135_v63  ;;  %v1444_v62 = vld [vmem:[#allocation8 + $0xd8] sm:$0xff]  ;;  %v1443_v63 = vld [vmem:[#allocation8 + $0xd0] sm:$0xff] }
 0x4bf   : > { %1355 = vmatpush.msra.mxu2 %v1305_v25  ;;  %1454 = vmatpush.msrb.mxu3 %v1448_v60  ;;  %v1539_v25 = vld [vmem:[#allocation10 + $0x1f8] sm:$0xff]  ;;  %v1513_v60 = vld [vmem:[#allocation10 + $0x128] sm:$0xff] }
 0x4c0   : > { %1567 = vmatpush.msra.mxu0 %v1539_v25  ;;  %v1718_v25 = vld [vmem:[#allocation5 + $0x380] sm:$0xff] }
 0x4c1   : > { %1356 = vmatpush.msra.mxu2 %v1302_v26  ;;  %1455 = vmatpush.msrb.mxu3 %v1447_v31  ;;  %v1537_v26 = vld [vmem:[#allocation10 + $0x1e8] sm:$0xff]  ;;  %v1508_v31 = vld [vmem:[#allocation10 + $0x100] sm:$0xff] }
 0x4c2   : > { %1568 = vmatpush.msra.mxu0 %v1537_v26  ;;  %v1711_v26 = vld [vmem:[#allocation5 + $0x348] sm:$0xff] }
 0x4c3   : > { %1357 = vmatpush.msra.mxu2 %v1299_v27  ;;  %1456 = vmatpush.msrb.mxu3 %v1446_v61  ;;  %v1534_v27 = vld [vmem:[#allocation10 + $0x1d0] sm:$0xff]  ;;  %v1511_v61 = vld [vmem:[#allocation10 + $0x118] sm:$0xff] }
 0x4c4   : > { %1351 = vmatmul.f32.vlgmr.msra.gmra.mxu1 %v3502_v33  ;;  %1331 = vmatmul.f32.vlgmr.msrb.gmra.mxu0 %v3502_v33 }
 0x4c5   : > { %1358 = vmatpush.msra.mxu2 %v1296_v28  ;;  %v1535_v28 = vld [vmem:[#allocation10 + $0x1d8] sm:$0xff] }
 0x4c6   : > { %1569 = vmatpush.msra.mxu0 %v1535_v28  ;;  %v1708_v28 = vld [vmem:[#allocation5 + $0x330] sm:$0xff] }
 0x4c7   : > { %1359 = vmatpush.msra.mxu2 %v1293_v29  ;;  %v1532_v29 = vld [vmem:[#allocation10 + $0x1c0] sm:$0xff] }
 0x4c9   : > { %1360 = vmatpush.msra.mxu2 %v1290_v30  ;;  %v1533_v30 = vld [vmem:[#allocation10 + $0x1c8] sm:$0xff] }
 0x4ca   : > { %1570 = vmatpush.msra.mxu0 %v1533_v30  ;;  %v1705_v30 = vld [vmem:[#allocation5 + $0x318] sm:$0xff] }
 0x4cb   : > { %1361 = vmatpush.msra.mxu2 %v1287_v32  ;;  %v1530_v32 = vld [vmem:[#allocation10 + $0x1b0] sm:$0xff] }
 0x4cd   : > { %1362 = vmatpush.msra.mxu2 %v1284_v34  ;;  %v1531_v34 = vld [vmem:[#allocation10 + $0x1b8] sm:$0xff] }
 0x4ce   : > { %1571 = vmatpush.msra.mxu0 %v1531_v34  ;;  %v1709_v34 = vld [vmem:[#allocation5 + $0x338] sm:$0xff] }
 0x4cf   : > { %1363 = vmatpush.msra.mxu2 %v1281_v36  ;;  %v1528_v36 = vld [vmem:[#allocation10 + $0x1a0] sm:$0xff] }
 0x4d1   : > { %1364 = vmatpush.msra.mxu2 %v1278_v37  ;;  %v1529_v37 = vld [vmem:[#allocation10 + $0x1a8] sm:$0xff] }
 0x4d2   : > { %1572 = vmatpush.msra.mxu0 %v1529_v37  ;;  %v1702_v37 = vld [vmem:[#allocation5 + $0x300] sm:$0xff] }
 0x4d3   : > { %1365 = vmatpush.msra.mxu2 %v1275_v40  ;;  %v1524_v40 = vld [vmem:[#allocation10 + $0x180] sm:$0xff] }
 0x4d5   : > { %1366 = vmatpush.msra.mxu2 %v1272_v43  ;;  %v1522_v43 = vld [vmem:[#allocation10 + $0x170] sm:$0xff] }
 0x4d7   : > { %1367 = vmatpush.msra.mxu2 %v1269_v45  ;;  %v1523_v45 = vld [vmem:[#allocation10 + $0x178] sm:$0xff] }
 0x4d9   : > { %1368 = vmatpush.msra.mxu2 %v1266_v12  ;;  %v1520_v12 = vld [vmem:[#allocation10 + $0x160] sm:$0xff] }
 0x4db   : > { %1369 = vmatpush.msra.mxu2 %v1263_v46  ;;  %v1521_v46 = vld [vmem:[#allocation10 + $0x168] sm:$0xff] }
 0x4dd   : > { %1370 = vmatpush.msra.mxu2 %v1260_v50  ;;  %v1517_v50 = vld [vmem:[#allocation10 + $0x148] sm:$0xff] }
 0x531   : > { %v1086_v3 = vpop.f32.mrf.mxu0  ;;  %v1109_v4 = vpop.f32.mrf.mxu1 }
 0x532   : > { %v1087_v5 = vadd.f32 %v1086_v3, %v1065_v1  ;;  %v1110_v6 = vadd.f32 %v1109_v4, %v1066_v2  ;;  %v1439_v3 = vld [vmem:[#allocation8 + $0xb0] sm:$0xff]  ;;  %v1438_v4 = vld [vmem:[#allocation8 + $0xa8] sm:$0xff] }
 0x534   : > { %v1115_v7 = vmax.f32 %v1087_v5, 0.0  ;;  %v1116_v8 = vmax.f32 %v1110_v6, 0.0  ;;  %v1437_v5 = vld [vmem:[#allocation8 + $0xa0] sm:$0xff] }
 0x536   : > { %1171 = vmatmul.f32.vlgmr.msrb.gmra.mxu2 %v1115_v7  ;;  %1194 = vmatmul.f32.vlgmr.msra.gmra.mxu3 %v1116_v8  ;;  %v1436_v7 = vld [vmem:[#allocation8 + $0x98] sm:$0xff]  ;;  %v1435_v8 = vld [vmem:[#allocation8 + $0x90] sm:$0xff] }
 0x539   : > { %v1089_v10 = vpop.f32.mrf.mxu0  ;;  %v1112_v11 = vpop.f32.mrf.mxu1 }
 0x53a   : > { %v1090_v13 = vadd.f32 %v1089_v10, %v1065_v1  ;;  %v1113_v14 = vadd.f32 %v1112_v11, %v1066_v2  ;;  %v1441_v1 = vld [vmem:[#allocation8 + $0xc0] sm:$0xff]  ;;  %v1440_v2 = vld [vmem:[#allocation8 + $0xb8] sm:$0xff]  ;;  %v1434_v10 = vld [vmem:[#allocation8 + $0x88] sm:$0xff] }
 0x53c   : > { %v1117_v17 = vmax.f32 %v1090_v13, 0.0  ;;  %v1118_v18 = vmax.f32 %v1113_v14, 0.0  ;;  %v1433_v14 = vld [vmem:[#allocation8 + $0x80] sm:$0xff] }
 0x53e   : > { %1174 = vmatmul.f32.gmra.mxu2 %v1117_v17  ;;  %1197 = vmatmul.f32.gmra.mxu3 %v1118_v18  ;;  %v2695_v18 = vld [vmem:[%s3856_s4 + $0x1] ss:$0 sm:$0xff] }
 0x541   : > { %v1352_v21 = vpop.f32.mrf.mxu1  ;;  %v1332_v22 = vpop.f32.mrf.mxu0 }
 0x542   : > { %v1353_v23 = vadd.f32 %v1352_v21, %v1310_v19  ;;  %v1333_v24 = vadd.f32 %v1332_v22, %v1309_v20  ;;  %v3591_v21 = vld [vmem:[%s3470_s8 + $0x8] sm:$0xff]  ;;  %s3861_s8 = sld [smem:[#allocation45_spill]] }
 0x544   : > { %1390 = vmatpush.xpose.msrb.mxu1 %v1353_v23  ;;  %v1538_v23 = vld [vmem:[#allocation10 + $0x1f0] sm:$0xff] }
 0x545   : > { %1547 = vmatpush.msrb.mxu2 %v1538_v23  ;;  %v1721_v23 = vld [vmem:[#allocation5 + $0x398] sm:$0xff] }
 0x546   : > { %1371 = vmatmul.f32.vlgmr.msra.gmra.mxu2 %v3502_v33  ;;  %v1445_v33 = vld [vmem:[#allocation8 + $0xe0] sm:$0xff] }
 0x547   : > { %1391 = vmatmul.f32.vlgmr.msrb.gmra.mxu1 %v1333_v24  ;;  %1457 = vmatpush.msrb.mxu3 %v1445_v33  ;;  %v1536_v24 = vld [vmem:[#allocation10 + $0x1e0] sm:$0xff] }
 0x548   : > { %1548 = vmatpush.msrb.mxu2 %v1536_v24  ;;  %v1747_v33 = vld [vmem:[#allocation5 + $0x468] sm:$0xff]  ;;  %v1714_v24 = vld [vmem:[#allocation5 + $0x360] sm:$0xff] }
 0x549   : > { %1458 = vmatpush.msrb.mxu3 %v1444_v62  ;;  %v1509_v62 = vld [vmem:[#allocation10 + $0x108] sm:$0xff] }
 0x54a   : > { %1549 = vmatpush.msrb.mxu2 %v1534_v27  ;;  %v1715_v27 = vld [vmem:[#allocation5 + $0x368] sm:$0xff] }
 0x54b   : > { %1459 = vmatpush.msrb.mxu3 %v1443_v63  ;;  %v1744_v63 = vld [vmem:[#allocation5 + $0x450] sm:$0xff] }
 0x54c   : > { %1550 = vmatpush.msrb.mxu2 %v1532_v29  ;;  %v1712_v29 = vld [vmem:[#allocation5 + $0x350] sm:$0xff] }
 0x54d   : > { %1460 = vmatpush.msrb.mxu3 %v1442_v0  ;;  %v1748_v0 = vld [vmem:[#allocation5 + $0x470] sm:$0xff] }
 0x54e   : > { %1551 = vmatpush.msrb.mxu2 %v1530_v32 }
 0x54f   : > { %1461 = vmatpush.msrb.mxu3 %v1441_v1  ;;  %v1741_v1 = vld [vmem:[#allocation5 + $0x438] sm:$0xff] }
 0x550   : > { %1552 = vmatpush.msrb.mxu2 %v1528_v36 }
 0x551   : > { %1462 = vmatpush.msrb.mxu3 %v1440_v2  ;;  %v1745_v2 = vld [vmem:[#allocation5 + $0x458] sm:$0xff] }
 0x553   : > { %1463 = vmatpush.msrb.mxu3 %v1439_v3  ;;  %v1738_v3 = vld [vmem:[#allocation5 + $0x420] sm:$0xff] }
 0x555   : > { %1464 = vmatpush.msrb.mxu3 %v1438_v4  ;;  %v1742_v4 = vld [vmem:[#allocation5 + $0x440] sm:$0xff] }
 0x557   : > { %1465 = vmatpush.msrb.mxu3 %v1437_v5  ;;  %v1735_v5 = vld [vmem:[#allocation5 + $0x408] sm:$0xff] }
 0x559   : > { %1466 = vmatpush.msrb.mxu3 %v1436_v7  ;;  %v1732_v7 = vld [vmem:[#allocation5 + $0x3f0] sm:$0xff] }
 0x55b   : > { %1467 = vmatpush.msrb.mxu3 %v1435_v8  ;;  %v1736_v8 = vld [vmem:[#allocation5 + $0x410] sm:$0xff] }
 0x55d   : > { %1468 = vmatpush.msrb.mxu3 %v1434_v10  ;;  %v1729_v10 = vld [vmem:[#allocation5 + $0x3d8] sm:$0xff] }
 0x55f   : > { %1469 = vmatpush.msrb.mxu3 %v1433_v14  ;;  %v1730_v14 = vld [vmem:[#allocation5 + $0x3e0] sm:$0xff] }
 0x5b9   : > { %v1172_v38 = vpop.f32.mrf.mxu2  ;;  %v1195_v41 = vpop.f32.mrf.mxu3 }
 0x5ba   : > { %v1173_v39 = vadd.f32 %v3568_v35, %v1172_v38  ;;  %v1526_v38 = vld [vmem:[#allocation10 + $0x190] sm:$0xff] }
 0x5bb   : > { %1553 = vmatpush.msrb.mxu2 %v1526_v38 }
 0x5bc   : > { %v3571_v42 = vadd.f32 %v1195_v41, %v1173_v39  ;;  %v1527_v39 = vld [vmem:[#allocation10 + $0x198] sm:$0xff]  ;;  %v1525_v41 = vld [vmem:[#allocation10 + $0x188] sm:$0xff] }
 0x5bd   : > { %1573 = vmatpush.msra.mxu0 %v1527_v39  ;;  %1554 = vmatpush.msrb.mxu2 %v1524_v40  ;;  %v1706_v39 = vld [vmem:[#allocation5 + $0x320] sm:$0xff]  ;;  %v1703_v40 = vld [vmem:[#allocation5 + $0x308] sm:$0xff] }
 0x5bf   : > { %1574 = vmatpush.msra.mxu0 %v1525_v41  ;;  %1555 = vmatpush.msrb.mxu2 %v1522_v43  ;;  %v1621_v41 = vld [vmem:[#allocation13 + $0x1f8] sm:$0xff]  ;;  %v1620_v43 = vld [vmem:[#allocation13 + $0x1f0] sm:$0xff] }
 0x5c0   : > { %1647 = vmatpush.msra.mxu3 %v1621_v41 }
 0x5c1   : > { %v3576_v57 = vpop.f32.mrf.mxu2  ;;  %v3585_v17 = vpop.f32.mrf.mxu3  ;;  %1575 = vmatpush.msra.mxu0 %v1523_v45  ;;  %1556 = vmatpush.msrb.mxu2 %v1520_v12  ;;  %v1605_v45 = vld [vmem:[#allocation13 + $0x178] sm:$0xff]  ;;  %v1619_v12 = vld [vmem:[#allocation13 + $0x1e8] sm:$0xff] }
 0x5c2   : > { %1648 = vmatpush.msra.mxu3 %v1620_v43 }
 0x5c3   : > { %1576 = vmatpush.msra.mxu0 %v1521_v46  ;;  %v1604_v46 = vld [vmem:[#allocation13 + $0x170] sm:$0xff] }
 0x5c4   : > { %v1392_v47 = vpop.f32.mrf.mxu1  ;;  %1649 = vmatpush.msra.mxu3 %v1619_v12 }
 0x5c5   : > { %v1395_v48 = vmul.f32 0.088388346, %v1392_v47  ;;  %v1518_v47 = vld [vmem:[#allocation10 + $0x150] sm:$0xff] }
 0x5c6   : > { %1557 = vmatpush.msrb.mxu2 %v1518_v47  ;;  %v1603_v47 = vld [vmem:[#allocation13 + $0x168] sm:$0xff] }
 0x5c7   : > { %v1397_v49 = vsel %vm1396_vm8, %v1395_v48, -inf }
 0x5c8   : > { %1398 = vmax.xlane.f32.xlu2 %v1397_v49  ;;  %v1516_v49 = vld [vmem:[#allocation10 + $0x140] sm:$0xff] }
 0x5c9   : > { %v1372_v16 = vpop.f32.mrf.mxu2  ;;  %1558 = vmatpush.msrb.mxu2 %v1516_v49  ;;  %v1602_v49 = vld [vmem:[#allocation13 + $0x160] sm:$0xff] }
 0x5ca   : > { %v1373_v59 = vadd.f32 %v1372_v16, %v1311_v58  ;;  %v1512_v58 = vld [vmem:[#allocation10 + $0x120] sm:$0xff]  ;;  %v1515_v16 = vld [vmem:[#allocation10 + $0x138] sm:$0xff] }
 0x5cc   : > { %1427 = vmatpush.msra.mxu1 %v1373_v59  ;;  %v1510_v59 = vld [vmem:[#allocation10 + $0x110] sm:$0xff] }
 0x5ce   : > { %1627 = vmatpush.msrb.mxu1 %v1605_v45 }
 0x5d0   : > { %1628 = vmatpush.msrb.mxu1 %v1604_v46 }
 0x5d2   : > { %1629 = vmatpush.msrb.mxu1 %v1603_v47  ;;  %v1749_v47 = vld [vmem:[#allocation5 + $0x478] sm:$0xff] }
 0x5d4   : > { %1630 = vmatpush.msrb.mxu1 %v1602_v49  ;;  %v1743_v49 = vld [vmem:[#allocation5 + $0x448] sm:$0xff] }
 0x63b   : > { %v1399_v51 = vpop.xlane.xlu2 %1398 }
 0x63c   : > { %v1400_v52 = vsub.f32 %v1395_v48, %v1399_v51  ;;  %v1519_v48 = vld [vmem:[#allocation10 + $0x158] sm:$0xff]  ;;  %v1514_v51 = vld [vmem:[#allocation10 + $0x130] sm:$0xff] }
 0x63d   : > { %1577 = vmatpush.msra.mxu0 %v1519_v48  ;;  %1559 = vmatpush.msrb.mxu2 %v1514_v51  ;;  %v1618_v48 = vld [vmem:[#allocation13 + $0x1e0] sm:$0xff]  ;;  %v1617_v51 = vld [vmem:[#allocation13 + $0x1d8] sm:$0xff] }
 0x63e   : > { %v1401_v53 = vmul.f32 1.442695, %v1400_v52  ;;  %1650 = vmatpush.msra.mxu3 %v1618_v48  ;;  %v1746_v48 = vld [vmem:[#allocation5 + $0x460] sm:$0xff] }
 0x63f   : > { %1578 = vmatpush.msra.mxu0 %v1517_v50  ;;  %1560 = vmatpush.msrb.mxu2 %v1512_v58 }
 0x640   : > { %2723 = vpow2.f32 %v1401_v53  ;;  %1651 = vmatpush.msra.mxu3 %v1617_v51  ;;  %v1737_v51 = vld [vmem:[#allocation5 + $0x418] sm:$0xff] }
 0x641   : > { %1579 = vmatpush.msra.mxu0 %v1515_v16  ;;  %1561 = vmatpush.msrb.mxu2 %v1510_v59  ;;  %v1600_v16 = vld [vmem:[#allocation13 + $0x150] sm:$0xff]  ;;  %v1615_v59 = vld [vmem:[#allocation13 + $0x1c8] sm:$0xff] }
 0x643   : > { %1580 = vmatpush.msra.mxu0 %v1513_v60  ;;  %1562 = vmatpush.msrb.mxu2 %v1508_v31  ;;  %v1599_v31 = vld [vmem:[#allocation13 + $0x148] sm:$0xff] }
 0x645   : > { %1581 = vmatpush.msra.mxu0 %v1511_v61  ;;  %1762 = vmatpush.msra.mxu2 %v1747_v33  ;;  %v1614_v61 = vld [vmem:[#allocation13 + $0x1c0] sm:$0xff] }
 0x646   : > { %v2724_v54 = vpop.eup %2723 }
 0x647   : > { %v1403_v55 = vsel %vm1396_vm8, %v2724_v54, 0.0  ;;  %1582 = vmatpush.msra.mxu0 %v1509_v62  ;;  %1763 = vmatpush.msra.mxu2 %v1744_v63  ;;  %v1598_v62 = vld [vmem:[#allocation13 + $0x140] sm:$0xff]  ;;  %v1613_v63 = vld [vmem:[#allocation13 + $0x1b8] sm:$0xff] }
 0x648   : > { %1404 = vadd.xlane.f32.xlu0 %v1403_v55 }
 0x649   : > { %1782 = vmatpush.msrb.mxu0 %v1748_v0  ;;  %1764 = vmatpush.msra.mxu2 %v1741_v1  ;;  %v1597_v1 = vld [vmem:[#allocation13 + $0x138] sm:$0xff] }
 0x64b   : > { %1783 = vmatpush.msrb.mxu0 %v1745_v2  ;;  %1765 = vmatpush.msra.mxu2 %v1738_v3  ;;  %v2696_v2 = vld [vmem:[#allocation14 + $0x1] ss:$0 sm:$0xff]  ;;  %v1612_v3 = vld [vmem:[#allocation13 + $0x1b0] sm:$0xff] }
 0x64d   : > { %1784 = vmatpush.msrb.mxu0 %v1742_v4  ;;  %1766 = vmatpush.msra.mxu2 %v1735_v5  ;;  %v1596_v5 = vld [vmem:[#allocation13 + $0x130] sm:$0xff] }
 0x64f   : > { %1767 = vmatpush.msra.mxu2 %v1732_v7  ;;  %v2697_v7 = vld [vmem:[%s3857_s10 + $0x1] ss:$0 sm:$0xff] }
 0x651   : > { %1768 = vmatpush.msra.mxu2 %v1729_v10 }
 0x6bb   : > { %v1405_v6 = vpop.xlane.xlu0 %1404 }
 0x6bc   : > { %2725 = vrcp.f32 %v1405_v6  ;;  %v1739_v6 = vld [vmem:[#allocation5 + $0x428] sm:$0xff] }
 0x6bd   : > { %1785 = vmatpush.msrb.mxu0 %v1739_v6 }
 0x6bf   : > { %1786 = vmatpush.msrb.mxu0 %v1736_v8  ;;  %v1611_v8 = vld [vmem:[#allocation13 + $0x1a8] sm:$0xff] }
 0x6c2   : > { %v2726_v11 = vpop.eup %2725 }
 0x6c3   : > { %v1407_v13 = vmul.f32 %v2726_v11, %v2724_v54  ;;  %v1733_v11 = vld [vmem:[#allocation5 + $0x3f8] sm:$0xff] }
 0x6c4   : > { %1787 = vmatpush.msrb.mxu0 %v1733_v11  ;;  %v1610_v11 = vld [vmem:[#allocation13 + $0x1a0] sm:$0xff] }
 0x6c5   : > { %2509 = vmatmul.msk.f32.vlgmr.msra.gmra.mxu1 %vm1396_vm8, %v1407_v13  ;;  %1408 = vst.msk [vmem:[%s3581_s14] sm:$0xff] %vm1396_vm8, %v1407_v13  ;;  %v1726_v13 = vld [vmem:[#allocation5 + $0x3c0] sm:$0xff]  ;;  %s3064_s14 = scalar_lea.hbm %s3860_s13, 16 }
 0x6c6   : > { %1769 = vmatpush.msra.mxu2 %v1726_v13  ;;  %1788 = vmatpush.msrb.mxu0 %v1730_v14  ;;  %v1609_v14 = vld [vmem:[#allocation13 + $0x198] sm:$0xff]  ;;  %p3066_p8 = scmp.lt.s32.totalorder %s3064_s14, %s3060_s16 }
 0x6c8   : > { %p3067_p9 = por %p3066_p8, %p3065_p7 }
 0x6ca   : > { %p3068_p10 = pnand %p3067_p9, %p3063_p12 }
 0x742   : > { %v1429_v15 = vpop.f32.mrf.mxu1 }
 0x743   : > { %1470 = vmatmul.f32.vlgmr.msrb.gmra.mxu3 %v1429_v15  ;;  %v1723_v15 = vld [vmem:[#allocation5 + $0x3a8] sm:$0xff] }
 0x744   : > { %1770 = vmatpush.msra.mxu2 %v1723_v15  ;;  %v1595_v15 = vld [vmem:[#allocation13 + $0x128] sm:$0xff] }
 0x7c6   : > { %v1471_v19 = vpop.f32.mrf.mxu3 }
 0x7c7   : > { %v1472_v20 = vadd.f32 %v2695_v18, %v1471_v19  ;;  %v1727_v18 = vld [vmem:[#allocation5 + $0x3c8] sm:$0xff]  ;;  %v1720_v19 = vld [vmem:[#allocation5 + $0x390] sm:$0xff] }
 0x7c8   : > { %1789 = vmatpush.msrb.mxu0 %v1727_v18  ;;  %1771 = vmatpush.msra.mxu2 %v1720_v19  ;;  %v1608_v18 = vld [vmem:[#allocation13 + $0x190] sm:$0xff]  ;;  %v1594_v19 = vld [vmem:[#allocation13 + $0x120] sm:$0xff] }
 0x7c9   : > { %v1474_v22 = vadd.f32 %v3591_v21, %v1472_v20  ;;  %v1724_v20 = vld [vmem:[#allocation5 + $0x3b0] sm:$0xff] }
 0x7ca   : > { %1790 = vmatpush.msrb.mxu0 %v1724_v20  ;;  %v1607_v20 = vld [vmem:[#allocation13 + $0x188] sm:$0xff] }
 0x7cb   : > { %1479 = vadd.xlane.f32.xlu1 %v1474_v22 }
 0x7cc   : > { %1791 = vmatpush.msrb.mxu0 %v1721_v23  ;;  %v1606_v23 = vld [vmem:[#allocation13 + $0x180] sm:$0xff] }
 0x7ce   : > { %1792 = vmatpush.msrb.mxu0 %v1718_v25  ;;  %v1591_v25 = vld [vmem:[#allocation13 + $0x108] sm:$0xff] }
 0x7d0   : > { %1793 = vmatpush.msrb.mxu0 %v1715_v27  ;;  %v1541_v27 = vld [vmem:[#allocation11 + $0x2] sm:$0x3] }
 0x7d2   : > { %1794 = vmatpush.msrb.mxu0 %v1712_v29 }
 0x7d4   : > { %1795 = vmatpush.msrb.mxu0 %v1709_v34 }
 0x7d6   : > { %1796 = vmatpush.msrb.mxu0 %v1706_v39 }
 0x7d8   : > { %1797 = vmatpush.msrb.mxu0 %v1703_v40 }
 0x83e   : > { %v1480_v52 = vpop.xlane.xlu1 %1479 }
 0x83f   : > { %v1481_v53 = vmul.f32 %v1480_v52, %v3532_v9 }
 0x841   : > { %v3595_v54 = vsub.f32 %v1474_v22, %v1481_v53  ;;  %v1717_v22 = vld [vmem:[#allocation5 + $0x378] sm:$0xff]  ;;  %v1601_v53 = vld [vmem:[#allocation13 + $0x158] sm:$0xff] }
 0x842   : > { %1772 = vmatpush.msra.mxu2 %v1717_v22  ;;  %1631 = vmatpush.msrb.mxu1 %v1601_v53  ;;  %v1593_v22 = vld [vmem:[#allocation13 + $0x118] sm:$0xff] }
 0x843   : > { %v1483_v55 = vmul.f32 %v3595_v54, %v3595_v54  ;;  %v1731_v53 = vld [vmem:[#allocation5 + $0x3e8] sm:$0xff] }
 0x844   : > { %1773 = vmatpush.msra.mxu2 %v1714_v24  ;;  %1632 = vmatpush.msrb.mxu1 %v1600_v16  ;;  %v1592_v24 = vld [vmem:[#allocation13 + $0x110] sm:$0xff] }
 0x845   : > { %1484 = vadd.xlane.f32.xlu2 %v1483_v55  ;;  %v1616_v55 = vld [vmem:[#allocation13 + $0x1d0] sm:$0xff] }
 0x846   : > { %1774 = vmatpush.msra.mxu2 %v1711_v26  ;;  %1652 = vmatpush.msra.mxu3 %v1616_v55  ;;  %v1590_v26 = vld [vmem:[#allocation13 + $0x100] sm:$0xff]  ;;  %v1722_v16 = vld [vmem:[#allocation5 + $0x3a0] sm:$0xff] }
 0x847   : > { %1633 = vmatpush.msrb.mxu1 %v1599_v31  ;;  %v1728_v55 = vld [vmem:[#allocation5 + $0x3d0] sm:$0xff] }
 0x848   : > { %1775 = vmatpush.msra.mxu2 %v1708_v28  ;;  %1653 = vmatpush.msra.mxu3 %v1615_v59  ;;  %v1544_v28 = vperm.slane %v1541_v27, 1  ;;  %v1719_v59 = vld [vmem:[#allocation5 + $0x388] sm:$0xff]  ;;  %v1716_v31 = vld [vmem:[#allocation5 + $0x370] sm:$0xff] }
 0x849   : > { %1634 = vmatpush.msrb.mxu1 %v1598_v62 }
 0x84a   : > { %1776 = vmatpush.msra.mxu2 %v1705_v30  ;;  %1654 = vmatpush.msra.mxu3 %v1614_v61 }
 0x84b   : > { %1635 = vmatpush.msrb.mxu1 %v1597_v1  ;;  %v1707_v1 = vld [vmem:[#allocation5 + $0x328] sm:$0xff] }
 0x84c   : > { %1777 = vmatpush.msra.mxu2 %v1702_v37  ;;  %1655 = vmatpush.msra.mxu3 %v1613_v63  ;;  %v1713_v63 = vld [vmem:[#allocation5 + $0x358] sm:$0xff] }
 0x84d   : > { %1636 = vmatpush.msrb.mxu1 %v1596_v5 }
 0x84e   : > { %1656 = vmatpush.msra.mxu3 %v1612_v3 }
 0x84f   : > { %1637 = vmatpush.msrb.mxu1 %v1595_v15  ;;  %v1900_v15 = vld [vmem:[#allocation8 + $0x178] sm:$0xff] }
 0x850   : > { %1657 = vmatpush.msra.mxu3 %v1611_v8 }
 0x851   : > { %1638 = vmatpush.msrb.mxu1 %v1594_v19  ;;  %v1897_v19 = vld [vmem:[#allocation8 + $0x160] sm:$0xff] }
 0x852   : > { %1658 = vmatpush.msra.mxu3 %v1610_v11 }
 0x853   : > { %1639 = vmatpush.msrb.mxu1 %v1593_v22  ;;  %v1895_v22 = vld [vmem:[#allocation8 + $0x150] sm:$0xff] }
 0x854   : > { %1659 = vmatpush.msra.mxu3 %v1609_v14 }
 0x855   : > { %1640 = vmatpush.msrb.mxu1 %v1592_v24  ;;  %v1893_v24 = vld [vmem:[#allocation8 + $0x140] sm:$0xff] }
 0x856   : > { %1660 = vmatpush.msra.mxu3 %v1608_v18  ;;  %v1899_v18 = vld [vmem:[#allocation8 + $0x170] sm:$0xff] }
 0x857   : > { %1641 = vmatpush.msrb.mxu1 %v1591_v25  ;;  %v1892_v25 = vld [vmem:[#allocation8 + $0x138] sm:$0xff] }
 0x858   : > { %1661 = vmatpush.msra.mxu3 %v1607_v20  ;;  %v1896_v20 = vld [vmem:[#allocation8 + $0x158] sm:$0xff] }
 0x859   : > { %1642 = vmatpush.msrb.mxu1 %v1590_v26  ;;  %v1891_v26 = vld [vmem:[#allocation8 + $0x130] sm:$0xff] }
 0x85a   : > { %1662 = vmatpush.msra.mxu3 %v1606_v23  ;;  %v1894_v23 = vld [vmem:[#allocation8 + $0x148] sm:$0xff] }
 0x85b   : > { %1802 = vmatpush.msra.mxu1 %v1749_v47  ;;  %v1201_v47 = vadd.f32 %v3571_v42, %v3550_v44 }
 0x85d   : > { %1803 = vmatpush.msra.mxu1 %v1746_v48  ;;  %v1996_v48 = vld [vmem:[#allocation10 + $0x2f0] sm:$0xff] }
 0x85f   : > { %1804 = vmatpush.msra.mxu1 %v1743_v49  ;;  %v1997_v49 = vld [vmem:[#allocation10 + $0x2f8] sm:$0xff] }
 0x8b8   : > { %v1485_v32 = vpop.xlane.xlu2 %1484 }
 0x8b9   : > { %v1486_v36 = vmul.f32 %v1485_v32, %v3532_v9  ;;  %v3613_v32 = vld [vmem:[#allocation7 + $0x6] sm:$0x7] }
 0x8ba   : > { %v1754_v37 = vperm.slane %v3613_v32, 1  ;;  %v1753_v45 = vperm.slane %v3613_v32, 0 }
 0x8bb   : > { %v1487_v38 = vadd.f32 1e-05, %v1486_v36  ;;  %v1543_v36 = vperm.slane %v1541_v27, 0  ;;  %v1890_v27 = vld [vmem:[#allocation8 + $0x128] sm:$0xff] }
 0x8bd   : > { %2727 = vrsqrt.f32 %v1487_v38  ;;  %vm1494_vm10 = vweird.f32 %v1487_v38 }
 0x8c3   : > { %v2728_v50 = vpop.eup %2727 }
 0x8c4   : > { %v1489_v52 = vmul.f32 %v2728_v50, %v1487_v38  ;;  %vm1495_vm9 = vweird.f32 %v2728_v50 }
 0x8c5   : > { %vm1496_vm11 = vmor %vm1494_vm10, %vm1495_vm9 }
 0x8c6   : > { %v1490_v58 = vmul.f32 %v2728_v50, %v1489_v52  ;;  %v1734_v52 = vld [vmem:[#allocation5 + $0x400] sm:$0xff] }
 0x8c8   : > { %v1491_v60 = vmul.f32 0.5, %v1490_v58  ;;  %v1725_v58 = vld [vmem:[#allocation5 + $0x3b8] sm:$0xff] }
 0x8ca   : > { %v1492_v33 = vsub.f32 1.5, %v1491_v60 }
 0x8cc   : > { %v1493_v0 = vmul.f32 %v2728_v50, %v1492_v33 }
 0x8ce   : > { %v1497_v4 = vsel %vm1496_vm11, %v2728_v50, %v1493_v0  ;;  %v1740_v50 = vld [vmem:[#allocation5 + $0x430] sm:$0xff]  ;;  %v1710_v0 = vld [vmem:[#allocation5 + $0x340] sm:$0xff] }
 0x8cf   : > { %v1498_v6 = vmul.f32 %v1497_v4, %v3595_v54  ;;  %v3609_v54 = vrot.slane %v3591_v21, 4  ;;  %1805 = vmatpush.msra.mxu1 %v1740_v50 }
 0x8d1   : > { %v1502_v10 = vmul.f32 %v2696_v2, %v1498_v6  ;;  %1806 = vmatpush.msra.mxu1 %v1737_v51  ;;  %v1704_v2 = vld [vmem:[#allocation5 + $0x310] sm:$0xff] }
 0x8d3   : > { %v3604_v13 = vadd.f32 %v2697_v7, %v1502_v10  ;;  %1807 = vmatpush.msra.mxu1 %v1734_v52  ;;  %v1755_v10 = vperm.slane %v3613_v32, 2  ;;  %v1887_v32 = vld [vmem:[#allocation8 + $0x110] sm:$0xff] }
 0x8d5   : > { %1563 = vmatmul.f32.vlgmr.msrb.gmra.mxu2 %v3604_v13  ;;  %1583 = vmatmul.f32.vlgmr.msra.gmra.mxu0 %v3604_v13 }
 0x8d6   : > { %1808 = vmatpush.msra.mxu1 %v1731_v53  ;;  %2008 = vmatpush.msra.mxu0 %v1996_v48 }
 0x8d8   : > { %1809 = vmatpush.msra.mxu1 %v1728_v55 }
 0x8da   : > { %1810 = vmatpush.msra.mxu1 %v1725_v58 }
 0x8dc   : > { %1811 = vmatpush.msra.mxu1 %v1722_v16 }
 0x8dd   : > { %1778 = vmatmul.f32.vlgmr.msra.gmra.mxu2 %v3609_v54  ;;  %1798 = vmatmul.f32.vlgmr.msrb.gmra.mxu0 %v3609_v54 }
 0x8de   : > { %1812 = vmatpush.msra.mxu1 %v1719_v59 }
 0x8e0   : > { %1813 = vmatpush.msra.mxu1 %v1716_v31 }
 0x8e2   : > { %1814 = vmatpush.msra.mxu1 %v1713_v63  ;;  %v1988_v63 = vld [vmem:[#allocation10 + $0x2b0] sm:$0xff] }
 0x8e4   : > { %1815 = vmatpush.msra.mxu1 %v1710_v0  ;;  %v1989_v0 = vld [vmem:[#allocation10 + $0x2b8] sm:$0xff] }
 0x8e6   : > { %1816 = vmatpush.msra.mxu1 %v1707_v1  ;;  %v1987_v1 = vld [vmem:[#allocation10 + $0x2a8] sm:$0xff] }
 0x8e8   : > { %1817 = vmatpush.msra.mxu1 %v1704_v2  ;;  %v1984_v2 = vld [vmem:[#allocation10 + $0x290] sm:$0xff] }
 0x952   : > { %v1584_v29 = vpop.f32.mrf.mxu0 }
 0x953   : > { %v1585_v30 = vadd.f32 %v1584_v29, %v1544_v28  ;;  %v1889_v28 = vld [vmem:[#allocation8 + $0x120] sm:$0xff] }
 0x955   : > { %v1588_v34 = vmax.f32 %v1585_v30, 0.0  ;;  %v1888_v30 = vld [vmem:[#allocation8 + $0x118] sm:$0xff] }
 0x957   : > { %1663 = vmatmul.f32.vlgmr.msra.gmra.mxu3 %v1588_v34  ;;  %v1886_v34 = vld [vmem:[#allocation8 + $0x108] sm:$0xff] }
 0x958   : > { %v1564_v38 = vpop.f32.mrf.mxu2 }
 0x959   : > { %v1565_v39 = vadd.f32 %v1564_v38, %v1543_v36  ;;  %v1885_v38 = vld [vmem:[#allocation8 + $0x100] sm:$0xff] }
 0x95a   : > { %v1799_v40 = vpop.f32.mrf.mxu0 }
 0x95b   : > { %v1587_v41 = vmax.f32 %v1565_v39, 0.0  ;;  %v1800_v43 = vadd.f32 %v1799_v40, %v1754_v37  ;;  %v2699_v40 = vld [vmem:[%s3856_s4 + $0x2] ss:$0 sm:$0xff]  ;;  %s2197_s4 = scalar_lea.hbm %s3861_s8, %s2529_s25 }
 0x95d   : > { %1643 = vmatmul.f32.vlgmr.msrb.gmra.mxu1 %v1587_v41  ;;  %1837 = vmatpush.xpose.msrb.mxu3 %v1800_v43 }
 0x95e   : > { %2028 = vmatpush.msrb.mxu1 %v1997_v49 }
 0x960   : > { %v1779_v12 = vpop.f32.mrf.mxu2 }
 0x961   : > { %v1780_v46 = vadd.f32 %v1779_v12, %v1753_v45  ;;  %1906 = vmatpush.msra.mxu3 %v1900_v15  ;;  %v1977_v15 = vld [vmem:[#allocation10 + $0x258] sm:$0xff] }
 0x963   : > { %1838 = vmatmul.f32.vlgmr.msrb.gmra.mxu3 %v1780_v46 }
 0x964   : > { %1907 = vmatpush.msra.mxu3 %v1899_v18  ;;  %v1974_v18 = vld [vmem:[#allocation10 + $0x240] sm:$0xff] }
 0x965   : > { %1818 = vmatmul.f32.vlgmr.msra.gmra.mxu1 %v3609_v54  ;;  %v1898_v54 = vld [vmem:[#allocation8 + $0x168] sm:$0xff] }
 0x966   : > { %1908 = vmatpush.msra.mxu3 %v1898_v54  ;;  %v1975_v54 = vld [vmem:[#allocation10 + $0x248] sm:$0xff] }
 0x968   : > { %1909 = vmatpush.msra.mxu3 %v1897_v19  ;;  %v1972_v19 = vld [vmem:[#allocation10 + $0x230] sm:$0xff] }
 0x96a   : > { %1910 = vmatpush.msra.mxu3 %v1896_v20  ;;  %v1973_v20 = vld [vmem:[#allocation10 + $0x238] sm:$0xff] }
 0x96c   : > { %1911 = vmatpush.msra.mxu3 %v1895_v22  ;;  %v1970_v22 = vld [vmem:[#allocation10 + $0x220] sm:$0xff] }
 0x96e   : > { %1912 = vmatpush.msra.mxu3 %v1894_v23  ;;  %v1971_v23 = vld [vmem:[#allocation10 + $0x228] sm:$0xff] }
 0x970   : > { %1913 = vmatpush.msra.mxu3 %v1893_v24  ;;  %v1968_v24 = vld [vmem:[#allocation10 + $0x210] sm:$0xff] }
 0x972   : > { %1914 = vmatpush.msra.mxu3 %v1892_v25  ;;  %v1969_v25 = vld [vmem:[#allocation10 + $0x218] sm:$0xff] }
 0x974   : > { %1915 = vmatpush.msra.mxu3 %v1891_v26  ;;  %v1966_v26 = vld [vmem:[#allocation10 + $0x200] sm:$0xff] }
 0x976   : > { %1916 = vmatpush.msra.mxu3 %v1890_v27  ;;  %v1967_v27 = vld [vmem:[#allocation10 + $0x208] sm:$0xff] }
 0x978   : > { %1917 = vmatpush.msra.mxu3 %v1889_v28 }
 0x97a   : > { %1918 = vmatpush.msra.mxu3 %v1888_v30 }
 0x97c   : > { %1919 = vmatpush.msra.mxu3 %v1887_v32  ;;  %v2066_v32 = vld [vmem:[#allocation13 + $0x278] sm:$0xff] }
 0x97e   : > { %1920 = vmatpush.msra.mxu3 %v1886_v34  ;;  %v2082_v34 = vld [vmem:[#allocation13 + $0x2f8] sm:$0xff] }
 0x980   : > { %1921 = vmatpush.msra.mxu3 %v1885_v38 }
 0x982   : > { %2108 = vmatpush.msrb.mxu3 %v2082_v34  ;;  %v2068_v34 = vld [vmem:[#allocation13 + $0x288] sm:$0xff] }
 0x9da   : > { %v3617_v60 = vpop.f32.mrf.mxu3  ;;  %v3622_v8 = vpop.f32.mrf.mxu1 }
 0x9e2   : > { %v1819_v11 = vpop.f32.mrf.mxu1 }
 0x9e3   : > { %v1820_v14 = vadd.f32 %v1819_v11, %v1755_v10  ;;  %v1978_v10 = vld [vmem:[#allocation10 + $0x260] sm:$0xff]  ;;  %v1979_v11 = vld [vmem:[#allocation10 + $0x268] sm:$0xff] }
 0x9e5   : > { %2513 = vmatpush.msk.msrb.mxu2 %vm1860_vm13, %v1820_v14  ;;  %v1976_v14 = vld [vmem:[#allocation10 + $0x250] sm:$0xff] }
 0x9e6   : > { %v1839_v61 = vpop.f32.mrf.mxu3 }
 0x9e7   : > { %v1842_v33 = vmul.f32 0.088388346, %v1839_v61  ;;  %v1992_v61 = vld [vmem:[#allocation10 + $0x2d0] sm:$0xff]  ;;  %2088 = vmatpush.msra.mxu2 %v2066_v32 }
 0x9e8   : > { %v2052_v32 = vld [vmem:[#allocation13 + $0x208] sm:$0xff] }
 0x9e9   : > { %v1844_v62 = vsel %vm1843_vm12, %v1842_v33, -inf }
 0x9ea   : > { %1845 = vmax.xlane.f32.xlu0 %v1844_v62  ;;  %v1991_v62 = vld [vmem:[#allocation10 + $0x2c8] sm:$0xff] }
 0xa5d   : > { %v1846_v3 = vpop.xlane.xlu0 %1845 }
 0xa5e   : > { %v1847_v4 = vsub.f32 %v1842_v33, %v1846_v3  ;;  %v1993_v33 = vld [vmem:[#allocation10 + $0x2d8] sm:$0xff] }
 0xa5f   : > { %v1985_v3 = vld [vmem:[#allocation10 + $0x298] sm:$0xff] }
 0xa60   : > { %v1848_v5 = vmul.f32 1.442695, %v1847_v4  ;;  %v1982_v4 = vld [vmem:[#allocation10 + $0x280] sm:$0xff] }
 0xa62   : > { %2729 = vpow2.f32 %v1848_v5  ;;  %v1983_v5 = vld [vmem:[#allocation10 + $0x288] sm:$0xff] }
 0xa68   : > { %v2730_v6 = vpop.eup %2729 }
 0xa69   : > { %v1850_v7 = vsel %vm1843_vm12, %v2730_v6, 0.0 }
 0xa6a   : > { %1851 = vadd.xlane.f32.xlu1 %v1850_v7  ;;  %v1981_v7 = vld [vmem:[#allocation10 + $0x278] sm:$0xff] }
 0xadd   : > { %v1852_v29 = vpop.xlane.xlu1 %1851 }
 0xade   : > { %2731 = vrcp.f32 %v1852_v29 }
 0xae4   : > { %v2732_v36 = vpop.eup %2731 }
 0xae5   : > { %v1854_v37 = vmul.f32 %v2732_v36, %v2730_v6  ;;  %v1980_v6 = vld [vmem:[#allocation10 + $0x270] sm:$0xff] }
 0xae7   : > { %2514 = vmatmul.msk.f32.vlgmr.msrb.gmra.mxu2 %vm1856_vm14, %v1854_v37  ;;  %1855 = vst.msk [vmem:[%s3626_s11] sm:$0xf] %vm1843_vm12, %v1854_v37 }
 0xb6a   : > { %v1881_v39 = vpop.f32.mrf.mxu2 }
 0xb6b   : > { %1922 = vmatmul.f32.vlgmr.msra.gmra.mxu3 %v1881_v39 }
 0xbee   : > { %v1923_v41 = vpop.f32.mrf.mxu3 }
 0xbef   : > { %v1924_v43 = vadd.f32 %v2699_v40, %v1923_v41 }
 0xbf1   : > { %v1927_v45 = vrot.slane %v1924_v43, 4 }
 0xbf3   : > { %v1929_v12 = vadd.f32 %v3591_v21, %v1927_v45  ;;  %v1176_v21 = vadd.f32 %v3568_v35, %v3576_v57  ;;  %v1994_v35 = vld [vmem:[#allocation10 + $0x2e0] sm:$0xff]  ;;  %v1995_v57 = vld [vmem:[#allocation10 + $0x2e8] sm:$0xff] }
 0xbf4   : > { %2009 = vmatpush.msra.mxu0 %v1994_v35  ;;  %2029 = vmatpush.msrb.mxu1 %v1995_v57 }
 0xbf5   : > { %v1935_v46 = vsel %vm1934_vm15, %v1929_v12, 0.0  ;;  %v1199_v58 = vadd.f32 %v3585_v17, %v1176_v21  ;;  %v1990_v17 = vld [vmem:[#allocation10 + $0x2c0] sm:$0xff]  ;;  %v2702_v21 = vld [vmem:[#allocation14 + $0x2] ss:$0 sm:$0xff] }
 0xbf6   : > { %1936 = vadd.xlane.f32.xlu2 %v1935_v46  ;;  %2010 = vmatpush.msra.mxu0 %v1992_v61  ;;  %v3671_v61 = vld [vmem:[#allocation16] ss:$0 sm:$0xff] }
 0xbf7   : > { %v3652_v31 = vadd.f32 %v1199_v58, %v3555_v56  ;;  %2030 = vmatpush.msrb.mxu1 %v1993_v33  ;;  %v1986_v56 = vld [vmem:[#allocation10 + $0x2a0] sm:$0xff]  ;;  %v2703_v58 = vld [vmem:[%s3857_s10 + $0x2] ss:$0 sm:$0xff]  ;;  %s3722_s10 = scalar_lea.sflag [#allocation21], %s2177_s27 }
 0xbf8   : > { %2011 = vmatpush.msra.mxu0 %v1990_v17 }
 0xbf9   : > { %2031 = vmatpush.msrb.mxu1 %v1991_v62 }
 0xbfa   : > { %2012 = vmatpush.msra.mxu0 %v1988_v63 }
 0xbfb   : > { %2032 = vmatpush.msrb.mxu1 %v1989_v0 }
 0xbfc   : > { %2013 = vmatpush.msra.mxu0 %v1986_v56  ;;  %v2065_v56 = vld [vmem:[#allocation13 + $0x270] sm:$0xff] }
 0xbfd   : > { %2033 = vmatpush.msrb.mxu1 %v1987_v1  ;;  %v2081_v1 = vld [vmem:[#allocation13 + $0x2f0] sm:$0xff]  ;;  %2089 = vmatpush.msra.mxu2 %v2065_v56 }
 0xbfe   : > { %1205 = vadd.xlane.f32.xlu2 %v1201_v47  ;;  %2014 = vmatpush.msra.mxu0 %v1984_v2  ;;  %v2064_v2 = vld [vmem:[#allocation13 + $0x268] sm:$0xff] }
 0xbff   : > { %2034 = vmatpush.msrb.mxu1 %v1985_v3  ;;  %2109 = vmatpush.msrb.mxu3 %v2081_v1  ;;  %v2080_v3 = vld [vmem:[#allocation13 + $0x2e8] sm:$0xff] }
 0xc00   : > { %2015 = vmatpush.msra.mxu0 %v1982_v4  ;;  %2090 = vmatpush.msra.mxu2 %v2064_v2  ;;  %v2079_v4 = vld [vmem:[#allocation13 + $0x2e0] sm:$0xff] }
 0xc01   : > { %2035 = vmatpush.msrb.mxu1 %v1983_v5  ;;  %2110 = vmatpush.msrb.mxu3 %v2080_v3  ;;  %v2062_v5 = vld [vmem:[#allocation13 + $0x258] sm:$0xff] }
 0xc02   : > { %2016 = vmatpush.msra.mxu0 %v1980_v6  ;;  %v2078_v6 = vld [vmem:[#allocation13 + $0x2d8] sm:$0xff] }
 0xc03   : > { %2036 = vmatpush.msrb.mxu1 %v1981_v7  ;;  %2111 = vmatpush.msrb.mxu3 %v2079_v4  ;;  %v2061_v7 = vld [vmem:[#allocation13 + $0x250] sm:$0xff] }
 0xc04   : > { %2017 = vmatpush.msra.mxu0 %v1978_v10  ;;  %v2077_v10 = vld [vmem:[#allocation13 + $0x2d0] sm:$0xff] }
 0xc05   : > { %2037 = vmatpush.msrb.mxu1 %v1979_v11  ;;  %2112 = vmatpush.msrb.mxu3 %v2078_v6  ;;  %v2060_v11 = vld [vmem:[#allocation13 + $0x248] sm:$0xff] }
 0xc06   : > { %2018 = vmatpush.msra.mxu0 %v1976_v14  ;;  %v2076_v14 = vld [vmem:[#allocation13 + $0x2c8] sm:$0xff] }
 0xc07   : > { %2038 = vmatpush.msrb.mxu1 %v1977_v15  ;;  %2113 = vmatpush.msrb.mxu3 %v2077_v10  ;;  %v2059_v15 = vld [vmem:[#allocation13 + $0x240] sm:$0xff] }
 0xc08   : > { %2019 = vmatpush.msra.mxu0 %v1974_v18  ;;  %v2075_v18 = vld [vmem:[#allocation13 + $0x2c0] sm:$0xff] }
 0xc09   : > { %2039 = vmatpush.msrb.mxu1 %v1975_v54  ;;  %2114 = vmatpush.msrb.mxu3 %v2076_v14  ;;  %v2058_v54 = vld [vmem:[#allocation13 + $0x238] sm:$0xff] }
 0xc0a   : > { %2020 = vmatpush.msra.mxu0 %v1972_v19  ;;  %v2074_v19 = vld [vmem:[#allocation13 + $0x2b8] sm:$0xff] }
 0xc0b   : > { %2040 = vmatpush.msrb.mxu1 %v1973_v20  ;;  %2115 = vmatpush.msrb.mxu3 %v2075_v18  ;;  %v2057_v20 = vld [vmem:[#allocation13 + $0x230] sm:$0xff] }
 0xc0c   : > { %2021 = vmatpush.msra.mxu0 %v1970_v22  ;;  %v2073_v22 = vld [vmem:[#allocation13 + $0x2b0] sm:$0xff] }
 0xc0d   : > { %2041 = vmatpush.msrb.mxu1 %v1971_v23  ;;  %2116 = vmatpush.msrb.mxu3 %v2074_v19  ;;  %v2056_v23 = vld [vmem:[#allocation13 + $0x228] sm:$0xff] }
 0xc0e   : > { %2022 = vmatpush.msra.mxu0 %v1968_v24  ;;  %v2072_v24 = vld [vmem:[#allocation13 + $0x2a8] sm:$0xff] }
 0xc0f   : > { %2042 = vmatpush.msrb.mxu1 %v1969_v25  ;;  %2117 = vmatpush.msrb.mxu3 %v2073_v22  ;;  %v2055_v25 = vld [vmem:[#allocation13 + $0x220] sm:$0xff] }
 0xc10   : > { %2023 = vmatpush.msra.mxu0 %v1966_v26  ;;  %v2071_v26 = vld [vmem:[#allocation13 + $0x2a0] sm:$0xff] }
 0xc11   : > { %2043 = vmatpush.msrb.mxu1 %v1967_v27  ;;  %2118 = vmatpush.msrb.mxu3 %v2072_v24  ;;  %v2054_v27 = vld [vmem:[#allocation13 + $0x218] sm:$0xff] }
 0xc13   : > { %2119 = vmatpush.msrb.mxu3 %v2071_v26 }
 0xc69   : > { %v1937_v50 = vpop.xlane.xlu2 %1936 }
 0xc6a   : > { %v1938_v51 = vmul.f32 %v1937_v50, %v3532_v9 }
 0xc6c   : > { %v3638_v52 = vsub.f32 %v1929_v12, %v1938_v51 }
 0xc6e   : > { %v1940_v53 = vmul.f32 %v3638_v52, %v3638_v52 }
 0xc70   : > { %v1941_v55 = vsel %vm1934_vm15, %v1940_v53, 0.0 }
 0xc71   : > { %1942 = vadd.xlane.f32.xlu0 %v1941_v55  ;;  %v1206_v44 = vpop.xlane.xlu2 %1205 }
 0xc72   : > { %v1209_v42 = vmul.f32 %v1206_v44, %v3532_v9 }
 0xc74   : > { %v3647_v16 = vsub.f32 %v1201_v47, %v1209_v42 }
 0xc76   : > { %v1213_v59 = vmul.f32 %v3647_v16, %v3647_v16 }
 0xc78   : > { %1215 = vadd.xlane.f32.xlu2 %v1213_v59 }
 0xc79   : > { %1207 = vadd.xlane.f32.xlu0 %v3652_v31 }
 0xce4   : > { %v1943_v28 = vpop.xlane.xlu0 %1942 }
 0xce5   : > { %v1944_v29 = vmul.f32 %v1943_v28, %v3532_v9  ;;  %v2070_v28 = vld [vmem:[#allocation13 + $0x298] sm:$0xff] }
 0xce6   : > { %2120 = vmatpush.msrb.mxu3 %v2070_v28 }
 0xce7   : > { %v1945_v30 = vadd.f32 1e-05, %v1944_v29  ;;  %v2053_v29 = vld [vmem:[#allocation13 + $0x210] sm:$0xff] }
 0xce9   : > { %2733 = vrsqrt.f32 %v1945_v30  ;;  %vm1952_vm1 = vweird.f32 %v1945_v30 }
 0xceb   : > { %v1216_v36 = vpop.xlane.xlu2 %1215 }
 0xcec   : > { %v1219_v37 = vmul.f32 %v1216_v36, %v3532_v9  ;;  %v1208_v38 = vpop.xlane.xlu0 %1207  ;;  %v2051_v36 = vld [vmem:[#allocation13 + $0x200] sm:$0xff] }
 0xced   : > { %v1210_v39 = vmul.f32 %v1208_v38, %v3532_v9 }
 0xcee   : > { %v1221_v40 = vadd.f32 1e-05, %v1219_v37  ;;  %v2067_v37 = vld [vmem:[#allocation13 + $0x280] sm:$0xff] }
 0xcef   : > { %v2734_v41 = vpop.eup %2733  ;;  %v3659_v43 = vsub.f32 %v3652_v31, %v1210_v39 }
 0xcf0   : > { %v1947_v45 = vmul.f32 %v2734_v41, %v1945_v30  ;;  %2735 = vrsqrt.f32 %v1221_v40  ;;  %vm1953_vm0 = vweird.f32 %v2734_v41  ;;  %vm1229_vm4 = vweird.f32 %v1221_v40  ;;  %v2069_v30 = vld [vmem:[#allocation13 + $0x290] sm:$0xff] }
 0xcf1   : > { %v1214_v12 = vmul.f32 %v3659_v43, %v3659_v43  ;;  %vm1954_vm2 = vmor %vm1952_vm1, %vm1953_vm0  ;;  %2121 = vmatpush.msrb.mxu3 %v2069_v30 }
 0xcf2   : > { %v1948_v46 = vmul.f32 %v2734_v41, %v1947_v45 }
 0xcf3   : > { %1217 = vadd.xlane.f32.xlu0 %v1214_v12  ;;  %2122 = vmatpush.msrb.mxu3 %v2068_v34 }
 0xcf4   : > { %v1949_v47 = vmul.f32 0.5, %v1948_v46 }
 0xcf5   : > { %2123 = vmatpush.msrb.mxu3 %v2067_v37 }
 0xcf6   : > { %v2736_v48 = vpop.eup %2735  ;;  %v1950_v49 = vsub.f32 1.5, %v1949_v47 }
 0xcf7   : > { %v1224_v50 = vmul.f32 %v2736_v48, %v1221_v40  ;;  %vm1230_vm3 = vweird.f32 %v2736_v48 }
 0xcf8   : > { %v1951_v51 = vmul.f32 %v2734_v41, %v1950_v49  ;;  %vm1231_vm5 = vmor %vm1229_vm4, %vm1230_vm3  ;;  %v1999_v49 = vld [vmem:[#allocation11 + $0x4] sm:$0x3] }
 0xcf9   : > { %v1225_v53 = vmul.f32 %v2736_v48, %v1224_v50 }
 0xcfa   : > { %v1955_v55 = vsel %vm1954_vm2, %v2734_v41, %v1951_v51 }
 0xcfb   : > { %v1956_v44 = vmul.f32 %v1955_v55, %v3638_v52  ;;  %v1226_v42 = vmul.f32 0.5, %v1225_v53  ;;  %v3674_v52 = vld [vmem:[#allocation17] ss:$0 sm:$0xff]  ;;  %v2001_v53 = vperm.slane %v1999_v49, 0 }
 0xcfd   : > { %v1227_v59 = vsub.f32 1.5, %v1226_v42  ;;  %v1960_v31 = vmul.f32 %v2702_v21, %v1956_v44  ;;  %v2002_v21 = vperm.slane %v1999_v49, 1 }
 0xcff   : > { %v1228_v35 = vmul.f32 %v2736_v48, %v1227_v59  ;;  %v3669_v57 = vadd.f32 %v2703_v58, %v1960_v31 }
 0xd01   : > { %v1232_v33 = vsel %vm1231_vm5, %v2736_v48, %v1228_v35  ;;  %v2006_v17 = vrot.slane %v3669_v57, 4 }
 0xd02   : > { %v1243_v62 = vmul.f32 %v1232_v33, %v3647_v16  ;;  %v2063_v16 = vld [vmem:[#allocation13 + $0x260] sm:$0xff] }
 0xd03   : > { %2024 = vmatmul.f32.vlgmr.msra.gmra.mxu0 %v2006_v17  ;;  %2044 = vmatmul.f32.vlgmr.msrb.gmra.mxu1 %v2006_v17  ;;  %v2704_v17 = vld [vmem:[%s3858_s30 + $0x2] ss:$0 sm:$0xff] }
 0xd04   : > { %v1248_v63 = vmul.f32 %v3671_v61, %v1243_v62  ;;  %2091 = vmatpush.msra.mxu2 %v2063_v16 }
 0xd06   : > { %v1253_v0 = vadd.f32 %v3674_v52, %v1248_v63  ;;  %2092 = vmatpush.msra.mxu2 %v2062_v5 }
 0xd08   : > { %1255 = vst [vmem:[%s3681_s18] sm:$0xff] %v1253_v0  ;;  %2093 = vmatpush.msra.mxu2 %v2061_v7 }
 0xd0a   : > { %2094 = vmatpush.msra.mxu2 %v2060_v11 }
 0xd0c   : > { %2095 = vmatpush.msra.mxu2 %v2059_v15 }
 0xd0e   : > { %2096 = vmatpush.msra.mxu2 %v2058_v54 }
 0xd10   : > { %2097 = vmatpush.msra.mxu2 %v2057_v20 }
 0xd12   : > { %2098 = vmatpush.msra.mxu2 %v2056_v23 }
 0xd14   : > { %2099 = vmatpush.msra.mxu2 %v2055_v25 }
 0xd16   : > { %2100 = vmatpush.msra.mxu2 %v2054_v27 }
 0xd18   : > { %2101 = vmatpush.msra.mxu2 %v2053_v29 }
 0xd1a   : > { %2102 = vmatpush.msra.mxu2 %v2052_v32 }
 0xd1c   : > { %2103 = vmatpush.msra.mxu2 %v2051_v36 }
 0xd66   : > { %v1218_v38 = vpop.xlane.xlu0 %1217 }
 0xd67   : > { %v1220_v39 = vmul.f32 %v1218_v38, %v3532_v9 }
 0xd69   : > { %v1222_v40 = vadd.f32 1e-05, %v1220_v39 }
 0xd6b   : > { %2737 = vrsqrt.f32 %v1222_v40  ;;  %vm1239_vm7 = vweird.f32 %v1222_v40 }
 0xd71   : > { %v2738_v41 = vpop.eup %2737 }
 0xd72   : > { %v1234_v45 = vmul.f32 %v2738_v41, %v1222_v40  ;;  %vm1240_vm6 = vweird.f32 %v2738_v41 }
 0xd73   : > { %vm1241_vm8 = vmor %vm1239_vm7, %vm1240_vm6 }
 0xd74   : > { %v1235_v12 = vmul.f32 %v2738_v41, %v1234_v45 }
 0xd76   : > { %v1236_v46 = vmul.f32 0.5, %v1235_v12 }
 0xd78   : > { %v1237_v47 = vsub.f32 1.5, %v1236_v46 }
 0xd7a   : > { %v1238_v48 = vmul.f32 %v2738_v41, %v1237_v47 }
 0xd7c   : > { %v1242_v50 = vsel %vm1241_vm8, %v2738_v41, %v1238_v48 }
 0xd7d   : > { %v1244_v51 = vmul.f32 %v1242_v50, %v3659_v43 }
 0xd7f   : > { %v1249_v55 = vmul.f32 %v3671_v61, %v1244_v51  ;;  %v2698_v61 = vld [vmem:[%s3858_s30 + $0x1] ss:$0 sm:$0xff] }
 0xd80   : > { %v2025_v44 = vpop.f32.mrf.mxu0  ;;  %v2045_v42 = vpop.f32.mrf.mxu1  ;;  %v1645_v1 = vadd.f32 %v2698_v61, %v3622_v8 }
 0xd81   : > { %v1254_v58 = vadd.f32 %v3674_v52, %v1249_v55  ;;  %v2026_v59 = vadd.f32 %v2025_v44, %v2001_v53  ;;  %v2046_v31 = vadd.f32 %v2045_v42, %v2002_v21 }
 0xd82   : > { %v1665_v3 = vadd.f32 %v3617_v60, %v1645_v1 }
 0xd83   : > { %1256 = vst [vmem:[%s3681_s18 + $0x8] sm:$0xff] %v1254_v58  ;;  %v2048_v35 = vmax.f32 %v2026_v59, 0.0  ;;  %v2049_v33 = vmax.f32 %v2046_v31, 0.0 }
 0xd84   : > { %v1667_v16 = vadd.f32 %v1665_v3, %v3604_v13 }
 0xd85   : > { %2104 = vmatmul.f32.vlgmr.msra.gmra.mxu2 %v2048_v35  ;;  %2124 = vmatmul.f32.vlgmr.msrb.gmra.mxu3 %v2049_v33 }
 0xe08   : > { %v2105_v43 = vpop.f32.mrf.mxu2  ;;  %v2125_v63 = vpop.f32.mrf.mxu3 }
 0xe09   : > { %v2106_v62 = vadd.f32 %v2704_v17, %v2105_v43 }
 0xe0b   : > { %v2126_v0 = vadd.f32 %v2125_v63, %v2106_v62 }
 0xe0d   : > { %v2129_v52 = vrot.slane %v2126_v0, 4 }
 0xe0f   : > { %v2131_v56 = vadd.f32 %v2129_v52, %v3669_v57 }
 0xe11   : > { %v2136_v2 = vsel %vm1934_vm15, %v2131_v56, 0.0 }
 0xe12   : > { %2137 = vadd.xlane.f32.xlu1 %v2136_v2 }
 0xe1a   : > { %1672 = vadd.xlane.f32.xlu1 %v1667_v16 }
 0xe85   : > { %v2138_v4 = vpop.xlane.xlu1 %2137 }
 0xe86   : > { %v2139_v5 = vmul.f32 %v2138_v4, %v3532_v9 }
 0xe88   : > { %v3702_v6 = vsub.f32 %v2131_v56, %v2139_v5 }
 0xe8a   : > { %v2141_v8 = vmul.f32 %v3702_v6, %v3702_v6 }
 0xe8c   : > { %v2142_v57 = vsel %vm1934_vm15, %v2141_v8, 0.0 }
 0xe8d   : > { %2143 = vadd.xlane.f32.xlu2 %v2142_v57  ;;  %v1673_v7 = vpop.xlane.xlu1 %1672 }
 0xe8e   : > { %v1674_v60 = vmul.f32 %v1673_v7, %v3532_v9 }
 0xe90   : > { %v3708_v10 = vsub.f32 %v1667_v16, %v1674_v60 }
 0xe92   : > { %v1676_v13 = vmul.f32 %v3708_v10, %v3708_v10 }
 0xe94   : > { %1677 = vadd.xlane.f32.xlu1 %v1676_v13 }
 0xe95   : > { %3071 = shalt.err (!%p3068_p10)
}
 0xe96   : > { %2569 = dma.vmem_to_hbm [thread:$0]  (%p3430_p4), %s2216_s2, 128, %s2218_s17, %s3722_s10  }
 0xe97   : > { %s2198_s25 = sshll.u32 %s3519_s5, 4  ;;  %s2200_s27 = sshll.u32 %s2197_s4, 4  ;;  %s2199_s25 = int_to_ptr.vmem [resolvable:$true] %s2198_s25  ;;  %s2201_s27 = int_to_ptr.hbm [resolvable:$true] %s2200_s27 }
 0xe98   : > { %s2173_s20 = scalar_lea.sflag [#allocation4], %s3464_s0  ;;  %s3086_s9 = sshra.s32 %s2201_s27, 4  ;;  %s3087_s9 = int_to_ptr.hbm [resolvable:$true] %s3086_s9 }
 0xe99   : > { %s3088_s6 = scalar_lea.hbm %s3087_s9, 16  ;;  %s3092_s7 = scalar_lea.hbm %s3861_s8, 32 }
 0xe9a   : > { %p3089_p13 = scmp.ne.s32.totalorder %s3087_s9, %s3088_s6  ;;  %p3093_p2 = scmp.lt.s32.totalorder %s3087_s9, %s3861_s8 }
 0xe9b   : > { %p3094_p1 = scmp.lt.s32.totalorder %s3092_s7, %s3088_s6 }
 0xe9c   : > { %p3090_p11 = pnand %p3089_p13, %p3430_p4 }
 0xe9d   : > { %p3095_p3 = por %p3094_p1, %p3093_p2 }
 0xe9e   : > { %p3091_p0 = pneg %p3090_p11 }
 0xea0   : > { %p3096_p5 = pnand %p3095_p3, %p3091_p0 }
 0xea2   : > { %3099 = shalt.err (!%p3096_p5)
}
 0xea3   : > { %s3213_s4 = smov 128   ;;  %s3214_s0 = smov 8  }
 0xea4   : > { %2568 = dma.vmem_to_hbm [thread:$0]  (%p3430_p4), %s2199_s25, 256, %s2201_s27, %s2173_s20, %s3213_s4, %s3213_s4, %s3214_s0  }
 0xea5   : > { %s2524_s5 = sshll.u32 %s3324_s28, 2  ;;  %s2229_s2 = sshll.u32 %s3626_s11, 4  ;;  %s2230_s2 = int_to_ptr.vmem [resolvable:$true] %s2229_s2 }
 0xea6   : > { %s3862_s12 = sld [smem:[#allocation47_spill]] }
 0xeac   : > { %s2227_s16 = scalar_lea.hbm %s3862_s12, %s2524_s5  ;;  %s3120_s25 = scalar_lea.hbm %s3862_s12, 8 }
 0xead   : > { %s2231_s9 = sshll.u32 %s2227_s16, 4  ;;  %s2232_s9 = int_to_ptr.hbm [resolvable:$true] %s2231_s9 }
 0xeae   : > { %s3114_s6 = sshra.s32 %s2232_s9, 4  ;;  %s3115_s6 = int_to_ptr.hbm [resolvable:$true] %s3114_s6 }
 0xeaf   : > { %s3116_s7 = scalar_lea.hbm %s3115_s6, 4  ;;  %p3121_p9 = scmp.lt.s32.totalorder %s3115_s6, %s3862_s12 }
 0xeb0   : > { %p3117_p12 = scmp.ne.s32.totalorder %s3115_s6, %s3116_s7  ;;  %p3122_p10 = scmp.lt.s32.totalorder %s3120_s25, %s3116_s7 }
 0xeb2   : > { %p3118_p7 = pnand %p3117_p12, %p3430_p4  ;;  %p3123_p13 = por %p3122_p10, %p3121_p9 }
 0xeb4   : > { %p3119_p8 = pneg %p3118_p7 }
 0xeb6   : > { %p3124_p11 = pnand %p3123_p13, %p3119_p8 }
 0xeb8   : > { %3127 = shalt.err (!%p3124_p11)
}
 0xeb9   : > { %2570 = dma.vmem_to_hbm [thread:$0]  (%p3430_p4), %s2230_s2, 64, %s2232_s9, %s3722_s10   ;;  %v2705_v29 = vld [vmem:[#allocation16 + $0x2] ss:$0 sm:$0xff]  ;;  %v2706_v34 = vld [vmem:[#allocation17 + $0x2] ss:$0 sm:$0xff] }
 0xeba   : > { %v2707_v41 = vld [vmem:[#allocation16 + $0x1] ss:$0 sm:$0xff]  ;;  %v2708_v12 = vld [vmem:[#allocation17 + $0x1] ss:$0 sm:$0xff] }
 0xf00   : > { %v2144_v11 = vpop.xlane.xlu2 %2143 }
 0xf01   : > { %v2145_v14 = vmul.f32 %v2144_v11, %v3532_v9 }
 0xf03   : > { %v2146_v15 = vadd.f32 1e-05, %v2145_v14 }
 0xf05   : > { %2739 = vrsqrt.f32 %v2146_v15  ;;  %vm2153_vm10 = vweird.f32 %v2146_v15 }
 0xf07   : > { %v1678_v18 = vpop.xlane.xlu1 %1677 }
 0xf08   : > { %v1679_v54 = vmul.f32 %v1678_v18, %v3532_v9 }
 0xf0a   : > { %v1680_v19 = vadd.f32 1e-05, %v1679_v54 }
 0xf0b   : > { %v2740_v20 = vpop.eup %2739 }
 0xf0c   : > { %v2148_v22 = vmul.f32 %v2740_v20, %v2146_v15  ;;  %2741 = vrsqrt.f32 %v1680_v19  ;;  %vm2154_vm9 = vweird.f32 %v2740_v20  ;;  %vm1687_vm13 = vweird.f32 %v1680_v19 }
 0xf0d   : > { %vm2155_vm11 = vmor %vm2153_vm10, %vm2154_vm9 }
 0xf0e   : > { %v2149_v23 = vmul.f32 %v2740_v20, %v2148_v22 }
 0xf10   : > { %v2150_v24 = vmul.f32 0.5, %v2149_v23 }
 0xf12   : > { %v2742_v25 = vpop.eup %2741  ;;  %v2151_v26 = vsub.f32 1.5, %v2150_v24 }
 0xf13   : > { %v1682_v27 = vmul.f32 %v2742_v25, %v1680_v19  ;;  %vm1688_vm12 = vweird.f32 %v2742_v25 }
 0xf14   : > { %v2152_v28 = vmul.f32 %v2740_v20, %v2151_v26  ;;  %vm1689_vm14 = vmor %vm1687_vm13, %vm1688_vm12 }
 0xf15   : > { %v1683_v30 = vmul.f32 %v2742_v25, %v1682_v27 }
 0xf16   : > { %v2156_v32 = vsel %vm2155_vm11, %v2740_v20, %v2152_v28 }
 0xf17   : > { %v2157_v9 = vmul.f32 %v2156_v32, %v3702_v6  ;;  %v1684_v36 = vmul.f32 0.5, %v1683_v30 }
 0xf19   : > { %v2161_v37 = vmul.f32 %v2705_v29, %v2157_v9  ;;  %v1685_v38 = vsub.f32 1.5, %v1684_v36 }
 0xf1b   : > { %v2165_v39 = vadd.f32 %v2706_v34, %v2161_v37  ;;  %v1686_v40 = vmul.f32 %v2742_v25, %v1685_v38 }
 0xf1d   : > { %2166 = vst [vmem:[%s3681_s18 + $0x14] sm:$0xf0] %v2165_v39  ;;  %v1690_v45 = vsel %vm1689_vm14, %v2742_v25, %v1686_v40 }
 0xf1e   : > { %v1691_v46 = vmul.f32 %v1690_v45, %v3708_v10 }
 0xf20   : > { %v1695_v47 = vmul.f32 %v2707_v41, %v1691_v46 }
 0xf22   : > { %v1699_v48 = vadd.f32 %v2708_v12, %v1695_v47 }
 0xf24   : > { %1700 = vst [vmem:[%s3681_s18 + $0x10] sm:$0xff] %v1699_v48 }
 0xf25 PF: > { %s2251_s10 = sand.u32 1, %s3178_s21   ;;  %p3863_p4 = scmp.ge.s32.totalorder %s3190_s24, 2 }
 0xf26   : > { %s2252_s26 = scalar_lea.sflag [#allocation4], %s2251_s10 }
 0xf27   : > { %p2607_p0 = pnand %p3863_p4, %p3434_p6 }
 0xf29   : > { %p2608_p2 = pneg %p2607_p0 }
 0xf2b   : > { %3169 = dma.done.wait (%p2608_p2), %s2252_s26, 256  }
 0xf2c   : > { %3171 = vsyncadd (%p2608_p2), %s2252_s26, 4294967040  ;;  %s3864_s27 = sadd.s32 4294967294, %s3190_s24  }
 0xf2d   : > { %s2261_s20 = sand.u32 1, %s3864_s27  }
 0xf2e   : > { %s2262_s4 = scalar_lea.sflag [#allocation21], %s2261_s20 }
 0xf2f   : > { %3173 = dma.done.wait (%p2608_p2), %s2262_s4, 192  }
 0xf30   : > { %3175 = vsyncadd (%p2608_p2), %s2262_s4, 4294967104  ;;  %p38_p1 = scmp.ge.s32.totalorder %s3402_s1, 4   ;;  %s3865_s21 = smov %s3182_s22 }
 0xf31   : > { %s3866_s22 = smov %s3186_s23  ;;  %s3867_s23 = smov %s3413_s3 }
 0xf32   : > { %s3868_s24 = smov %s3402_s1  ;;  %40 = sbr.rel (!%p38_p1) target bundleno = 30 (0x1e), region = 221 }
 0xf37   :  { %2278 = vsyncpa [#allocation3], 1 }
 0xf38   :  { %2280 = vsyncpa [#allocation3 + $0x1], 1 }
 0xf39   :  { %2281 = vsyncpa [#allocation6], 1 }
 0xf3a   :  { %2282 = vsyncpa [#allocation9], 1 }
 0xf3b   :  { %2283 = vsyncpa [#allocation12], 1 }
 0xf3c   :  { %2284 = vsyncpa [#allocation15], 1 }
 0xf3d   :  { %2285 = vsyncpa [#allocation18], 1 }
 0xf3e   :  { %2286 = vsyncpa [#allocation4], 1 }
 0xf3f   :  { %2288 = vsyncpa [#allocation4 + $0x1], 1 }
 0xf40   :  { %2289 = vsyncpa [#allocation21], 1 }
 0xf41   :  { %2291 = vsyncpa [#allocation21 + $0x1], 1 }

</bundles_post_ra>
